<compile_context>
chip_gen: v7x
topology: tpu7x:2x2x1
jax: 0.10.0
libtpu: 0.0.40
codegen_flags: <defaults>
</compile_context>

<pallas_src>
import functools

import jax
import jax.numpy as jnp
import numpy as np
from jax.experimental import pallas as pl
from jax.experimental.pallas import tpu as pltpu

ACT_SLOPE = 0.01        # nn.LeakyReLU() default used by HeteroGNN.activation
GAT_SLOPE = 0.2         # GATConv attention LeakyReLU slope
NEG_INF = -1e30

NODE_DICT = {"proposal": 16, "branch": 12}
REL_PP = ("proposal", "edge", "proposal")
REL_BP = ("branch", "edge", "proposal")
REL_BB = ("branch", "edge", "branch")
RELATIONS = (REL_PP, REL_BP, REL_BB)
EDGE_DICT = {REL_PP: 10, REL_BP: 10, REL_BB: 10}

HIDDEN = 2 * max(NODE_DICT.values())      # scale_hidden_dim * max node dim = 32
HEADS_1 = HEADS_2 = 1                     # module defaults
OUTPUT_DIM = HEADS_1 * HEADS_2 * HIDDEN   # 32


def _round_up(x, m):
    return ((x + m - 1) // m) * m


def _leaky(x, slope):
    return jnp.where(x >= 0, x, slope * x)


# ---------------------------------------------------------------------------
# slab layouts: every section starts on an 8-row (sublane) boundary, column 0.
# ---------------------------------------------------------------------------
class _Layout:
    def __init__(self):
        self.sections = {}
        self.rows = 0

    def add(self, name, nrows, ncols):
        self.sections[name] = (self.rows, nrows, ncols)
        self.rows += _round_up(max(nrows, 1), 8)


# ---------------------------------------------------------------------------
# fused kernel: whole forward pass for ONE graph per grid step, all in VMEM
# ---------------------------------------------------------------------------
def _hetero_gnn_kernel(const_ref, feat_ref, struct_ref, out_ref, h_scratch, *, cfg):
    NP, NB, ET, C = cfg["NP"], cfg["NB"], cfg["ET"], cfg["C"]
    NN = NP + NB
    cl, sl = cfg["const_sections"], cfg["struct_sections"]

    def cs(name):                       # static slice into the shared constant slab
        r0, nr, nc = cl[name]
        return const_ref[r0:r0 + nr, 0:nc]

    def ss(name):                       # static slice into the per-graph structure slab
        r0, nr, nc = sl[name]
        return struct_ref[r0:r0 + nr, 0:nc]

    # ---- input Linears (nodes + edges) -> LeakyReLU, ONE matmul ------------------
    h_full = _leaky(
        jnp.dot(feat_ref[...], cs("W_IN"), preferred_element_type=jnp.float32)
        + cs("B_IN"), ACT_SLOPE)                                       # [NN+ET, 5C]

    # att_edge.(W_e e) scores for BOTH conv layers and all relations, one matmul
    ae_all = jnp.dot(h_full[NN:NN + ET, :], cs("V_AE"),
                     preferred_element_type=jnp.float32)               # [ET, 8]

    # ---- structure constants (host precomputed, reused by both conv layers) ------
    d_pp, d_bp, d_bb = ss("D_PP"), ss("D_BP"), ss("D_BB")
    s_pp, s_bp, s_bb = ss("S_PP"), ss("S_BP"), ss("S_BB")
    k_pp, k_bp, k_bb = ss("MASK_PP"), ss("MASK_BP"), ss("MASK_BB")
    m_pp, m_bb = ss("M_PP"), ss("M_BB")
    eye_p, eye_b = cs("EYE_P"), cs("EYE_B")

    def gat(xs, a_s, a_d, ae, d_mat, s_mat, mask, bias, self_blend):
        # per-edge (source + edge-attr) score, densified with MXU matmuls
        t_e = jnp.dot(s_mat, a_s, preferred_element_type=jnp.float32) + ae    # [ET,1]
        dense = jnp.dot(d_mat, t_e * s_mat, preferred_element_type=jnp.float32)  # [Nd,Ns]
        if self_blend is not None:       # add_self_loops(fill_value="mean"), same-type only
            m_mean, eye = self_blend
            t_self = a_s + jnp.dot(m_mean, ae, preferred_element_type=jnp.float32)
            dense = dense + t_self * eye
        scores = _leaky(a_d + dense, GAT_SLOPE)
        scores = jnp.where(mask > 0, scores, NEG_INF)
        row_max = jnp.max(scores, axis=-1, keepdims=True)
        p = jnp.exp(scores - row_max) * mask
        den = jnp.sum(p, axis=-1, keepdims=True)
        alpha = p / jnp.where(den > 0, den, 1.0)      # rows w/o edges -> alpha = 0 (PyG)
        return jnp.dot(alpha, xs, preferred_element_type=jnp.float32) + bias

    def conv(w_key, b_key, ae_col0, need_branch):
        h_all = h_scratch[...]                                              # [NN, C]
        # ONE matmul: all three source projections + all six attention scalars
        hc = jnp.dot(h_all, cs(w_key), preferred_element_type=jnp.float32)  # [NN, 4C+8]
        biases = cs(b_key)                                                  # [3, C]
        q0 = 4 * C
        xs_pp = hc[0:NP, 0:C]
        xs_bp = hc[NP:NN, C:2 * C]
        xs_bb = hc[NP:NN, 2 * C:3 * C]
        a_s_pp = hc[0:NP, q0 + 0:q0 + 1]
        a_d_pp = hc[0:NP, q0 + 1:q0 + 2]
        a_d_bp = hc[0:NP, q0 + 2:q0 + 3]
        a_s_bp = hc[NP:NN, q0 + 3:q0 + 4]
        a_s_bb = hc[NP:NN, q0 + 4:q0 + 5]
        a_d_bb = hc[NP:NN, q0 + 5:q0 + 6]

        out_pp = gat(xs_pp, a_s_pp, a_d_pp, ae_all[:, ae_col0 + 0:ae_col0 + 1],
                     d_pp, s_pp, k_pp, biases[0:1, :], (m_pp, eye_p))
        out_bp = gat(xs_bp, a_s_bp, a_d_bp, ae_all[:, ae_col0 + 1:ae_col0 + 2],
                     d_bp, s_bp, k_bp, biases[1:2, :], None)
        hp = out_pp + out_bp             # HeteroConv(aggr="sum") on 'proposal'
        hb = None
        if need_branch:                  # layer-2 branch output never reaches the head
            hb = gat(xs_bb, a_s_bb, a_d_bb, ae_all[:, ae_col0 + 2:ae_col0 + 3],
                     d_bb, s_bb, k_bb, biases[2:3, :], (m_bb, eye_b))
        return hp, hb

    # layer inputs are assembled in a VMEM scratch [NN, C] (cheap ref stores, no concat)
    h_scratch[0:NP, :] = h_full[0:NP, 0:C]
    h_scratch[NP:NN, :] = h_full[NP:NN, C:2 * C]
    hp1, hb1 = conv("W_CAT1", "BIAS1", 0, True)

    h_scratch[0:NP, :] = hp1
    h_scratch[NP:NN, :] = hb1
    hp2, _ = conv("W_CAT2", "BIAS2", 3, False)

    # lane-dense pre-head output; the [32,1] head is applied outside the kernel
    out_ref[...] = hp2.astype(out_ref.dtype)


def build_forward(dims, const_sections, struct_sections):
    NP, NB, C = dims["NP"], dims["NB"], dims["C"]
    NN = NP + NB
    cfg = {"NP": NP, "NB": NB, "ET": dims["ET"], "C": C,
           "const_sections": const_sections, "struct_sections": struct_sections}
    kernel = functools.partial(_hetero_gnn_kernel, cfg=cfg)

    def fwd(const_slab, feat_slab, struct_slab, head_w, head_b):
        B, nrf, fw = feat_slab.shape
        _, nrs, sw = struct_slab.shape
        rc, cw = const_slab.shape
        pre = pl.pallas_call(
            kernel,
            out_shape=jax.ShapeDtypeStruct((B, NP, C), jnp.float32),
            grid=(B,),
            in_specs=[
                pl.BlockSpec((rc, cw), lambda b: (0, 0)),          # shared constants
                pl.BlockSpec((None, nrf, fw), lambda b: (b, 0, 0)),  # per-graph features
                pl.BlockSpec((None, nrs, sw), lambda b: (b, 0, 0)),  # per-graph structure
            ],
            out_specs=pl.BlockSpec((None, NP, C), lambda b: (b, 0, 0)),
            scratch_shapes=[pltpu.VMEM((NN, C), jnp.float32)],
            compiler_params=pltpu.CompilerParams(
                dimension_semantics=("parallel",)),
        )(const_slab, feat_slab, struct_slab)
        # final Linear(hidden, 1) head outside the kernel (keeps the store path lane-dense)
        return jnp.einsum("bnc,co->bno", pre, head_w) + head_b

    return jax.jit(fwd)


# ---------------------------------------------------------------------------
# host-side packing (one-time, outside the timed path)
# ---------------------------------------------------------------------------
def compute_dims(graphs):
    NP = _round_up(max(g["x"]["proposal"].shape[0] for g in graphs), 8)
    NB = _round_up(max(g["x"]["branch"].shape[0] for g in graphs), 8)
    e_pad = {r: _round_up(max(g["edge_index"][r].shape[1] for g in graphs), 8)
             for r in RELATIONS}
    return {"NP": NP, "NB": NB, "E_PAD": e_pad, "ET": sum(e_pad.values()),
            "FW": max(max(NODE_DICT.values()), max(EDGE_DICT.values())),
            "C": HIDDEN}


def pack_const(params, dims):
    """All weights + batch-independent constants -> ONE lane-dense f32 slab."""
    NP, NB, FW, C = dims["NP"], dims["NB"], dims["FW"], dims["C"]
    CW = _round_up(max(5 * C, 4 * C + 8, NP, NB), 128)

    lay = _Layout()
    lay.add("W_IN", FW, 5 * C)        # [wn_p | wn_b | we_pp | we_bp | we_bb]
    lay.add("B_IN", 1, 5 * C)
    lay.add("V_AE", 5 * C, 8)         # att_edge.(W_e .) columns, 2 layers x 3 relations
    lay.add("W_CAT1", C, 4 * C + 8)   # [w_src_pp | w_src_bp | w_src_bb | 0 | Q1]
    lay.add("BIAS1", 3, C)
    lay.add("W_CAT2", C, 4 * C + 8)
    lay.add("BIAS2", 3, C)
    lay.add("EYE_P", NP, NP)
    lay.add("EYE_B", NB, NB)

    slab = np.zeros((_round_up(lay.rows, 8), CW), np.float32)

    def put(name, arr):
        r0, nr, nc = lay.sections[name]
        a = np.asarray(arr, np.float32)
        assert a.shape == (nr, nc), (name, a.shape, (nr, nc))
        slab[r0:r0 + nr, 0:nc] = a

    def pad_rows(w, rows):
        w = np.asarray(w, np.float32)
        out = np.zeros((rows, w.shape[1]), np.float32)
        out[: w.shape[0]] = w
        return out

    w_in = np.concatenate(
        [pad_rows(params["node_lin"]["proposal"]["w"], FW),
         pad_rows(params["node_lin"]["branch"]["w"], FW),
         pad_rows(params["edge_lin"][REL_PP]["w"], FW),
         pad_rows(params["edge_lin"][REL_BP]["w"], FW),
         pad_rows(params["edge_lin"][REL_BB]["w"], FW)], axis=1)
    b_in = np.concatenate(
        [np.asarray(params["node_lin"]["proposal"]["b"]),
         np.asarray(params["node_lin"]["branch"]["b"]),
         np.asarray(params["edge_lin"][REL_PP]["b"]),
         np.asarray(params["edge_lin"][REL_BP]["b"]),
         np.asarray(params["edge_lin"][REL_BB]["b"])])[None, :]
    put("W_IN", w_in)
    put("B_IN", b_in)

    v_ae = np.zeros((5 * C, 8), np.float32)
    for li, conv_key in enumerate(("conv1", "conv2")):
        for ri, rel in enumerate(RELATIONS):
            p = params[conv_key][rel]
            v = np.asarray(p["w_edge"]) @ np.asarray(p["att_edge"])      # [C]
            v_ae[(2 + ri) * C:(3 + ri) * C, 3 * li + ri] = v
    put("V_AE", v_ae)

    def cat_layer(conv):
        pp, bp, bb = conv[REL_PP], conv[REL_BP], conv[REL_BB]
        w = np.zeros((C, 4 * C + 8), np.float32)
        w[:, 0:C] = np.asarray(pp["w_src"])
        w[:, C:2 * C] = np.asarray(bp["w_src"])
        w[:, 2 * C:3 * C] = np.asarray(bb["w_src"])
        q0 = 4 * C                 # att_src / att_dst folded into the projection (MXU)
        w[:, q0 + 0] = np.asarray(pp["w_src"]) @ np.asarray(pp["att_src"])
        w[:, q0 + 1] = np.asarray(pp["w_src"]) @ np.asarray(pp["att_dst"])
        w[:, q0 + 2] = np.asarray(bp["w_dst"]) @ np.asarray(bp["att_dst"])
        w[:, q0 + 3] = np.asarray(bp["w_src"]) @ np.asarray(bp["att_src"])
        w[:, q0 + 4] = np.asarray(bb["w_src"]) @ np.asarray(bb["att_src"])
        w[:, q0 + 5] = np.asarray(bb["w_src"]) @ np.asarray(bb["att_dst"])
        bias = np.stack([np.asarray(pp["bias"]), np.asarray(bp["bias"]),
                         np.asarray(bb["bias"])], axis=0)
        return w, bias

    w1, bias1 = cat_layer(params["conv1"])
    w2, bias2 = cat_layer(params["conv2"])
    put("W_CAT1", w1)
    put("BIAS1", bias1)
    put("W_CAT2", w2)
    put("BIAS2", bias2)
    put("EYE_P", np.eye(NP, dtype=np.float32))
    put("EYE_B", np.eye(NB, dtype=np.float32))
    return jnp.asarray(slab), lay.sections


def build_struct_layout(dims):
    NP, NB, ET = dims["NP"], dims["NB"], dims["ET"]
    lay = _Layout()
    lay.add("D_PP", NP, ET)
    lay.add("D_BP", NP, ET)
    lay.add("D_BB", NB, ET)
    lay.add("M_PP", NP, ET)
    lay.add("M_BB", NB, ET)
    lay.add("S_PP", ET, NP)
    lay.add("S_BP", ET, NB)
    lay.add("S_BB", ET, NB)
    lay.add("MASK_PP", NP, NP)
    lay.add("MASK_BP", NP, NB)
    lay.add("MASK_BB", NB, NB)
    return lay


def pack_graph(graph, dims, struct_lay):
    NP, NB, ET, FW = dims["NP"], dims["NB"], dims["ET"], dims["FW"]
    e_pad = dims["E_PAD"]
    SW = _round_up(max(ET, NP, NB), 128)

    # feature slab rows: [proposal nodes | branch nodes | PP edges | BP edges | BB edges]
    feat = np.zeros((NP + NB + ET, FW), np.float32)
    xp = np.asarray(graph["x"]["proposal"], np.float32)
    xb = np.asarray(graph["x"]["branch"], np.float32)
    feat[0:xp.shape[0], 0:xp.shape[1]] = xp
    feat[NP:NP + xb.shape[0], 0:xb.shape[1]] = xb
    e_off, off = {}, NP + NB
    for rel in RELATIONS:
        ea = np.asarray(graph["edge_attr"][rel], np.float32)
        feat[off:off + ea.shape[0], 0:ea.shape[1]] = ea
        e_off[rel] = off - (NP + NB)
        off += e_pad[rel]

    struct = np.zeros((_round_up(struct_lay.rows, 8), SW), np.float32)

    def put(name, arr):
        r0, nr, nc = struct_lay.sections[name]
        assert arr.shape == (nr, nc), (name, arr.shape, (nr, nc))
        struct[r0:r0 + nr, 0:nc] = arr

    n_src = {REL_PP: NP, REL_BP: NB, REL_BB: NB}
    n_dst = {REL_PP: NP, REL_BP: NP, REL_BB: NB}
    mats = {}
    for rel in RELATIONS:
        ei = np.asarray(graph["edge_index"][rel])
        src, dst = ei[0], ei[1]
        if rel[0] == rel[2]:
            assert not np.any(src == dst), "raw self-loops unsupported (dense formulation)"
        d = np.zeros((n_dst[rel], ET), np.float32)
        s = np.zeros((ET, n_src[rel]), np.float32)
        g = e_off[rel] + np.arange(ei.shape[1])
        d[dst, g] = 1.0
        s[g, src] = 1.0
        adj = d @ s
        assert np.max(adj) <= 1.0, "parallel (duplicate) edges unsupported"
        mats[rel] = (d, s, (adj > 0).astype(np.float32))

    d_pp, s_pp, k_pp = mats[REL_PP]
    d_bp, s_bp, k_bp = mats[REL_BP]
    d_bb, s_bb, k_bb = mats[REL_BB]
    k_pp = np.maximum(k_pp, np.eye(NP, dtype=np.float32))   # add_self_loops (same-type)
    k_bb = np.maximum(k_bb, np.eye(NB, dtype=np.float32))
    m_pp = d_pp / np.maximum(d_pp.sum(axis=1, keepdims=True), 1.0)   # mean self-loop fill
    m_bb = d_bb / np.maximum(d_bb.sum(axis=1, keepdims=True), 1.0)

    put("D_PP", d_pp)
    put("D_BP", d_bp)
    put("D_BB", d_bb)
    put("M_PP", m_pp)
    put("M_BB", m_bb)
    put("S_PP", s_pp)
    put("S_BP", s_bp)
    put("S_BB", s_bb)
    put("MASK_PP", k_pp)
    put("MASK_BP", k_bp)
    put("MASK_BB", k_bb)
    return feat, struct


def pack_batch(graphs, dims):
    lay = build_struct_layout(dims)
    feats, structs = [], []
    for g in graphs:
        f, s = pack_graph(g, dims, lay)
        feats.append(f)
        structs.append(s)
    return jnp.asarray(np.stack(feats)), jnp.asarray(np.stack(structs)), lay.sections


# ---------------------------------------------------------------------------
# deterministic parameter init (matches module layer shapes)
# ---------------------------------------------------------------------------
def init_params(key):
    keys = iter(jax.random.split(key, 64))

    def w(shape):
        return jax.random.normal(next(keys), shape, jnp.float32) * 0.1

    def gat(f_src, f_dst, c, e_dim, shared):
        p = {"w_src": w((f_src, c)),
             "att_src": w((c,)), "att_dst": w((c,)),
             "w_edge": w((e_dim, c)), "att_edge": w((c,)),
             "bias": w((c,))}
        if not shared:
            p["w_dst"] = w((f_dst, c))
        return p

    return {
        "node_lin": {k: {"w": w((d, HIDDEN)), "b": w((HIDDEN,))}
                     for k, d in NODE_DICT.items()},
        "edge_lin": {r: {"w": w((d, HIDDEN)), "b": w((HIDDEN,))}
                     for r, d in EDGE_DICT.items()},
        "conv1": {
            REL_PP: gat(HIDDEN, HIDDEN, HEADS_1 * HIDDEN, HIDDEN, shared=True),
            REL_BP: gat(HIDDEN, HIDDEN, HEADS_1 * HIDDEN, HIDDEN, shared=False),
            REL_BB: gat(HIDDEN, HIDDEN, HEADS_1 * HIDDEN, HIDDEN, shared=True),
        },
        "conv2": {
            REL_PP: gat(HEADS_1 * HIDDEN, HEADS_1 * HIDDEN, OUTPUT_DIM, HIDDEN, shared=True),
            REL_BP: gat(HEADS_1 * HIDDEN, HEADS_1 * HIDDEN, OUTPUT_DIM, HIDDEN, shared=False),
            REL_BB: gat(HEADS_1 * HIDDEN, HEADS_1 * HIDDEN, OUTPUT_DIM, HIDDEN, shared=True),
        },
        "out": {"w": w((OUTPUT_DIM, 1)), "b": jnp.zeros((1,), jnp.float32)},
    }


# ---------------------------------------------------------------------------
# pure-JAX reference (previously validated formulation)
# ---------------------------------------------------------------------------
def _ref_linear(x, w, b, act=False):
    y = x @ w + b
    return jnp.where(y >= 0, y, ACT_SLOPE * y) if act else y


def _ref_gat(p, x_src, x_dst, edge_index, edge_attr, same_type):
    n_src, n_dst = x_src.shape[0], x_dst.shape[0]
    xs = x_src @ p["w_src"]
    xd = xs if same_type else x_dst @ p["w_dst"]
    a_s = xs @ p["att_src"]
    a_d = xd @ p["att_dst"]
    src, dst = edge_index[0], edge_index[1]
    a_e_edges = (edge_attr @ p["w_edge"]) @ p["att_edge"]
    a_e = jnp.zeros((n_dst, n_src), jnp.float32).at[dst, src].set(a_e_edges)
    mask = jnp.zeros((n_dst, n_src), jnp.float32).at[dst, src].set(1.0)
    if same_type:
        sums = jnp.zeros((n_dst, edge_attr.shape[1]), jnp.float32).at[dst].add(edge_attr)
        cnts = jnp.zeros((n_dst,), jnp.float32).at[dst].add(1.0)
        mean_attr = sums / jnp.maximum(cnts, 1.0)[:, None]
        a_self = (mean_attr @ p["w_edge"]) @ p["att_edge"]
        diag = jnp.arange(n_dst)
        a_e = a_e.at[diag, diag].set(a_self)
        mask = mask.at[diag, diag].set(1.0)
    scores = a_d[:, None] + a_s[None, :] + a_e
    scores = jnp.where(scores >= 0, scores, GAT_SLOPE * scores)
    scores = jnp.where(mask > 0, scores, -1e30)
    m = jnp.max(scores, axis=-1, keepdims=True)
    pmat = jnp.exp(scores - m) * mask
    denom = jnp.sum(pmat, axis=-1, keepdims=True)
    alpha = pmat * jnp.where(denom > 0, 1.0 / denom, 0.0)
    return alpha @ xs + p["bias"]


def reference_forward(params, x_dict, edge_index_dict, edge_attr_dict):
    x = {k: _ref_linear(x_dict[k], params["node_lin"][k]["w"],
                        params["node_lin"][k]["b"], act=True) for k in x_dict}
    ea = {r: _ref_linear(edge_attr_dict[r], params["edge_lin"][r]["w"],
                         params["edge_lin"][r]["b"], act=True) for r in edge_attr_dict}
    for conv_key in ("conv1", "conv2"):
        outs = {"proposal": [], "branch": []}
        for rel in RELATIONS:
            s, _, d = rel
            outs[d].append(_ref_gat(params[conv_key][rel], x[s], x[d],
                                    edge_index_dict[rel], ea[rel], s == d))
        x = {k: functools.reduce(lambda a, b: a + b, v) for k, v in outs.items()}
    return x["proposal"] @ params["out"]["w"] + params["out"]["b"]


# ---------------------------------------------------------------------------
# synthetic graphs
# ---------------------------------------------------------------------------
def make_edges(n_src, n_dst, offsets, same_type):
    src, dst = [], []
    for off in offsets:
        for s in range(n_src):
            d = (s + off) % n_dst
            if same_type and d == s:      # keep the raw edge list free of self-loops
                continue
            src.append(s)
            dst.append(d)
    return jnp.array([src, dst], dtype=jnp.int32)


if __name__ == "__main__":
    key = jax.random.PRNGKey(0)
    k_par, k_data = jax.random.split(key)
    params = init_params(k_par)

    N_PROP, N_BRANCH, B = 10, 14, 3
    pp_offsets = [(1, 2), (2, 3), (1, 4)]
    bp_offsets = [(0, 3), (1, 5), (2, 4)]
    bb_offsets = [(1, 4), (2, 5), (3, 6)]

    graphs = []
    for b, dk in enumerate(jax.random.split(k_data, B)):
        kx1, kx2, ke1, ke2, ke3 = jax.random.split(dk, 5)
        ei = {REL_PP: make_edges(N_PROP, N_PROP, pp_offsets[b], True),
              REL_BP: make_edges(N_BRANCH, N_PROP, bp_offsets[b], False),
              REL_BB: make_edges(N_BRANCH, N_BRANCH, bb_offsets[b], True)}
        graphs.append({
            "x": {"proposal": jax.random.normal(kx1, (N_PROP, NODE_DICT["proposal"]),
                                                jnp.float32),
                  "branch": jax.random.normal(kx2, (N_BRANCH, NODE_DICT["branch"]),
                                              jnp.float32)},
            "edge_index": ei,
            "edge_attr": {
                REL_PP: jax.random.normal(ke1, (ei[REL_PP].shape[1], EDGE_DICT[REL_PP]),
                                          jnp.float32),
                REL_BP: jax.random.normal(ke2, (ei[REL_BP].shape[1], EDGE_DICT[REL_BP]),
                                          jnp.float32),
                REL_BB: jax.random.normal(ke3, (ei[REL_BB].shape[1], EDGE_DICT[REL_BB]),
                                          jnp.float32),
            },
        })

    # one-time prep (outside the timed path): slab packing on the host
    dims = compute_dims(graphs)
    const_slab, const_sections = pack_const(params, dims)
    feat_slab, struct_slab, struct_sections = pack_batch(graphs, dims)
    head_w = jnp.asarray(params["out"]["w"])
    head_b = jnp.asarray(params["out"]["b"])

    forward = build_forward(dims, const_sections, struct_sections)
    out = jax.block_until_ready(
        forward(const_slab, feat_slab, struct_slab, head_w, head_b))

    assert out.shape == (B, dims["NP"], 1) and out.dtype == jnp.float32
    assert bool(jnp.all(jnp.isfinite(out[:, :N_PROP, :])))

    ref_fn = jax.jit(reference_forward)
    for b, g in enumerate(graphs):
        ref = jax.block_until_ready(
            ref_fn(params, g["x"], g["edge_index"], g["edge_attr"]))
        np.testing.assert_allclose(np.asarray(out[b, :N_PROP, :]), np.asarray(ref),
                                   rtol=5e-2, atol=1e-2)

    print("KERNEL_OK")
</pallas_src>

<mosaic_0001>
module attributes {stable_mosaic.version = 11 : i64} {
  func.func @_hetero_gnn_kernel(%arg0: i32, %arg1: memref<296x256xf32, #tpu.memory_space<vmem>>, %arg2: memref<1x120x16xf32, #tpu.memory_space<vmem>>, %arg3: memref<1x392x128xf32, #tpu.memory_space<vmem>>, %arg4: memref<1x16x32xf32, #tpu.memory_space<vmem>>, %arg5: memref<32x32xf32, #tpu.memory_space<vmem>>) attributes {dimension_semantics = [#tpu.dimension_semantics<parallel>], iteration_bounds = array<i64: 3>, scalar_prefetch = 0 : i64, scratch_operands = 1 : i64, tpu.core_type = #tpu.core_type<tc>, window_params = [{pipeline_mode = #tpu.pipeline_mode<synchronous>, transform_indices = @transform_0, window_bounds = array<i64: 296, 256>}, {transform_indices = @transform_1, window_bounds = array<i64: 1, 120, 16>}, {transform_indices = @transform_2, window_bounds = array<i64: 1, 392, 128>}, {transform_indices = @transform_3, window_bounds = array<i64: 1, 16, 32>}]} {
    %c0 = arith.constant 0 : index
    %c0_0 = arith.constant 0 : index
    %c0_1 = arith.constant 0 : index
    %0 = vector.load %arg2[%c0, %c0_0, %c0_1] : memref<1x120x16xf32, #tpu.memory_space<vmem>>, vector<1x120x16xf32>
    %1 = vector.shape_cast %0 : vector<1x120x16xf32> to vector<120x16xf32>
    %c0_2 = arith.constant 0 : index
    %c0_3 = arith.constant 0 : index
    %2 = vector.load %arg1[%c0_2, %c0_3] : memref<296x256xf32, #tpu.memory_space<vmem>>, vector<16x160xf32>
    %cst = arith.constant dense<0.000000e+00> : vector<120x160xf32>
    %3 = tpu.matmul %1, %2, %cst {dimension_numbers = #tpu.dot_dimension_numbers<[1], [0], [0], [1], [0, 0, 1, 1], [], []>} : vector<120x16xf32>, vector<16x160xf32>, vector<120x160xf32> -> vector<120x160xf32>
    %c16 = arith.constant 16 : index
    %c0_4 = arith.constant 0 : index
    %4 = vector.load %arg1[%c16, %c0_4] : memref<296x256xf32, #tpu.memory_space<vmem>>, vector<1x160xf32>
    %5 = vector.broadcast %4 : vector<1x160xf32> to vector<120x160xf32>
    %6 = arith.addf %3, %5 : vector<120x160xf32>
    %cst_5 = arith.constant 0.000000e+00 : f32
    %7 = vector.broadcast %cst_5 : f32 to vector<120x160xf32>
    %8 = arith.cmpf oge, %6, %7 : vector<120x160xf32>
    %cst_6 = arith.constant 0.00999999977 : f32
    %9 = vector.broadcast %cst_6 : f32 to vector<120x160xf32>
    %10 = arith.mulf %9, %6 : vector<120x160xf32>
    %11 = arith.select %8, %6, %10 : vector<120x160xi1>, vector<120x160xf32>
    %12 = vector.extract_strided_slice %11 {offsets = [32, 0], sizes = [88, 160], strides = [1, 1]} : vector<120x160xf32> to vector<88x160xf32>
    %c24 = arith.constant 24 : index
    %c0_7 = arith.constant 0 : index
    %13 = vector.load %arg1[%c24, %c0_7] : memref<296x256xf32, #tpu.memory_space<vmem>>, vector<160x8xf32>
    %cst_8 = arith.constant dense<0.000000e+00> : vector<88x8xf32>
    %14 = tpu.matmul %12, %13, %cst_8 {dimension_numbers = #tpu.dot_dimension_numbers<[1], [0], [0], [1], [0, 0, 1, 1], [], []>} : vector<88x160xf32>, vector<160x8xf32>, vector<88x8xf32> -> vector<88x8xf32>
    %c0_9 = arith.constant 0 : index
    %c0_10 = arith.constant 0 : index
    %c0_11 = arith.constant 0 : index
    %15 = vector.load %arg3[%c0_9, %c0_10, %c0_11] : memref<1x392x128xf32, #tpu.memory_space<vmem>>, vector<1x16x88xf32>
    %16 = vector.shape_cast %15 : vector<1x16x88xf32> to vector<16x88xf32>
    %c0_12 = arith.constant 0 : index
    %c16_13 = arith.constant 16 : index
    %c0_14 = arith.constant 0 : index
    %17 = vector.load %arg3[%c0_12, %c16_13, %c0_14] : memref<1x392x128xf32, #tpu.memory_space<vmem>>, vector<1x16x88xf32>
    %18 = vector.shape_cast %17 : vector<1x16x88xf32> to vector<16x88xf32>
    %c0_15 = arith.constant 0 : index
    %c32 = arith.constant 32 : index
    %c0_16 = arith.constant 0 : index
    %19 = vector.load %arg3[%c0_15, %c32, %c0_16] : memref<1x392x128xf32, #tpu.memory_space<vmem>>, vector<1x16x88xf32>
    %20 = vector.shape_cast %19 : vector<1x16x88xf32> to vector<16x88xf32>
    %c0_17 = arith.constant 0 : index
    %c80 = arith.constant 80 : index
    %c0_18 = arith.constant 0 : index
    %21 = vector.load %arg3[%c0_17, %c80, %c0_18] : memref<1x392x128xf32, #tpu.memory_space<vmem>>, vector<1x88x16xf32>
    %22 = vector.shape_cast %21 : vector<1x88x16xf32> to vector<88x16xf32>
    %c0_19 = arith.constant 0 : index
    %c168 = arith.constant 168 : index
    %c0_20 = arith.constant 0 : index
    %23 = vector.load %arg3[%c0_19, %c168, %c0_20] : memref<1x392x128xf32, #tpu.memory_space<vmem>>, vector<1x88x16xf32>
    %24 = vector.shape_cast %23 : vector<1x88x16xf32> to vector<88x16xf32>
    %c0_21 = arith.constant 0 : index
    %c256 = arith.constant 256 : index
    %c0_22 = arith.constant 0 : index
    %25 = vector.load %arg3[%c0_21, %c256, %c0_22] : memref<1x392x128xf32, #tpu.memory_space<vmem>>, vector<1x88x16xf32>
    %26 = vector.shape_cast %25 : vector<1x88x16xf32> to vector<88x16xf32>
    %c0_23 = arith.constant 0 : index
    %c344 = arith.constant 344 : index
    %c0_24 = arith.constant 0 : index
    %27 = vector.load %arg3[%c0_23, %c344, %c0_24] : memref<1x392x128xf32, #tpu.memory_space<vmem>>, vector<1x16x16xf32>
    %28 = vector.shape_cast %27 : vector<1x16x16xf32> to vector<16x16xf32>
    %c0_25 = arith.constant 0 : index
    %c360 = arith.constant 360 : index
    %c0_26 = arith.constant 0 : index
    %29 = vector.load %arg3[%c0_25, %c360, %c0_26] : memref<1x392x128xf32, #tpu.memory_space<vmem>>, vector<1x16x16xf32>
    %30 = vector.shape_cast %29 : vector<1x16x16xf32> to vector<16x16xf32>
    %c0_27 = arith.constant 0 : index
    %c376 = arith.constant 376 : index
    %c0_28 = arith.constant 0 : index
    %31 = vector.load %arg3[%c0_27, %c376, %c0_28] : memref<1x392x128xf32, #tpu.memory_space<vmem>>, vector<1x16x16xf32>
    %32 = vector.shape_cast %31 : vector<1x16x16xf32> to vector<16x16xf32>
    %c0_29 = arith.constant 0 : index
    %c48 = arith.constant 48 : index
    %c0_30 = arith.constant 0 : index
    %33 = vector.load %arg3[%c0_29, %c48, %c0_30] : memref<1x392x128xf32, #tpu.memory_space<vmem>>, vector<1x16x88xf32>
    %34 = vector.shape_cast %33 : vector<1x16x88xf32> to vector<16x88xf32>
    %c0_31 = arith.constant 0 : index
    %c64 = arith.constant 64 : index
    %c0_32 = arith.constant 0 : index
    %35 = vector.load %arg3[%c0_31, %c64, %c0_32] : memref<1x392x128xf32, #tpu.memory_space<vmem>>, vector<1x16x88xf32>
    %36 = vector.shape_cast %35 : vector<1x16x88xf32> to vector<16x88xf32>
    %c264 = arith.constant 264 : index
    %c0_33 = arith.constant 0 : index
    %37 = vector.load %arg1[%c264, %c0_33] : memref<296x256xf32, #tpu.memory_space<vmem>>, vector<16x16xf32>
    %c280 = arith.constant 280 : index
    %c0_34 = arith.constant 0 : index
    %38 = vector.load %arg1[%c280, %c0_34] : memref<296x256xf32, #tpu.memory_space<vmem>>, vector<16x16xf32>
    %39 = vector.extract_strided_slice %11 {offsets = [0, 0], sizes = [16, 32], strides = [1, 1]} : vector<120x160xf32> to vector<16x32xf32>
    %c0_35 = arith.constant 0 : index
    %c0_36 = arith.constant 0 : index
    %40 = vector.load %arg5[%c0_35, %c0_36] : memref<32x32xf32, #tpu.memory_space<vmem>>, vector<16x32xf32>
    tpu.vector_store %arg5[%c0_35, %c0_36], %39 {strides = array<i32>} : memref<32x32xf32, #tpu.memory_space<vmem>>, vector<16x32xf32>,
    %41 = vector.extract_strided_slice %11 {offsets = [16, 32], sizes = [16, 32], strides = [1, 1]} : vector<120x160xf32> to vector<16x32xf32>
    %c16_37 = arith.constant 16 : index
    %c0_38 = arith.constant 0 : index
    %42 = vector.load %arg5[%c16_37, %c0_38] : memref<32x32xf32, #tpu.memory_space<vmem>>, vector<16x32xf32>
    tpu.vector_store %arg5[%c16_37, %c0_38], %41 {strides = array<i32>} : memref<32x32xf32, #tpu.memory_space<vmem>>, vector<16x32xf32>,
    %c0_39 = arith.constant 0 : index
    %c0_40 = arith.constant 0 : index
    %43 = vector.load %arg5[%c0_39, %c0_40] : memref<32x32xf32, #tpu.memory_space<vmem>>, vector<32x32xf32>
    %c184 = arith.constant 184 : index
    %c0_41 = arith.constant 0 : index
    %44 = vector.load %arg1[%c184, %c0_41] : memref<296x256xf32, #tpu.memory_space<vmem>>, vector<32x136xf32>
    %cst_42 = arith.constant dense<0.000000e+00> : vector<32x136xf32>
    %45 = tpu.matmul %43, %44, %cst_42 {dimension_numbers = #tpu.dot_dimension_numbers<[1], [0], [0], [1], [0, 0, 1, 1], [], []>} : vector<32x32xf32>, vector<32x136xf32>, vector<32x136xf32> -> vector<32x136xf32>
    %c216 = arith.constant 216 : index
    %c0_43 = arith.constant 0 : index
    %46 = vector.load %arg1[%c216, %c0_43] : memref<296x256xf32, #tpu.memory_space<vmem>>, vector<3x32xf32>
    %47 = vector.extract_strided_slice %45 {offsets = [0, 0], sizes = [16, 32], strides = [1, 1]} : vector<32x136xf32> to vector<16x32xf32>
    %48 = vector.extract_strided_slice %45 {offsets = [16, 32], sizes = [16, 32], strides = [1, 1]} : vector<32x136xf32> to vector<16x32xf32>
    %49 = vector.extract_strided_slice %45 {offsets = [16, 64], sizes = [16, 32], strides = [1, 1]} : vector<32x136xf32> to vector<16x32xf32>
    %50 = vector.extract_strided_slice %45 {offsets = [0, 128], sizes = [16, 1], strides = [1, 1]} : vector<32x136xf32> to vector<16x1xf32>
    %51 = vector.extract_strided_slice %45 {offsets = [0, 129], sizes = [16, 1], strides = [1, 1]} : vector<32x136xf32> to vector<16x1xf32>
    %52 = vector.extract_strided_slice %45 {offsets = [0, 130], sizes = [16, 1], strides = [1, 1]} : vector<32x136xf32> to vector<16x1xf32>
    %53 = vector.extract_strided_slice %45 {offsets = [16, 131], sizes = [16, 1], strides = [1, 1]} : vector<32x136xf32> to vector<16x1xf32>
    %54 = vector.extract_strided_slice %45 {offsets = [16, 132], sizes = [16, 1], strides = [1, 1]} : vector<32x136xf32> to vector<16x1xf32>
    %55 = vector.extract_strided_slice %45 {offsets = [16, 133], sizes = [16, 1], strides = [1, 1]} : vector<32x136xf32> to vector<16x1xf32>
    %56 = vector.extract_strided_slice %14 {offsets = [0, 0], sizes = [88, 1], strides = [1, 1]} : vector<88x8xf32> to vector<88x1xf32>
    %57 = vector.extract_strided_slice %46 {offsets = [0, 0], sizes = [1, 32], strides = [1, 1]} : vector<3x32xf32> to vector<1x32xf32>
    %cst_44 = arith.constant dense<0.000000e+00> : vector<88x1xf32>
    %58 = tpu.matmul %22, %50, %cst_44 {dimension_numbers = #tpu.dot_dimension_numbers<[1], [0], [0], [1], [0, 0, 1, 1], [], []>} : vector<88x16xf32>, vector<16x1xf32>, vector<88x1xf32> -> vector<88x1xf32>
    %59 = arith.addf %58, %56 : vector<88x1xf32>
    %60 = vector.broadcast %59 : vector<88x1xf32> to vector<88x16xf32>
    %61 = arith.mulf %60, %22 : vector<88x16xf32>
    %cst_45 = arith.constant dense<0.000000e+00> : vector<16x16xf32>
    %62 = tpu.matmul %16, %61, %cst_45 {dimension_numbers = #tpu.dot_dimension_numbers<[1], [0], [0], [1], [0, 0, 1, 1], [], []>} : vector<16x88xf32>, vector<88x16xf32>, vector<16x16xf32> -> vector<16x16xf32>
    %cst_46 = arith.constant dense<0.000000e+00> : vector<16x1xf32>
    %63 = tpu.matmul %34, %56, %cst_46 {dimension_numbers = #tpu.dot_dimension_numbers<[1], [0], [0], [1], [0, 0, 1, 1], [], []>} : vector<16x88xf32>, vector<88x1xf32>, vector<16x1xf32> -> vector<16x1xf32>
    %64 = arith.addf %50, %63 : vector<16x1xf32>
    %65 = vector.broadcast %64 : vector<16x1xf32> to vector<16x16xf32>
    %66 = arith.mulf %65, %37 : vector<16x16xf32>
    %67 = arith.addf %62, %66 : vector<16x16xf32>
    %68 = vector.broadcast %51 : vector<16x1xf32> to vector<16x16xf32>
    %69 = arith.addf %68, %67 : vector<16x16xf32>
    %cst_47 = arith.constant 0.000000e+00 : f32
    %70 = vector.broadcast %cst_47 : f32 to vector<16x16xf32>
    %71 = arith.cmpf oge, %69, %70 : vector<16x16xf32>
    %cst_48 = arith.constant 2.000000e-01 : f32
    %72 = vector.broadcast %cst_48 : f32 to vector<16x16xf32>
    %73 = arith.mulf %72, %69 : vector<16x16xf32>
    %74 = arith.select %71, %69, %73 : vector<16x16xi1>, vector<16x16xf32>
    %cst_49 = arith.constant 0.000000e+00 : f32
    %75 = vector.broadcast %cst_49 : f32 to vector<16x16xf32>
    %76 = arith.cmpf ogt, %28, %75 : vector<16x16xf32>
    %cst_50 = arith.constant -1.000000e+30 : f32
    %77 = vector.broadcast %cst_50 : f32 to vector<16x16xf32>
    %78 = arith.select %76, %74, %77 : vector<16x16xi1>, vector<16x16xf32>
    %cst_51 = arith.constant dense<0xFF800000> : vector<16xf32>
    %79 = vector.multi_reduction <maximumf>, %78, %cst_51 [1] : vector<16x16xf32> to vector<16xf32>
    %80 = vector.shape_cast %79 : vector<16xf32> to vector<16x1xf32>
    %81 = vector.broadcast %80 : vector<16x1xf32> to vector<16x16xf32>
    %82 = arith.subf %78, %81 : vector<16x16xf32>
    %83 = math.exp %82 : vector<16x16xf32>
    %84 = arith.mulf %83, %28 : vector<16x16xf32>
    %cst_52 = arith.constant dense<0.000000e+00> : vector<16xf32>
    %85 = vector.multi_reduction <add>, %84, %cst_52 [1] : vector<16x16xf32> to vector<16xf32>
    %86 = vector.shape_cast %85 : vector<16xf32> to vector<16x1xf32>
    %cst_53 = arith.constant 0.000000e+00 : f32
    %87 = vector.broadcast %cst_53 : f32 to vector<16x1xf32>
    %88 = arith.cmpf ogt, %86, %87 : vector<16x1xf32>
    %cst_54 = arith.constant 1.000000e+00 : f32
    %89 = vector.broadcast %cst_54 : f32 to vector<16x1xf32>
    %90 = arith.select %88, %86, %89 : vector<16x1xi1>, vector<16x1xf32>
    %91 = vector.broadcast %90 : vector<16x1xf32> to vector<16x16xf32>
    %92 = arith.divf %84, %91 : vector<16x16xf32>
    %cst_55 = arith.constant dense<0.000000e+00> : vector<16x32xf32>
    %93 = tpu.matmul %92, %47, %cst_55 {dimension_numbers = #tpu.dot_dimension_numbers<[1], [0], [0], [1], [0, 0, 1, 1], [], []>} : vector<16x16xf32>, vector<16x32xf32>, vector<16x32xf32> -> vector<16x32xf32>
    %94 = vector.broadcast %57 : vector<1x32xf32> to vector<16x32xf32>
    %95 = arith.addf %93, %94 : vector<16x32xf32>
    %96 = vector.extract_strided_slice %14 {offsets = [0, 1], sizes = [88, 1], strides = [1, 1]} : vector<88x8xf32> to vector<88x1xf32>
    %97 = vector.extract_strided_slice %46 {offsets = [1, 0], sizes = [1, 32], strides = [1, 1]} : vector<3x32xf32> to vector<1x32xf32>
    %cst_56 = arith.constant dense<0.000000e+00> : vector<88x1xf32>
    %98 = tpu.matmul %24, %53, %cst_56 {dimension_numbers = #tpu.dot_dimension_numbers<[1], [0], [0], [1], [0, 0, 1, 1], [], []>} : vector<88x16xf32>, vector<16x1xf32>, vector<88x1xf32> -> vector<88x1xf32>
    %99 = arith.addf %98, %96 : vector<88x1xf32>
    %100 = vector.broadcast %99 : vector<88x1xf32> to vector<88x16xf32>
    %101 = arith.mulf %100, %24 : vector<88x16xf32>
    %cst_57 = arith.constant dense<0.000000e+00> : vector<16x16xf32>
    %102 = tpu.matmul %18, %101, %cst_57 {dimension_numbers = #tpu.dot_dimension_numbers<[1], [0], [0], [1], [0, 0, 1, 1], [], []>} : vector<16x88xf32>, vector<88x16xf32>, vector<16x16xf32> -> vector<16x16xf32>
    %103 = vector.broadcast %52 : vector<16x1xf32> to vector<16x16xf32>
    %104 = arith.addf %103, %102 : vector<16x16xf32>
    %cst_58 = arith.constant 0.000000e+00 : f32
    %105 = vector.broadcast %cst_58 : f32 to vector<16x16xf32>
    %106 = arith.cmpf oge, %104, %105 : vector<16x16xf32>
    %cst_59 = arith.constant 2.000000e-01 : f32
    %107 = vector.broadcast %cst_59 : f32 to vector<16x16xf32>
    %108 = arith.mulf %107, %104 : vector<16x16xf32>
    %109 = arith.select %106, %104, %108 : vector<16x16xi1>, vector<16x16xf32>
    %cst_60 = arith.constant 0.000000e+00 : f32
    %110 = vector.broadcast %cst_60 : f32 to vector<16x16xf32>
    %111 = arith.cmpf ogt, %30, %110 : vector<16x16xf32>
    %cst_61 = arith.constant -1.000000e+30 : f32
    %112 = vector.broadcast %cst_61 : f32 to vector<16x16xf32>
    %113 = arith.select %111, %109, %112 : vector<16x16xi1>, vector<16x16xf32>
    %cst_62 = arith.constant dense<0xFF800000> : vector<16xf32>
    %114 = vector.multi_reduction <maximumf>, %113, %cst_62 [1] : vector<16x16xf32> to vector<16xf32>
    %115 = vector.shape_cast %114 : vector<16xf32> to vector<16x1xf32>
    %116 = vector.broadcast %115 : vector<16x1xf32> to vector<16x16xf32>
    %117 = arith.subf %113, %116 : vector<16x16xf32>
    %118 = math.exp %117 : vector<16x16xf32>
    %119 = arith.mulf %118, %30 : vector<16x16xf32>
    %cst_63 = arith.constant dense<0.000000e+00> : vector<16xf32>
    %120 = vector.multi_reduction <add>, %119, %cst_63 [1] : vector<16x16xf32> to vector<16xf32>
    %121 = vector.shape_cast %120 : vector<16xf32> to vector<16x1xf32>
    %cst_64 = arith.constant 0.000000e+00 : f32
    %122 = vector.broadcast %cst_64 : f32 to vector<16x1xf32>
    %123 = arith.cmpf ogt, %121, %122 : vector<16x1xf32>
    %cst_65 = arith.constant 1.000000e+00 : f32
    %124 = vector.broadcast %cst_65 : f32 to vector<16x1xf32>
    %125 = arith.select %123, %121, %124 : vector<16x1xi1>, vector<16x1xf32>
    %126 = vector.broadcast %125 : vector<16x1xf32> to vector<16x16xf32>
    %127 = arith.divf %119, %126 : vector<16x16xf32>
    %cst_66 = arith.constant dense<0.000000e+00> : vector<16x32xf32>
    %128 = tpu.matmul %127, %48, %cst_66 {dimension_numbers = #tpu.dot_dimension_numbers<[1], [0], [0], [1], [0, 0, 1, 1], [], []>} : vector<16x16xf32>, vector<16x32xf32>, vector<16x32xf32> -> vector<16x32xf32>
    %129 = vector.broadcast %97 : vector<1x32xf32> to vector<16x32xf32>
    %130 = arith.addf %128, %129 : vector<16x32xf32>
    %131 = arith.addf %95, %130 : vector<16x32xf32>
    %132 = vector.extract_strided_slice %14 {offsets = [0, 2], sizes = [88, 1], strides = [1, 1]} : vector<88x8xf32> to vector<88x1xf32>
    %133 = vector.extract_strided_slice %46 {offsets = [2, 0], sizes = [1, 32], strides = [1, 1]} : vector<3x32xf32> to vector<1x32xf32>
    %cst_67 = arith.constant dense<0.000000e+00> : vector<88x1xf32>
    %134 = tpu.matmul %26, %54, %cst_67 {dimension_numbers = #tpu.dot_dimension_numbers<[1], [0], [0], [1], [0, 0, 1, 1], [], []>} : vector<88x16xf32>, vector<16x1xf32>, vector<88x1xf32> -> vector<88x1xf32>
    %135 = arith.addf %134, %132 : vector<88x1xf32>
    %136 = vector.broadcast %135 : vector<88x1xf32> to vector<88x16xf32>
    %137 = arith.mulf %136, %26 : vector<88x16xf32>
    %cst_68 = arith.constant dense<0.000000e+00> : vector<16x16xf32>
    %138 = tpu.matmul %20, %137, %cst_68 {dimension_numbers = #tpu.dot_dimension_numbers<[1], [0], [0], [1], [0, 0, 1, 1], [], []>} : vector<16x88xf32>, vector<88x16xf32>, vector<16x16xf32> -> vector<16x16xf32>
    %cst_69 = arith.constant dense<0.000000e+00> : vector<16x1xf32>
    %139 = tpu.matmul %36, %132, %cst_69 {dimension_numbers = #tpu.dot_dimension_numbers<[1], [0], [0], [1], [0, 0, 1, 1], [], []>} : vector<16x88xf32>, vector<88x1xf32>, vector<16x1xf32> -> vector<16x1xf32>
    %140 = arith.addf %54, %139 : vector<16x1xf32>
    %141 = vector.broadcast %140 : vector<16x1xf32> to vector<16x16xf32>
    %142 = arith.mulf %141, %38 : vector<16x16xf32>
    %143 = arith.addf %138, %142 : vector<16x16xf32>
    %144 = vector.broadcast %55 : vector<16x1xf32> to vector<16x16xf32>
    %145 = arith.addf %144, %143 : vector<16x16xf32>
    %cst_70 = arith.constant 0.000000e+00 : f32
    %146 = vector.broadcast %cst_70 : f32 to vector<16x16xf32>
    %147 = arith.cmpf oge, %145, %146 : vector<16x16xf32>
    %cst_71 = arith.constant 2.000000e-01 : f32
    %148 = vector.broadcast %cst_71 : f32 to vector<16x16xf32>
    %149 = arith.mulf %148, %145 : vector<16x16xf32>
    %150 = arith.select %147, %145, %149 : vector<16x16xi1>, vector<16x16xf32>
    %cst_72 = arith.constant 0.000000e+00 : f32
    %151 = vector.broadcast %cst_72 : f32 to vector<16x16xf32>
    %152 = arith.cmpf ogt, %32, %151 : vector<16x16xf32>
    %cst_73 = arith.constant -1.000000e+30 : f32
    %153 = vector.broadcast %cst_73 : f32 to vector<16x16xf32>
    %154 = arith.select %152, %150, %153 : vector<16x16xi1>, vector<16x16xf32>
    %cst_74 = arith.constant dense<0xFF800000> : vector<16xf32>
    %155 = vector.multi_reduction <maximumf>, %154, %cst_74 [1] : vector<16x16xf32> to vector<16xf32>
    %156 = vector.shape_cast %155 : vector<16xf32> to vector<16x1xf32>
    %157 = vector.broadcast %156 : vector<16x1xf32> to vector<16x16xf32>
    %158 = arith.subf %154, %157 : vector<16x16xf32>
    %159 = math.exp %158 : vector<16x16xf32>
    %160 = arith.mulf %159, %32 : vector<16x16xf32>
    %cst_75 = arith.constant dense<0.000000e+00> : vector<16xf32>
    %161 = vector.multi_reduction <add>, %160, %cst_75 [1] : vector<16x16xf32> to vector<16xf32>
    %162 = vector.shape_cast %161 : vector<16xf32> to vector<16x1xf32>
    %cst_76 = arith.constant 0.000000e+00 : f32
    %163 = vector.broadcast %cst_76 : f32 to vector<16x1xf32>
    %164 = arith.cmpf ogt, %162, %163 : vector<16x1xf32>
    %cst_77 = arith.constant 1.000000e+00 : f32
    %165 = vector.broadcast %cst_77 : f32 to vector<16x1xf32>
    %166 = arith.select %164, %162, %165 : vector<16x1xi1>, vector<16x1xf32>
    %167 = vector.broadcast %166 : vector<16x1xf32> to vector<16x16xf32>
    %168 = arith.divf %160, %167 : vector<16x16xf32>
    %cst_78 = arith.constant dense<0.000000e+00> : vector<16x32xf32>
    %169 = tpu.matmul %168, %49, %cst_78 {dimension_numbers = #tpu.dot_dimension_numbers<[1], [0], [0], [1], [0, 0, 1, 1], [], []>} : vector<16x16xf32>, vector<16x32xf32>, vector<16x32xf32> -> vector<16x32xf32>
    %170 = vector.broadcast %133 : vector<1x32xf32> to vector<16x32xf32>
    %171 = arith.addf %169, %170 : vector<16x32xf32>
    %c0_79 = arith.constant 0 : index
    %c0_80 = arith.constant 0 : index
    %172 = vector.load %arg5[%c0_79, %c0_80] : memref<32x32xf32, #tpu.memory_space<vmem>>, vector<16x32xf32>
    tpu.vector_store %arg5[%c0_79, %c0_80], %131 {strides = array<i32>} : memref<32x32xf32, #tpu.memory_space<vmem>>, vector<16x32xf32>,
    %c16_81 = arith.constant 16 : index
    %c0_82 = arith.constant 0 : index
    %173 = vector.load %arg5[%c16_81, %c0_82] : memref<32x32xf32, #tpu.memory_space<vmem>>, vector<16x32xf32>
    tpu.vector_store %arg5[%c16_81, %c0_82], %171 {strides = array<i32>} : memref<32x32xf32, #tpu.memory_space<vmem>>, vector<16x32xf32>,
    %c0_83 = arith.constant 0 : index
    %c0_84 = arith.constant 0 : index
    %174 = vector.load %arg5[%c0_83, %c0_84] : memref<32x32xf32, #tpu.memory_space<vmem>>, vector<32x32xf32>
    %c224 = arith.constant 224 : index
    %c0_85 = arith.constant 0 : index
    %175 = vector.load %arg1[%c224, %c0_85] : memref<296x256xf32, #tpu.memory_space<vmem>>, vector<32x136xf32>
    %cst_86 = arith.constant dense<0.000000e+00> : vector<32x136xf32>
    %176 = tpu.matmul %174, %175, %cst_86 {dimension_numbers = #tpu.dot_dimension_numbers<[1], [0], [0], [1], [0, 0, 1, 1], [], []>} : vector<32x32xf32>, vector<32x136xf32>, vector<32x136xf32> -> vector<32x136xf32>
    %c256_87 = arith.constant 256 : index
    %c0_88 = arith.constant 0 : index
    %177 = vector.load %arg1[%c256_87, %c0_88] : memref<296x256xf32, #tpu.memory_space<vmem>>, vector<3x32xf32>
    %178 = vector.extract_strided_slice %176 {offsets = [0, 0], sizes = [16, 32], strides = [1, 1]} : vector<32x136xf32> to vector<16x32xf32>
    %179 = vector.extract_strided_slice %176 {offsets = [16, 32], sizes = [16, 32], strides = [1, 1]} : vector<32x136xf32> to vector<16x32xf32>
    %180 = vector.extract_strided_slice %176 {offsets = [0, 128], sizes = [16, 1], strides = [1, 1]} : vector<32x136xf32> to vector<16x1xf32>
    %181 = vector.extract_strided_slice %176 {offsets = [0, 129], sizes = [16, 1], strides = [1, 1]} : vector<32x136xf32> to vector<16x1xf32>
    %182 = vector.extract_strided_slice %176 {offsets = [0, 130], sizes = [16, 1], strides = [1, 1]} : vector<32x136xf32> to vector<16x1xf32>
    %183 = vector.extract_strided_slice %176 {offsets = [16, 131], sizes = [16, 1], strides = [1, 1]} : vector<32x136xf32> to vector<16x1xf32>
    %184 = vector.extract_strided_slice %14 {offsets = [0, 3], sizes = [88, 1], strides = [1, 1]} : vector<88x8xf32> to vector<88x1xf32>
    %185 = vector.extract_strided_slice %177 {offsets = [0, 0], sizes = [1, 32], strides = [1, 1]} : vector<3x32xf32> to vector<1x32xf32>
    %cst_89 = arith.constant dense<0.000000e+00> : vector<88x1xf32>
    %186 = tpu.matmul %22, %180, %cst_89 {dimension_numbers = #tpu.dot_dimension_numbers<[1], [0], [0], [1], [0, 0, 1, 1], [], []>} : vector<88x16xf32>, vector<16x1xf32>, vector<88x1xf32> -> vector<88x1xf32>
    %187 = arith.addf %186, %184 : vector<88x1xf32>
    %188 = vector.broadcast %187 : vector<88x1xf32> to vector<88x16xf32>
    %189 = arith.mulf %188, %22 : vector<88x16xf32>
    %cst_90 = arith.constant dense<0.000000e+00> : vector<16x16xf32>
    %190 = tpu.matmul %16, %189, %cst_90 {dimension_numbers = #tpu.dot_dimension_numbers<[1], [0], [0], [1], [0, 0, 1, 1], [], []>} : vector<16x88xf32>, vector<88x16xf32>, vector<16x16xf32> -> vector<16x16xf32>
    %cst_91 = arith.constant dense<0.000000e+00> : vector<16x1xf32>
    %191 = tpu.matmul %34, %184, %cst_91 {dimension_numbers = #tpu.dot_dimension_numbers<[1], [0], [0], [1], [0, 0, 1, 1], [], []>} : vector<16x88xf32>, vector<88x1xf32>, vector<16x1xf32> -> vector<16x1xf32>
    %192 = arith.addf %180, %191 : vector<16x1xf32>
    %193 = vector.broadcast %192 : vector<16x1xf32> to vector<16x16xf32>
    %194 = arith.mulf %193, %37 : vector<16x16xf32>
    %195 = arith.addf %190, %194 : vector<16x16xf32>
    %196 = vector.broadcast %181 : vector<16x1xf32> to vector<16x16xf32>
    %197 = arith.addf %196, %195 : vector<16x16xf32>
    %cst_92 = arith.constant 0.000000e+00 : f32
    %198 = vector.broadcast %cst_92 : f32 to vector<16x16xf32>
    %199 = arith.cmpf oge, %197, %198 : vector<16x16xf32>
    %cst_93 = arith.constant 2.000000e-01 : f32
    %200 = vector.broadcast %cst_93 : f32 to vector<16x16xf32>
    %201 = arith.mulf %200, %197 : vector<16x16xf32>
    %202 = arith.select %199, %197, %201 : vector<16x16xi1>, vector<16x16xf32>
    %cst_94 = arith.constant 0.000000e+00 : f32
    %203 = vector.broadcast %cst_94 : f32 to vector<16x16xf32>
    %204 = arith.cmpf ogt, %28, %203 : vector<16x16xf32>
    %cst_95 = arith.constant -1.000000e+30 : f32
    %205 = vector.broadcast %cst_95 : f32 to vector<16x16xf32>
    %206 = arith.select %204, %202, %205 : vector<16x16xi1>, vector<16x16xf32>
    %cst_96 = arith.constant dense<0xFF800000> : vector<16xf32>
    %207 = vector.multi_reduction <maximumf>, %206, %cst_96 [1] : vector<16x16xf32> to vector<16xf32>
    %208 = vector.shape_cast %207 : vector<16xf32> to vector<16x1xf32>
    %209 = vector.broadcast %208 : vector<16x1xf32> to vector<16x16xf32>
    %210 = arith.subf %206, %209 : vector<16x16xf32>
    %211 = math.exp %210 : vector<16x16xf32>
    %212 = arith.mulf %211, %28 : vector<16x16xf32>
    %cst_97 = arith.constant dense<0.000000e+00> : vector<16xf32>
    %213 = vector.multi_reduction <add>, %212, %cst_97 [1] : vector<16x16xf32> to vector<16xf32>
    %214 = vector.shape_cast %213 : vector<16xf32> to vector<16x1xf32>
    %cst_98 = arith.constant 0.000000e+00 : f32
    %215 = vector.broadcast %cst_98 : f32 to vector<16x1xf32>
    %216 = arith.cmpf ogt, %214, %215 : vector<16x1xf32>
    %cst_99 = arith.constant 1.000000e+00 : f32
    %217 = vector.broadcast %cst_99 : f32 to vector<16x1xf32>
    %218 = arith.select %216, %214, %217 : vector<16x1xi1>, vector<16x1xf32>
    %219 = vector.broadcast %218 : vector<16x1xf32> to vector<16x16xf32>
    %220 = arith.divf %212, %219 : vector<16x16xf32>
    %cst_100 = arith.constant dense<0.000000e+00> : vector<16x32xf32>
    %221 = tpu.matmul %220, %178, %cst_100 {dimension_numbers = #tpu.dot_dimension_numbers<[1], [0], [0], [1], [0, 0, 1, 1], [], []>} : vector<16x16xf32>, vector<16x32xf32>, vector<16x32xf32> -> vector<16x32xf32>
    %222 = vector.broadcast %185 : vector<1x32xf32> to vector<16x32xf32>
    %223 = arith.addf %221, %222 : vector<16x32xf32>
    %224 = vector.extract_strided_slice %14 {offsets = [0, 4], sizes = [88, 1], strides = [1, 1]} : vector<88x8xf32> to vector<88x1xf32>
    %225 = vector.extract_strided_slice %177 {offsets = [1, 0], sizes = [1, 32], strides = [1, 1]} : vector<3x32xf32> to vector<1x32xf32>
    %cst_101 = arith.constant dense<0.000000e+00> : vector<88x1xf32>
    %226 = tpu.matmul %24, %183, %cst_101 {dimension_numbers = #tpu.dot_dimension_numbers<[1], [0], [0], [1], [0, 0, 1, 1], [], []>} : vector<88x16xf32>, vector<16x1xf32>, vector<88x1xf32> -> vector<88x1xf32>
    %227 = arith.addf %226, %224 : vector<88x1xf32>
    %228 = vector.broadcast %227 : vector<88x1xf32> to vector<88x16xf32>
    %229 = arith.mulf %228, %24 : vector<88x16xf32>
    %cst_102 = arith.constant dense<0.000000e+00> : vector<16x16xf32>
    %230 = tpu.matmul %18, %229, %cst_102 {dimension_numbers = #tpu.dot_dimension_numbers<[1], [0], [0], [1], [0, 0, 1, 1], [], []>} : vector<16x88xf32>, vector<88x16xf32>, vector<16x16xf32> -> vector<16x16xf32>
    %231 = vector.broadcast %182 : vector<16x1xf32> to vector<16x16xf32>
    %232 = arith.addf %231, %230 : vector<16x16xf32>
    %cst_103 = arith.constant 0.000000e+00 : f32
    %233 = vector.broadcast %cst_103 : f32 to vector<16x16xf32>
    %234 = arith.cmpf oge, %232, %233 : vector<16x16xf32>
    %cst_104 = arith.constant 2.000000e-01 : f32
    %235 = vector.broadcast %cst_104 : f32 to vector<16x16xf32>
    %236 = arith.mulf %235, %232 : vector<16x16xf32>
    %237 = arith.select %234, %232, %236 : vector<16x16xi1>, vector<16x16xf32>
    %cst_105 = arith.constant 0.000000e+00 : f32
    %238 = vector.broadcast %cst_105 : f32 to vector<16x16xf32>
    %239 = arith.cmpf ogt, %30, %238 : vector<16x16xf32>
    %cst_106 = arith.constant -1.000000e+30 : f32
    %240 = vector.broadcast %cst_106 : f32 to vector<16x16xf32>
    %241 = arith.select %239, %237, %240 : vector<16x16xi1>, vector<16x16xf32>
    %cst_107 = arith.constant dense<0xFF800000> : vector<16xf32>
    %242 = vector.multi_reduction <maximumf>, %241, %cst_107 [1] : vector<16x16xf32> to vector<16xf32>
    %243 = vector.shape_cast %242 : vector<16xf32> to vector<16x1xf32>
    %244 = vector.broadcast %243 : vector<16x1xf32> to vector<16x16xf32>
    %245 = arith.subf %241, %244 : vector<16x16xf32>
    %246 = math.exp %245 : vector<16x16xf32>
    %247 = arith.mulf %246, %30 : vector<16x16xf32>
    %cst_108 = arith.constant dense<0.000000e+00> : vector<16xf32>
    %248 = vector.multi_reduction <add>, %247, %cst_108 [1] : vector<16x16xf32> to vector<16xf32>
    %249 = vector.shape_cast %248 : vector<16xf32> to vector<16x1xf32>
    %cst_109 = arith.constant 0.000000e+00 : f32
    %250 = vector.broadcast %cst_109 : f32 to vector<16x1xf32>
    %251 = arith.cmpf ogt, %249, %250 : vector<16x1xf32>
    %cst_110 = arith.constant 1.000000e+00 : f32
    %252 = vector.broadcast %cst_110 : f32 to vector<16x1xf32>
    %253 = arith.select %251, %249, %252 : vector<16x1xi1>, vector<16x1xf32>
    %254 = vector.broadcast %253 : vector<16x1xf32> to vector<16x16xf32>
    %255 = arith.divf %247, %254 : vector<16x16xf32>
    %cst_111 = arith.constant dense<0.000000e+00> : vector<16x32xf32>
    %256 = tpu.matmul %255, %179, %cst_111 {dimension_numbers = #tpu.dot_dimension_numbers<[1], [0], [0], [1], [0, 0, 1, 1], [], []>} : vector<16x16xf32>, vector<16x32xf32>, vector<16x32xf32> -> vector<16x32xf32>
    %257 = vector.broadcast %225 : vector<1x32xf32> to vector<16x32xf32>
    %258 = arith.addf %256, %257 : vector<16x32xf32>
    %259 = arith.addf %223, %258 : vector<16x32xf32>
    %c0_112 = arith.constant 0 : index
    %c0_113 = arith.constant 0 : index
    %c0_114 = arith.constant 0 : index
    %260 = vector.load %arg4[%c0_112, %c0_113, %c0_114] : memref<1x16x32xf32, #tpu.memory_space<vmem>>, vector<1x16x32xf32>
    %261 = vector.shape_cast %260 : vector<1x16x32xf32> to vector<16x32xf32>
    %262 = vector.shape_cast %259 : vector<16x32xf32> to vector<1x16x32xf32>
    tpu.vector_store %arg4[%c0_112, %c0_113, %c0_114], %262 {strides = array<i32>} : memref<1x16x32xf32, #tpu.memory_space<vmem>>, vector<1x16x32xf32>,
    return
  }
  func.func @transform_0(%arg0: i32) -> (i32, i32) {
    %c0_i32 = arith.constant 0 : i32
    %c0_i32_0 = arith.constant 0 : i32
    %c0_i32_1 = arith.constant 0 : i32
    return %c0_i32, %c0_i32_0 : i32, i32
  }
  func.func @transform_1(%arg0: i32) -> (i32, i32, i32) {
    %c0_i32 = arith.constant 0 : i32
    %c0_i32_0 = arith.constant 0 : i32
    %c0_i32_1 = arith.constant 0 : i32
    return %arg0, %c0_i32, %c0_i32_0 : i32, i32, i32
  }
  func.func @transform_2(%arg0: i32) -> (i32, i32, i32) {
    %c0_i32 = arith.constant 0 : i32
    %c0_i32_0 = arith.constant 0 : i32
    %c0_i32_1 = arith.constant 0 : i32
    return %arg0, %c0_i32, %c0_i32_0 : i32, i32, i32
  }
  func.func @transform_3(%arg0: i32) -> (i32, i32, i32) {
    %c0_i32 = arith.constant 0 : i32
    %c0_i32_0 = arith.constant 0 : i32
    %c0_i32_1 = arith.constant 0 : i32
    return %arg0, %c0_i32, %c0_i32_0 : i32, i32, i32
  }
}

</mosaic_0001>

<bundles_post_ra>
// kernel: fwd.1
= control target key start
LH: loop header
LB: loop body
LE: loop exit
PB: predicated region body
PF: predicated region fallthrough
CT: control target
= control target key end

     0   :  { %8 = vsyncpa [#allocation4], 0  ;;  %s6135_s0 = inlined_call_operand.hbm [shape: f32[296,256], index: 0, kind: input, shape index: {}]   ;;  %s6136_s1 = inlined_call_operand.vmem [shape: f32[3,120,16], index: 1, kind: input, shape index: {}]   ;;  %s6137_s2 = inlined_call_operand.hbm [shape: f32[3,392,128], index: 2, kind: input, shape index: {}]   ;;  %s6138_s3 = inlined_call_operand.vmem [shape: f32[3,16,32], index: 3, kind: output, shape index: {}]  }
   0x1   :  { %9 = vsyncpa [#allocation6], 0 }
   0x2   :  { %11 = vsyncpa [#allocation6 + $0x1], 0  ;;  %s4996_s12 = smov 0   ;;  %s4998_s13 = smov 0  }
   0x3   :  { %s5000_s14 = smov 0   ;;  %s5002_s15 = smov 0  }
   0x4 LB: > { %s5015_s16 = sadd.s32 4294967295, %s4953_s15   ;;  %p84_p0 = scmp.ne.s32.totalorder %s4945_s13, %s4941_s12  ;;  %s4953_s15 = sphi %s5002_s15, %s6168_s15   ;;  %s4949_s14 = sphi %s5000_s14, %s6167_s14   ;;  %s4945_s13 = sphi %s4998_s13, %s6166_s13   ;;  %s4941_s12 = sphi %s4996_s12, %s6165_s12  }
   0x5   : > { %p6139_p1 = scmp.eq.s32.totalorder %s5015_s16, 0  ;;  %p3664_p2 = scmp.ge.s32.totalorder %s4953_s15, 1 }
   0x6   : > { %p121_p3 = scmp.lt.s32.totalorder %s4953_s15, 4  ;;  %s4955_s19 = smov [#allocation3]  }
   0x7   : > { %p5023_p4 = por %p6139_p1, %p84_p0  ;;  %s133_s20 = sshll.u32 %s4955_s19, 4  ;;  %s134_s20 = int_to_ptr.vmem [resolvable:$true] %s133_s20 }
   0x8   : > { %p5027_p5 = pnand %p3664_p2, %p121_p3  ;;  %s5040_s22 = sadd.s32 1, %s4953_s15  }
   0x9   : > { %s6152_s17 = scalar_select %p5023_p4, 1, 0 }
   0xa   : > { %s6153_s18 = scalar_select %p5027_p5, 1, 0 }
   0xb   : > { %p4669_p6 = pneg %p5027_p5  ;;  %s71_s23 = sadd.s32 1, %s4949_s14 }
   0xc   : > { %s68_s24 = ssub.s32 %s4953_s15, %s5040_s22  ;;  %s4857_s27 = scalar_lea.hbm %s6135_s0, 9472 }
   0xd   : > { %p5035_p7 = pnand %p4669_p6, %p6139_p1  ;;  %p4858_p8 = scmp.ne.s32.totalorder %s6135_s0, %s4857_s27 }
   0xe   : > { %p4864_p12 = scmp.lt.u32.totalorder %s4857_s27, %s6135_s0 }
   0xf   : > { %p4859_p9 = pneg %p5035_p7 }
  0x11   : > { %p4860_p10 = pnand %p4859_p9, %p4858_p8 }
  0x13   : > { %p4861_p11 = pneg %p4860_p10 }
  0x15   : > { %p4866_p13 = pnand %p4864_p12, %p4861_p11 }
  0x17   : > { %4869 = shalt.err (!%p4866_p13)
}
  0x18   : > { %s4870_s5 = scalar_lea.vmem %s134_s20, 9472  ;;  %p4878_p6 = scmp.lt.s32.totalorder %s134_s20, %s134_s20 }
  0x19   : > { %p4871_p0 = scmp.ne.s32.totalorder %s134_s20, %s4870_s5  ;;  %p4879_p1 = scmp.lt.s32.totalorder %s4870_s5, %s4870_s5 }
  0x1b   : > { %p4873_p2 = pnand %p4871_p0, %p4859_p9  ;;  %p4880_p4 = por %p4879_p1, %p4878_p6 }
  0x1d   : > { %p4874_p3 = pneg %p4873_p2 }
  0x1f   : > { %p4881_p5 = pnand %p4880_p4, %p4874_p3 }
  0x21   : > { %4884 = shalt.err (!%p4881_p5)
}
  0x22   : > { %s4956_s6 = smov 256   ;;  %s4957_s7 = smov 16  }
  0x23   : > { %4672 = dma.hbm_to_vmem [thread:$0]  (!%p5035_p7), %s6135_s0, 9472, %s134_s20, [#allocation4], %s4956_s6, %s4956_s6, %s4957_s7  }
  0x24   : > { %p69_p8 = scmp.eq.s32.totalorder %s68_s24, 0  ;;  %p78_p9 = scmp.ne.s32.totalorder %s4949_s14, %s4945_s13 }
  0x25   : > { %p79_p1 = scmp.eq.s32.totalorder %s4953_s15, 0  ;;  %p4678_p4 = scmp.lt.s32.totalorder %s4953_s15, 3 }
  0x26   : > { %s5066_s10 = scalar_select %p69_p8, %s4949_s14, %s71_s23  }
  0x27   : > { %p80_p5 = por %p79_p1, %p78_p9  ;;  %s155_s11 = sand.u32 1, %s4949_s14  }
  0x28   : > { %s4659_s12 = smul.u32 392, %s155_s11  ;;  %s4890_s30 = scalar_lea.hbm %s6137_s2, 18816 }
  0x29   : > { %s4660_s19 = smul.u32 6272, %s4953_s15  ;;  %p5070_p10 = pnand %p4678_p4, %p80_p5 }
  0x2a   : > { %s159_s23 = scalar_lea.vmem [#allocation5], %s4659_s12  ;;  %s5081_s15 = scalar_lea.sflag [#allocation6], %s155_s11 }
  0x2b   : > { %s5077_s20 = scalar_lea.hbm %s6137_s2, %s4660_s19  ;;  %s166_s24 = sshll.u32 %s159_s23, 4  ;;  %s5079_s24 = int_to_ptr.vmem [resolvable:$true] %s166_s24 }
  0x2c   : > { %s4885_s27 = scalar_lea.hbm %s5077_s20, 6272  ;;  %p4887_p11 = pneg %p5070_p10 }
  0x2d   : > { %p4886_p7 = scmp.ne.s32.totalorder %s5077_s20, %s4885_s27  ;;  %p4891_p0 = scmp.lt.u32.totalorder %s5077_s20, %s6137_s2 }
  0x2e   : > { %p4892_p2 = scmp.lt.u32.totalorder %s4890_s30, %s4885_s27  ;;  %p4894_p6 = scmp.lt.u32.totalorder %s4885_s27, %s5077_s20 }
  0x2f   : > { %p4888_p12 = pnand %p4887_p11, %p4886_p7 }
  0x30   : > { %p4893_p3 = por %p4892_p2, %p4891_p0 }
  0x31   : > { %p4889_p13 = pneg %p4888_p12 }
  0x32   : > { %p4895_p8 = por %p4894_p6, %p4893_p3 }
  0x34   : > { %p4896_p9 = pnand %p4895_p8, %p4889_p13 }
  0x36   : > { %4899 = shalt.err (!%p4896_p9)
}
  0x37   : > { %s4900_s6 = scalar_lea.vmem %s5079_s24, 6272  ;;  %s4958_s7 = smov [#allocation5]  }
  0x38   : > { %p4901_p1 = scmp.ne.s32.totalorder %s5079_s24, %s4900_s6  ;;  %s4905_s8 = sshll.u32 %s4958_s7, 4  ;;  %s4906_s8 = int_to_ptr.vmem [resolvable:$false] %s4905_s8 }
  0x39   : > { %s4907_s9 = scalar_lea.vmem %s4906_s8, 12544  ;;  %p4908_p7 = scmp.lt.s32.totalorder %s5079_s24, %s4906_s8 }
  0x3a   : > { %p4903_p4 = pnand %p4901_p1, %p4887_p11  ;;  %p4909_p12 = scmp.lt.s32.totalorder %s4907_s9, %s4900_s6 }
  0x3c   : > { %p4904_p5 = pneg %p4903_p4  ;;  %p4910_p0 = por %p4909_p12, %p4908_p7 }
  0x3e   : > { %p4911_p2 = pnand %p4910_p0, %p4904_p5 }
  0x40   : > { %4914 = shalt.err (!%p4911_p2)
}
  0x41   : > { %s4959_s11 = smov 128   ;;  %s4960_s12 = smov 8  }
  0x42   : > { %4676 = dma.hbm_to_vmem [thread:$0]  (!%p5070_p10), %s5077_s20, 6272, %s5079_s24, %s5081_s15, %s4959_s11, %s4959_s11, %s4960_s12  }
  0x43   : > { %p6156_p11 = scmp.ne.s32.totalorder %s6153_s18, 0 }
  0x44   : > { %p6157_p13 = scmp.eq.s32.totalorder (!%p6156_p11), %s5015_s16, 0 }
  0x45   : > { %178 = sbr.rel (%p6156_p11) target bundleno = 5302 (0x14b6), region = 32 }
  0x4c   : > { %4932 = dma.done.wait (%p6157_p13), [#allocation4], 9472   ;;  %p6158_p3 = pmov %p6157_p13 }
  0x4d   : > { %s184_s19 = sand.u32 1, %s4945_s13   ;;  %p6159_p6 = scmp.ne.s32.totalorder %s6152_s17, 0 }
  0x4e   : > { %4934 = vsyncadd (%p6158_p3), [#allocation4], 4294957824  ;;  %s4661_s26 = smul.u32 392, %s184_s19  ;;  %s185_s21 = scalar_lea.sflag [#allocation6], %s184_s19 }
  0x50   : > { %s5116_s23 = scalar_lea.vmem [#allocation5], %s4661_s26 }
  0x51   : > { %4936 = dma.done.wait (%p6159_p6), %s185_s21, 6272  }
  0x52   : > { %4938 = vsyncadd (%p6159_p6), %s185_s21, 4294961024  ;;  %p216_p10 = scmp.lt.s32.totalorder %s5015_s16, 2  ;;  %v6148_v0 = vmov 0.0   ;;  %v6150_v1 = vmov 0.0|0.0   ;;  %v242_v2 = vld [vmem:[#allocation3 + $0x8] sm:$0xff]  ;;  %v244_v3 = vld [vmem:[#allocation3 + $0x18] sm:$0xff] }
  0x53   : > { %368 = vmatprep.mubr.f32.mxu0 %v6148_v0  ;;  %4404 = vmatprep.subr.bf16.mxu1 %v6150_v1  ;;  %v241_v4 = vld [vmem:[#allocation3] sm:$0xff]  ;;  %v4400_v5 = vpack.c.bf16 %v244_v3, %v242_v2  ;;  %v243_v6 = vld [vmem:[#allocation3 + $0x10] sm:$0xff]  ;;  %vm258_vm0 = vcmask 130048   ;;  %v777_v10 = vld [vmem:[#allocation3 + $0x178] sm:$0xff]  ;;  %v248_v3 = vlaneseq  ;;  %vm553_vm2 = vcmask 261120   ;;  %s4963_s24 = smov 96  }
  0x54   : > { %s6170_s16 = smov (!%p216_p10, %s5015_s16), 2  ;;  %v4402_v7 = vpack.c.bf16 %v243_v6, %v241_v4  ;;  %v779_v11 = vld [vmem:[#allocation3 + $0x188] sm:$0xff]  ;;  %v776_v13 = vld [vmem:[#allocation3 + $0x170] sm:$0xff]  ;;  %v778_v14 = vld [vmem:[#allocation3 + $0x180] sm:$0xff]  ;;  %s4967_s15 = smov 127  }
  0x55   : > { %s4662_s18 = smul.u32 120, %s6170_s16  ;;  %4401 = vmatprep.subr.bf16.mxu0 %v4400_v5  ;;  %v4434_v12 = vpack.c.bf16 %v779_v11, %v777_v10  ;;  %v533_v15 = vld [vmem:[#allocation3 + $0x30] sm:$0xff]  ;;  %v4436_v16 = vpack.c.bf16 %v778_v14, %v776_v13  ;;  %v534_v17 = vld [vmem:[#allocation3 + $0x40] sm:$0xff]  ;;  %v781_v21 = vld [vmem:[#allocation3 + $0x198] sm:$0xff]  ;;  %v5189_v4 = vshrl.u32 %v248_v3, 7  ;;  %s4968_s27 = smov 125  }
  0x56   : > { %4403 = vmatpush1.bf16.msra.mxu0 %v4402_v7  ;;  %v535_v18 = vld [vmem:[#allocation3 + $0x50] sm:$0xff]  ;;  %v536_v19 = vld [vmem:[#allocation3 + $0x60] sm:$0xff]  ;;  %v4405_v20 = vpack.c.bf16 %v534_v17, %v533_v15  ;;  %v783_v22 = vld [vmem:[#allocation3 + $0x1a8] sm:$0xff]  ;;  %s4970_s28 = smov 124   ;;  %s4971_s29 = smov 126  }
  0x57   : > { %s5132_s20 = scalar_lea.vmem %s6136_s1, %s4662_s18  ;;  %4435 = vmatprep.subr.bf16.mxu0 %v4434_v12  ;;  %v4408_v23 = vpack.c.bf16 %v536_v19, %v535_v18  ;;  %v4438_v24 = vpack.c.bf16 %v783_v22, %v781_v21  ;;  %v780_v25 = vld [vmem:[#allocation3 + $0x190] sm:$0xff]  ;;  %v782_v26 = vld [vmem:[#allocation3 + $0x1a0] sm:$0xff]  ;;  %v5192_v5 = vsub.s32 0, %v5189_v4  ;;  %v5203_v21 = vsub.s32 1, %v5189_v4  ;;  %s4972_s30 = smov 4  }
  0x58   : > { %v226_v8 = vld [vmem:[%s5132_s20] sm:$0xff]  ;;  %v227_v9 = vld [vmem:[%s5132_s20 + $0x8] sm:$0xff]  ;;  %4406 = vmatpush1.bf16.msra.mxu1 %v4405_v20  ;;  %v228_v27 = vld [vmem:[%s5132_s20 + $0x10] sm:$0xff]  ;;  %v4440_v30 = vpack.c.bf16 %v782_v26, %v780_v25  ;;  %s4975_s4 = smov 64   ;;  %s3790_s5 = sshll.u32 %s6170_s16, 4 }
  0x59   : > { %3673 = vmatmul.mubr.msk.f32.vlgmr.msra.gmra.mrb[0].mxu0 %vm258_vm0, %v226_v8  ;;  %4407 = vmatprep.subr.bf16.mxu1 %v6150_v1  ;;  %v537_v28 = vld [vmem:[#allocation3 + $0x70] sm:$0xff]  ;;  %v538_v29 = vld [vmem:[#allocation3 + $0x80] sm:$0xff]  ;;  %v229_v32 = vld [vmem:[%s5132_s20 + $0x18] sm:$0xff]  ;;  %s225_s8 = scalar_lea.vmem %s6138_s3, %s3790_s5 }
  0x5a   : > { %373 = vmatprep.mubr.f32.mxu0 %v6148_v0  ;;  %4437 = vmatpush1.bf16.msra.mxu0 %v4436_v16  ;;  %v4411_v31 = vpack.c.bf16 %v538_v29, %v537_v28  ;;  %v539_v33 = vld [vmem:[#allocation3 + $0x90] sm:$0xff]  ;;  %v540_v34 = vld [vmem:[#allocation3 + $0xa0] sm:$0xff]  ;;  %v231_v37 = vld [vmem:[%s5132_s20 + $0x28] sm:$0xff] }
  0x5b   : > { %4439 = vmatprep.subr.bf16.mxu0 %v4438_v24  ;;  %v4414_v35 = vpack.c.bf16 %v540_v34, %v539_v33  ;;  %v230_v36 = vld [vmem:[%s5132_s20 + $0x20] sm:$0xff]  ;;  %v232_v38 = vld [vmem:[%s5132_s20 + $0x30] sm:$0xff]  ;;  %v233_v39 = vld [vmem:[%s5132_s20 + $0x38] sm:$0xff] }
  0x5c   : > { %4409 = vmatpush1.bf16.msra.mxu1 %v4408_v23  ;;  %v234_v40 = vld [vmem:[%s5132_s20 + $0x40] sm:$0xff]  ;;  %v235_v41 = vld [vmem:[%s5132_s20 + $0x48] sm:$0xff]  ;;  %v236_v42 = vld [vmem:[%s5132_s20 + $0x50] sm:$0xff] }
  0x5d   : > { %3674 = vmatmul.mubr.msk.f32.gmra.mrb[2].mxu0 %vm258_vm0, %v227_v9  ;;  %4410 = vmatprep.subr.bf16.mxu1 %v6150_v1  ;;  %v237_v43 = vld [vmem:[%s5132_s20 + $0x58] sm:$0xff]  ;;  %v238_v44 = vld [vmem:[%s5132_s20 + $0x60] sm:$0xff]  ;;  %v239_v45 = vld [vmem:[%s5132_s20 + $0x68] sm:$0xff] }
  0x5e   : > { %378 = vmatprep.mubr.f32.mxu0 %v6148_v0  ;;  %4441 = vmatpush1.bf16.msra.mxu0 %v4440_v30  ;;  %v240_v46 = vld [vmem:[%s5132_s20 + $0x70] sm:$0xff]  ;;  %v542_v48 = vld [vmem:[#allocation3 + $0xc0] sm:$0xff] }
  0x5f   : > { %4442 = vmatprep.subr.bf16.mxu0 %v6150_v1  ;;  %v541_v47 = vld [vmem:[#allocation3 + $0xb0] sm:$0xff]  ;;  %v544_v51 = vld [vmem:[#allocation3 + $0xe0] sm:$0xff] }
  0x60   : > { %4412 = vmatpush1.bf16.msra.mxu1 %v4411_v31  ;;  %v4417_v49 = vpack.c.bf16 %v542_v48, %v541_v47  ;;  %v543_v50 = vld [vmem:[#allocation3 + $0xd0] sm:$0xff]  ;;  %v546_v54 = vld [vmem:[#allocation3 + $0x100] sm:$0xff] }
  0x61   : > { %3675 = vmatmul.mubr.msk.f32.gmra.mrb[4].mxu0 %vm258_vm0, %v228_v27  ;;  %4413 = vmatprep.subr.bf16.mxu1 %v6150_v1  ;;  %v4420_v52 = vpack.c.bf16 %v544_v51, %v543_v50  ;;  %v545_v53 = vld [vmem:[#allocation3 + $0xf0] sm:$0xff]  ;;  %v548_v57 = vld [vmem:[#allocation3 + $0x120] sm:$0xff] }
  0x62   : > { %383 = vmatprep.mubr.f32.mxu0 %v6148_v0  ;;  %v4423_v55 = vpack.c.bf16 %v546_v54, %v545_v53  ;;  %v547_v56 = vld [vmem:[#allocation3 + $0x110] sm:$0xff]  ;;  %v550_v60 = vld [vmem:[#allocation3 + $0x140] sm:$0xff] }
  0x63   : > { %v4426_v58 = vpack.c.bf16 %v548_v57, %v547_v56  ;;  %v549_v59 = vld [vmem:[#allocation3 + $0x130] sm:$0xff]  ;;  %v552_v63 = vld [vmem:[#allocation3 + $0x160] sm:$0xff] }
  0x64   : > { %4415 = vmatpush1.bf16.msra.mxu1 %v4414_v35  ;;  %v4429_v61 = vpack.c.bf16 %v550_v60, %v549_v59  ;;  %v551_v62 = vld [vmem:[#allocation3 + $0x150] sm:$0xff]  ;;  %v246_v6 = vld [vmem:[#allocation3 + $0x20] ss:$8 sm:$0x3] }
  0x65   : > { %3676 = vmatmul.mubr.msk.f32.gmra.mrb[6].mxu0 %vm258_vm0, %v229_v32  ;;  %4416 = vmatprep.subr.bf16.mxu1 %v6150_v1  ;;  %v4432_v2 = vpack.c.bf16 %v552_v63, %v551_v62  ;;  %v5195_v7 = vrot.slane %v246_v6, %v5192_v5  ;;  %v5208_v28 = vrot.slane %v246_v6, %v5203_v21 }
  0x66   : > { %388 = vmatprep.mubr.f32.mxu0 %v6148_v0 }
  0x68   : > { %4418 = vmatpush1.bf16.msra.mxu1 %v4417_v49 }
  0x69   : > { %3677 = vmatmul.mubr.msk.f32.gmra.mrb[8].mxu0 %vm258_vm0, %v230_v36  ;;  %4419 = vmatprep.subr.bf16.mxu1 %v6150_v1 }
  0x6a   : > { %394 = vmatprep.mubr.f32.mxu0 %v6148_v0 }
  0x6c   : > { %4421 = vmatpush1.bf16.msra.mxu1 %v4420_v52 }
  0x6d   : > { %3678 = vmatmul.mubr.msk.f32.gmra.mrb[10].mxu0 %vm258_vm0, %v231_v37  ;;  %4422 = vmatprep.subr.bf16.mxu1 %v6150_v1 }
  0x6e   : > { %400 = vmatprep.mubr.f32.mxu0 %v6148_v0 }
  0x70   : > { %4424 = vmatpush1.bf16.msra.mxu1 %v4423_v55 }
  0x71   : > { %3679 = vmatmul.mubr.msk.f32.gmra.mrb[12].mxu0 %vm258_vm0, %v232_v38  ;;  %4425 = vmatprep.subr.bf16.mxu1 %v6150_v1 }
  0x72   : > { %406 = vmatprep.mubr.f32.mxu0 %v6148_v0 }
  0x74   : > { %4427 = vmatpush1.bf16.msra.mxu1 %v4426_v58 }
  0x75   : > { %3680 = vmatmul.mubr.msk.f32.gmra.mrb[14].mxu0 %vm258_vm0, %v233_v39  ;;  %4428 = vmatprep.subr.bf16.mxu1 %v6150_v1 }
  0x76   : > { %412 = vmatprep.mubr.f32.mxu0 %v6148_v0 }
  0x78   : > { %4430 = vmatpush1.bf16.msra.mxu1 %v4429_v61 }
  0x79   : > { %3681 = vmatmul.mubr.msk.f32.gmra.mrb[16].mxu0 %vm258_vm0, %v234_v40  ;;  %4431 = vmatprep.subr.bf16.mxu1 %v6150_v1 }
  0x7a   : > { %418 = vmatprep.mubr.f32.mxu0 %v6148_v0 }
  0x7c   : > { %4433 = vmatpush1.bf16.msra.mxu1 %v4432_v2 }
  0x7d   : > { %3682 = vmatmul.mubr.msk.f32.gmra.mrb[18].mxu0 %vm258_vm0, %v235_v41 }
  0x7e   : > { %424 = vmatprep.mubr.f32.mxu0 %v6148_v0 }
  0x81   : > { %3683 = vmatmul.mubr.msk.f32.gmra.mrb[20].mxu0 %vm258_vm0, %v236_v42 }
  0x82   : > { %430 = vmatprep.mubr.f32.mxu0 %v6148_v0 }
  0x85   : > { %3684 = vmatmul.mubr.msk.f32.gmra.mrb[22].mxu0 %vm258_vm0, %v237_v43 }
  0x86   : > { %436 = vmatprep.mubr.f32.mxu0 %v6148_v0 }
  0x89   : > { %3685 = vmatmul.mubr.msk.f32.gmra.mrb[24].mxu0 %vm258_vm0, %v238_v44 }
  0x8a   : > { %442 = vmatprep.mubr.f32.mxu0 %v6148_v0 }
  0x8d   : > { %3686 = vmatmul.mubr.msk.f32.gmra.mrb[26].mxu0 %vm258_vm0, %v239_v45 }
  0x8e   : > { %448 = vmatprep.mubr.f32.mxu0 %v6148_v0 }
  0x91   : > { %3687 = vmatmul.mubr.msk.f32.gmra.mrb[28].mxu0 %vm258_vm0, %v240_v46 }
  0x92   : > { %860 = vmatprep.mubr.f32.mxu0 %v6148_v0 }
 0x12c   : > { %v370_v8 = vpop.f32.mrb[0].mxu0 }
 0x12d   : > { %v371_v9 = vadd.f32 %v370_v8, %v5195_v7  ;;  %v372_v10 = vpop.f32.mrb[1].mxu0 }
 0x12f   : > { %vm455_vm1 = vcmp.ge.f32.partialorder %v371_v9, 0.0  ;;  %v481_v11 = vmul.f32 0.01, %v371_v9 }
 0x130   : > { %v375_v12 = vpop.f32.mrb[2].mxu0 }
 0x131   : > { %v507_v13 = vsel %vm455_vm1, %v371_v9, %v481_v11  ;;  %v376_v14 = vadd.f32 %v375_v12, %v5195_v7  ;;  %v377_v15 = vpop.f32.mrb[3].mxu0 }
 0x132   : > { %760 = vst.msk [vmem:[#allocation2] sm:$0xff] %vm553_vm2, %v507_v13 }
 0x133   : > { %vm456_vm3 = vcmp.ge.f32.partialorder %v376_v14, 0.0  ;;  %v482_v16 = vmul.f32 0.01, %v376_v14 }
 0x134   : > { %v380_v17 = vpop.f32.mrb[4].mxu0 }
 0x135   : > { %v508_v18 = vsel %vm456_vm3, %v376_v14, %v482_v16  ;;  %v381_v19 = vadd.f32 %v380_v17, %v5195_v7  ;;  %v382_v20 = vpop.f32.mrb[5].mxu0 }
 0x136   : > { %761 = vst.msk [vmem:[#allocation2 + $0x8] sm:$0xff] %vm553_vm2, %v508_v18 }
 0x137   : > { %vm457_vm4 = vcmp.ge.f32.partialorder %v381_v19, 0.0  ;;  %v483_v22 = vmul.f32 0.01, %v381_v19 }
 0x138   : > { %v385_v23 = vpop.f32.mrb[6].mxu0 }
 0x139   : > { %v386_v24 = vadd.f32 %v385_v23, %v5195_v7  ;;  %v772_v25 = vld [vmem:[#allocation2] sm:$0xff]  ;;  %v387_v26 = vpop.f32.mrb[7].mxu0  ;;  %v509_v27 = vsel %vm457_vm4, %v381_v19, %v483_v22 }
 0x13a   : > { %3699 = vmatmul.mubr.msk.f32.vlgmr.msra.gmra.mrb[30].mxu0 %vm553_vm2, %v772_v25  ;;  %764 = vrot.lane.b32.xlu0 %v509_v27, %s4963_s24 }
 0x13b   : > { %v484_v29 = vmul.f32 0.01, %v386_v24  ;;  %866 = vmatprep.mubr.f32.mxu0 %v6148_v0  ;;  %vm458_vm5 = vcmp.ge.f32.partialorder %v386_v24, 0.0 }
 0x13c   : > { %v390_v30 = vpop.f32.mrb[8].mxu0 }
 0x13d   : > { %v391_v31 = vadd.f32 %v390_v30, %v5195_v7  ;;  %v392_v32 = vpop.f32.mrb[9].mxu0  ;;  %v773_v33 = vld [vmem:[#allocation2 + $0x8] sm:$0xff]  ;;  %v510_v34 = vsel %vm458_vm5, %v386_v24, %v484_v29 }
 0x13e   : > { %v393_v35 = vadd.f32 %v392_v32, %v5208_v28  ;;  %3700 = vmatmul.mubr.msk.f32.gmra.mrb[32].mxu0 %vm553_vm2, %v773_v33  ;;  %766 = vrot.lane.b32.xlu0 %v510_v34, %s4963_s24 }
 0x13f   : > { %v485_v36 = vmul.f32 0.01, %v391_v31  ;;  %vm459_vm6 = vcmp.ge.f32.partialorder %v391_v31, 0.0  ;;  %872 = vmatprep.mubr.f32.mxu0 %v6148_v0 }
 0x140   : > { %v396_v37 = vpop.f32.mrb[10].mxu0  ;;  %vm460_vm7 = vcmp.ge.f32.partialorder %v393_v35, 0.0  ;;  %v486_v38 = vmul.f32 0.01, %v393_v35 }
 0x141   : > { %v397_v39 = vadd.f32 %v396_v37, %v5195_v7  ;;  %v398_v40 = vpop.f32.mrb[11].mxu0  ;;  %v511_v41 = vsel %vm459_vm6, %v391_v31, %v485_v36 }
 0x142   : > { %v399_v42 = vadd.f32 %v398_v40, %v5208_v28  ;;  %v512_v43 = vsel %vm460_vm7, %v393_v35, %v486_v38 }
 0x143   : > { %v487_v44 = vmul.f32 0.01, %v397_v39  ;;  %3688 = vmatprep.mubr.msk.f32.mxu1 %vm553_vm2, %v512_v43  ;;  %vm461_vm8 = vcmp.ge.f32.partialorder %v397_v39, 0.0 }
 0x144   : > { %vm462_vm9 = vcmp.ge.f32.partialorder %v399_v42, 0.0  ;;  %v488_v45 = vmul.f32 0.01, %v399_v42  ;;  %v402_v46 = vpop.f32.mrb[12].mxu0  ;;  %652 = vmatmul.mubr.f32.vlgmr.msra.gmra.mrb[0].mxu1 %v511_v41 }
 0x145   : > { %v403_v47 = vadd.f32 %v402_v46, %v5195_v7  ;;  %v404_v48 = vpop.f32.mrb[13].mxu0  ;;  %v513_v49 = vsel %vm461_vm8, %v397_v39, %v487_v44 }
 0x146   : > { %v405_v50 = vadd.f32 %v404_v48, %v5208_v28  ;;  %v514_v51 = vsel %vm462_vm9, %v399_v42, %v488_v45 }
 0x147   : > { %v489_v52 = vmul.f32 0.01, %v403_v47  ;;  %3689 = vmatprep.mubr.msk.f32.mxu1 %vm553_vm2, %v514_v51  ;;  %vm463_vm10 = vcmp.ge.f32.partialorder %v403_v47, 0.0 }
 0x148   : > { %vm464_vm11 = vcmp.ge.f32.partialorder %v405_v50, 0.0  ;;  %v490_v53 = vmul.f32 0.01, %v405_v50  ;;  %v408_v54 = vpop.f32.mrb[14].mxu0  ;;  %657 = vmatmul.mubr.f32.gmra.mrb[2].mxu1 %v513_v49 }
 0x149   : > { %v409_v55 = vadd.f32 %v408_v54, %v5195_v7  ;;  %v410_v56 = vpop.f32.mrb[15].mxu0  ;;  %v515_v57 = vsel %vm463_vm10, %v403_v47, %v489_v52 }
 0x14a   : > { %v411_v58 = vadd.f32 %v410_v56, %v5208_v28  ;;  %v516_v59 = vsel %vm464_vm11, %v405_v50, %v490_v53 }
 0x14b   : > { %v491_v60 = vmul.f32 0.01, %v409_v55  ;;  %3690 = vmatprep.mubr.msk.f32.mxu1 %vm553_vm2, %v516_v59  ;;  %vm465_vm12 = vcmp.ge.f32.partialorder %v409_v55, 0.0 }
 0x14c   : > { %vm466_vm13 = vcmp.ge.f32.partialorder %v411_v58, 0.0  ;;  %v492_v61 = vmul.f32 0.01, %v411_v58  ;;  %v414_v62 = vpop.f32.mrb[16].mxu0  ;;  %662 = vmatmul.mubr.f32.gmra.mrb[4].mxu1 %v515_v57 }
 0x14d   : > { %v415_v63 = vadd.f32 %v414_v62, %v5195_v7  ;;  %v416_v2 = vpop.f32.mrb[17].mxu0  ;;  %v517_v3 = vsel %vm465_vm12, %v409_v55, %v491_v60 }
 0x14e   : > { %v417_v6 = vadd.f32 %v416_v2, %v5208_v28  ;;  %v518_v8 = vsel %vm466_vm13, %v411_v58, %v492_v61 }
 0x14f   : > { %v493_v9 = vmul.f32 0.01, %v415_v63  ;;  %3691 = vmatprep.mubr.msk.f32.mxu1 %vm553_vm2, %v518_v8  ;;  %vm467_vm14 = vcmp.ge.f32.partialorder %v415_v63, 0.0 }
 0x150   : > { %vm468_vm15 = vcmp.ge.f32.partialorder %v417_v6, 0.0  ;;  %v494_v10 = vmul.f32 0.01, %v417_v6  ;;  %v420_v11 = vpop.f32.mrb[18].mxu0  ;;  %667 = vmatmul.mubr.f32.gmra.mrb[6].mxu1 %v517_v3  ;;  %v752_v3 = vld [vmem:[%s5116_s23 + $0x30] sm:$0xff] }
 0x151   : > { %v421_v12 = vadd.f32 %v420_v11, %v5195_v7  ;;  %v422_v13 = vpop.f32.mrb[19].mxu0  ;;  %v519_v14 = vsel %vm467_vm14, %v415_v63, %v493_v9  ;;  %vm4964_vm14 = vmmov 0  }
 0x152   : > { %v423_v15 = vadd.f32 %v422_v13, %v5208_v28  ;;  %v520_v16 = vsel %vm468_vm15, %v417_v6, %v494_v10  ;;  %vm1105_vm15 = vcmask 719872   ;;  %v5266_v13 = vld [vmem:[%s5116_s23 + $0x50] sm:$0xff] }
 0x153   : > { %v495_v17 = vmul.f32 0.01, %v421_v12  ;;  %3692 = vmatprep.mubr.msk.f32.mxu1 %vm553_vm2, %v520_v16  ;;  %vm469_vm1 = vcmp.ge.f32.partialorder %v421_v12, 0.0  ;;  %v5275_v16 = vld [vmem:[%s5116_s23 + $0x58] sm:$0xff] }
 0x154   : > { %vm470_vm3 = vcmp.ge.f32.partialorder %v423_v15, 0.0  ;;  %v496_v18 = vmul.f32 0.01, %v423_v15  ;;  %v426_v19 = vpop.f32.mrb[20].mxu0  ;;  %672 = vmatmul.mubr.f32.gmra.mrb[8].mxu1 %v519_v14 }
 0x155   : > { %v427_v20 = vadd.f32 %v426_v19, %v5195_v7  ;;  %v428_v22 = vpop.f32.mrb[21].mxu0  ;;  %v521_v23 = vsel %vm469_vm1, %v421_v12, %v495_v17 }
 0x156   : > { %v429_v24 = vadd.f32 %v428_v22, %v5208_v28  ;;  %v522_v25 = vsel %vm470_vm3, %v423_v15, %v496_v18 }
 0x157   : > { %v497_v26 = vmul.f32 0.01, %v427_v20  ;;  %3693 = vmatprep.mubr.msk.f32.mxu1 %vm553_vm2, %v522_v25  ;;  %vm471_vm4 = vcmp.ge.f32.partialorder %v427_v20, 0.0 }
 0x158   : > { %vm472_vm5 = vcmp.ge.f32.partialorder %v429_v24, 0.0  ;;  %v498_v27 = vmul.f32 0.01, %v429_v24  ;;  %v432_v29 = vpop.f32.mrb[22].mxu0  ;;  %677 = vmatmul.mubr.f32.gmra.mrb[10].mxu1 %v521_v23 }
 0x159   : > { %v433_v30 = vadd.f32 %v432_v29, %v5195_v7  ;;  %v434_v31 = vpop.f32.mrb[23].mxu0  ;;  %v523_v32 = vsel %vm471_vm4, %v427_v20, %v497_v26  ;;  %v5286_v20 = vld [vmem:[%s5116_s23 + $0x60] sm:$0xff]  ;;  %v5306_v29 = vld [vmem:[%s5116_s23 + $0x70] sm:$0xff] }
 0x15a   : > { %v435_v33 = vadd.f32 %v434_v31, %v5208_v28  ;;  %v524_v34 = vsel %vm472_vm5, %v429_v24, %v498_v27  ;;  %v5295_v24 = vld [vmem:[%s5116_s23 + $0x68] sm:$0xff] }
 0x15b   : > { %v499_v35 = vmul.f32 0.01, %v433_v30  ;;  %3694 = vmatprep.mubr.msk.f32.mxu1 %vm553_vm2, %v524_v34  ;;  %vm473_vm6 = vcmp.ge.f32.partialorder %v433_v30, 0.0 }
 0x15c   : > { %vm474_vm7 = vcmp.ge.f32.partialorder %v435_v33, 0.0  ;;  %v500_v36 = vmul.f32 0.01, %v435_v33  ;;  %v438_v37 = vpop.f32.mrb[24].mxu0  ;;  %682 = vmatmul.mubr.f32.gmra.mrb[12].mxu1 %v523_v32  ;;  %v5315_v32 = vld [vmem:[%s5116_s23 + $0x78] sm:$0xff] }
 0x15d   : > { %v439_v38 = vadd.f32 %v438_v37, %v5195_v7  ;;  %v440_v39 = vpop.f32.mrb[25].mxu0  ;;  %v525_v40 = vsel %vm473_vm6, %v433_v30, %v499_v35 }
 0x15e   : > { %v441_v41 = vadd.f32 %v440_v39, %v5208_v28  ;;  %v526_v42 = vsel %vm474_vm7, %v435_v33, %v500_v36  ;;  %v5326_v36 = vld [vmem:[%s5116_s23 + $0x80] sm:$0xff]  ;;  %v5335_v39 = vld [vmem:[%s5116_s23 + $0x88] sm:$0xff] }
 0x15f   : > { %v501_v43 = vmul.f32 0.01, %v439_v38  ;;  %3695 = vmatprep.mubr.msk.f32.mxu1 %vm553_vm2, %v526_v42  ;;  %vm475_vm8 = vcmp.ge.f32.partialorder %v439_v38, 0.0 }
 0x160   : > { %vm476_vm9 = vcmp.ge.f32.partialorder %v441_v41, 0.0  ;;  %v502_v44 = vmul.f32 0.01, %v441_v41  ;;  %v444_v45 = vpop.f32.mrb[26].mxu0  ;;  %687 = vmatmul.mubr.f32.gmra.mrb[14].mxu1 %v525_v40 }
 0x161   : > { %v445_v46 = vadd.f32 %v444_v45, %v5195_v7  ;;  %v446_v47 = vpop.f32.mrb[27].mxu0  ;;  %v527_v48 = vsel %vm475_vm8, %v439_v38, %v501_v43  ;;  %v5346_v43 = vld [vmem:[%s5116_s23 + $0x90] sm:$0xff] }
 0x162   : > { %v447_v49 = vadd.f32 %v446_v47, %v5208_v28  ;;  %v528_v50 = vsel %vm476_vm9, %v441_v41, %v502_v44 }
 0x163   : > { %v503_v51 = vmul.f32 0.01, %v445_v46  ;;  %3696 = vmatprep.mubr.msk.f32.mxu1 %vm553_vm2, %v528_v50  ;;  %vm477_vm10 = vcmp.ge.f32.partialorder %v445_v46, 0.0  ;;  %v5366_v50 = vld [vmem:[%s5116_s23 + $0xa0] sm:$0xff] }
 0x164   : > { %vm478_vm11 = vcmp.ge.f32.partialorder %v447_v49, 0.0  ;;  %v504_v52 = vmul.f32 0.01, %v447_v49  ;;  %692 = vmatmul.mubr.f32.gmra.mrb[16].mxu1 %v527_v48  ;;  %v450_v53 = vpop.f32.mrb[28].mxu0 }
 0x165   : > { %v451_v54 = vadd.f32 %v450_v53, %v5195_v7  ;;  %v452_v55 = vpop.f32.mrb[29].mxu0  ;;  %v529_v56 = vsel %vm477_vm10, %v445_v46, %v503_v51  ;;  %v5355_v46 = vld [vmem:[%s5116_s23 + $0x98] sm:$0xff] }
 0x166   : > { %v453_v57 = vadd.f32 %v452_v55, %v5208_v28  ;;  %v530_v58 = vsel %vm478_vm11, %v447_v49, %v504_v52  ;;  %v753_v53 = vld [vmem:[%s5116_s23 + $0x38] sm:$0xff] }
 0x167   : > { %v505_v59 = vmul.f32 0.01, %v451_v54  ;;  %3697 = vmatprep.mubr.msk.f32.mxu1 %vm553_vm2, %v530_v58  ;;  %vm479_vm12 = vcmp.ge.f32.partialorder %v451_v54, 0.0 }
 0x168   : > { %vm480_vm13 = vcmp.ge.f32.partialorder %v453_v57, 0.0  ;;  %v506_v60 = vmul.f32 0.01, %v453_v57  ;;  %697 = vmatmul.mubr.f32.gmra.mrb[18].mxu1 %v529_v56 }
 0x169   : > { %v531_v61 = vsel %vm479_vm12, %v451_v54, %v505_v59  ;;  %v6146_v54 = vmov 0  }
 0x16a   : > { %v532_v62 = vsel %vm480_vm13, %v453_v57, %v506_v60  ;;  %4732 = vset.pattern.permute.xlu1 %v6146_v54  ;;  %4733 = vset.pattern.permute.xlu0 %v6146_v54 }
 0x16b   : > { %3698 = vmatprep.mubr.msk.f32.mxu1 %vm553_vm2, %v532_v62 }
 0x16c   : > { %702 = vmatmul.mubr.f32.gmra.mrb[20].mxu1 %v531_v61 }
 0x16d   : > { %4039 = vmatprep.mubr.msk.f32.mxu1 %vm1105_vm15, %v752_v3 }
 0x1ac   : > { %v765_v63 = vpop.permute.xlu0 %764 }
 0x1ad   : > { %770 = vst.msk [vmem:[#allocation2 + $0x10] sm:$0xff] %vm553_vm2, %v765_v63 }
 0x1b0   : > { %v767_v7 = vpop.permute.xlu0 %766 }
 0x1b1   : > { %771 = vst.msk [vmem:[#allocation2 + $0x18] sm:$0xff] %vm553_vm2, %v767_v7 }
 0x1b4   : > { %v774_v28 = vld [vmem:[#allocation2 + $0x10] sm:$0xff] }
 0x1b5   : > { %3701 = vmatmul.mubr.msk.f32.gmra.mrb[34].mxu0 %vm553_vm2, %v774_v28 }
 0x1b6   : > { %878 = vmatprep.mubr.f32.mxu0 %v6148_v0 }
 0x1b8   : > { %v775_v2 = vld [vmem:[#allocation2 + $0x18] sm:$0xff] }
 0x1b9   : > { %3702 = vmatmul.mubr.msk.f32.gmra.mrb[36].mxu0 %vm553_vm2, %v775_v2 }
 0x1ba   : > { %3984 = vmatprep.mubr.msk.f32.mxu0 %vm4964_vm14, %v6148_v0 }
 0x20d   : > { %v862_v6 = vpop.f32.mrb[30].mxu0 }
 0x20e   : > { %v5257_v8 = vpop.f32.mrb[31].mxu0 }
 0x211   : > { %v868_v9 = vpop.f32.mrb[32].mxu0 }
 0x212   : > { %v5259_v10 = vpack.c.bf16 %v868_v9, %v862_v6  ;;  %v5261_v11 = vpop.f32.mrb[33].mxu0 }
 0x213   : > { %v4443_v12 = vpack.c.bf16 %v5261_v11, %v5257_v8 }
 0x215   : > { %4444 = vmatpush3.bf16.msra.mxu0 %v4443_v12 }
 0x217   : > { %v5268_v14 = vpop.f32.mrb[0].mxu1 }
 0x218   : > { %3985 = vmatmul.mubr.msk.f32.vlgmr.msra.gmra.mrb[38].mxu0 %vm258_vm0, %v5266_v13  ;;  %v655_v15 = vpop.f32.mrb[1].mxu1 }
 0x219   : > { %3987 = vmatprep.mubr.msk.f32.mxu0 %vm4964_vm14, %v6148_v0 }
 0x21b   : > { %v5277_v17 = vpop.f32.mrb[2].mxu1 }
 0x21c   : > { %3988 = vmatmul.mubr.msk.f32.gmra.mrb[40].mxu0 %vm258_vm0, %v5275_v16  ;;  %v660_v18 = vpop.f32.mrb[3].mxu1  ;;  %v4445_v19 = vpack.c.bf16 %v5277_v17, %v5268_v14 }
 0x21d   : > { %3990 = vmatprep.mubr.msk.f32.mxu0 %vm4964_vm14, %v6148_v0 }
 0x21e   : > { %4446 = vmatprep.subr.bf16.mxu1 %v4445_v19 }
 0x21f   : > { %v5288_v22 = vpop.f32.mrb[4].mxu1  ;;  %4448 = vmatpush3.bf16.msra.mxu1 %v4445_v19 }
 0x220   : > { %3991 = vmatmul.mubr.msk.f32.gmra.mrb[42].mxu0 %vm258_vm0, %v5286_v20  ;;  %v665_v23 = vpop.f32.mrb[5].mxu1 }
 0x221   : > { %3993 = vmatprep.mubr.msk.f32.mxu0 %vm4964_vm14, %v6148_v0 }
 0x223   : > { %v5297_v25 = vpop.f32.mrb[6].mxu1 }
 0x224   : > { %3994 = vmatmul.mubr.msk.f32.gmra.mrb[44].mxu0 %vm258_vm0, %v5295_v24  ;;  %v670_v26 = vpop.f32.mrb[7].mxu1  ;;  %v4449_v27 = vpack.c.bf16 %v5297_v25, %v5288_v22 }
 0x225   : > { %3996 = vmatprep.mubr.msk.f32.mxu0 %vm4964_vm14, %v6148_v0 }
 0x226   : > { %4450 = vmatprep.subr.bf16.mxu1 %v4449_v27 }
 0x227   : > { %v5308_v30 = vpop.f32.mrb[8].mxu1  ;;  %4452 = vmatpush3.bf16.msra.mxu1 %v4449_v27 }
 0x228   : > { %3997 = vmatmul.mubr.msk.f32.gmra.mrb[46].mxu0 %vm258_vm0, %v5306_v29  ;;  %v675_v31 = vpop.f32.mrb[9].mxu1 }
 0x229   : > { %3999 = vmatprep.mubr.msk.f32.mxu0 %vm4964_vm14, %v6148_v0 }
 0x22b   : > { %v5317_v33 = vpop.f32.mrb[10].mxu1 }
 0x22c   : > { %4000 = vmatmul.mubr.msk.f32.gmra.mrb[48].mxu0 %vm258_vm0, %v5315_v32  ;;  %v680_v34 = vpop.f32.mrb[11].mxu1  ;;  %v4453_v35 = vpack.c.bf16 %v5317_v33, %v5308_v30 }
 0x22d   : > { %4002 = vmatprep.mubr.msk.f32.mxu0 %vm4964_vm14, %v6148_v0 }
 0x22e   : > { %4454 = vmatprep.subr.bf16.mxu1 %v4453_v35 }
 0x22f   : > { %v5328_v37 = vpop.f32.mrb[12].mxu1  ;;  %4456 = vmatpush3.bf16.msra.mxu1 %v4453_v35 }
 0x230   : > { %4003 = vmatmul.mubr.msk.f32.gmra.mrb[50].mxu0 %vm258_vm0, %v5326_v36  ;;  %v685_v38 = vpop.f32.mrb[13].mxu1 }
 0x231   : > { %4005 = vmatprep.mubr.msk.f32.mxu0 %vm4964_vm14, %v6148_v0 }
 0x233   : > { %v5337_v40 = vpop.f32.mrb[14].mxu1 }
 0x234   : > { %4006 = vmatmul.mubr.msk.f32.gmra.mrb[52].mxu0 %vm258_vm0, %v5335_v39  ;;  %v690_v41 = vpop.f32.mrb[15].mxu1  ;;  %v4457_v42 = vpack.c.bf16 %v5337_v40, %v5328_v37 }
 0x235   : > { %4008 = vmatprep.mubr.msk.f32.mxu0 %vm4964_vm14, %v6148_v0 }
 0x236   : > { %4458 = vmatprep.subr.bf16.mxu1 %v4457_v42 }
 0x237   : > { %v5348_v44 = vpop.f32.mrb[16].mxu1  ;;  %4460 = vmatpush3.bf16.msra.mxu1 %v4457_v42 }
 0x238   : > { %4009 = vmatmul.mubr.msk.f32.gmra.mrb[54].mxu0 %vm258_vm0, %v5346_v43  ;;  %v695_v45 = vpop.f32.mrb[17].mxu1 }
 0x239   : > { %4011 = vmatprep.mubr.msk.f32.mxu0 %vm4964_vm14, %v6148_v0 }
 0x23b   : > { %v5357_v47 = vpop.f32.mrb[18].mxu1 }
 0x23c   : > { %4012 = vmatmul.mubr.msk.f32.gmra.mrb[56].mxu0 %vm258_vm0, %v5355_v46  ;;  %v4461_v48 = vpack.c.bf16 %v5357_v47, %v5348_v44  ;;  %v700_v49 = vpop.f32.mrb[19].mxu1 }
 0x23d   : > { %4014 = vmatprep.mubr.msk.f32.mxu0 %vm4964_vm14, %v6148_v0 }
 0x23e   : > { %4462 = vmatprep.subr.bf16.mxu1 %v4461_v48 }
 0x23f   : > { %4464 = vmatpush3.bf16.msra.mxu1 %v4461_v48  ;;  %v5368_v51 = vpop.f32.mrb[20].mxu1 }
 0x240   : > { %4015 = vmatmul.mubr.msk.f32.gmra.mrb[58].mxu0 %vm258_vm0, %v5366_v50  ;;  %4037 = vmatprep.subr.mxu1 %v5368_v51  ;;  %v705_v52 = vpop.f32.mrb[21].mxu1 }
 0x243   : > { %4038 = vmatpush3.msra.mxu1 %v5368_v51 }
 0x244   : > { %4040 = vmatmul.mubr.msk.f32.vlgmr.msra.gmra.mrb[22].mxu1 %vm1105_vm15, %v753_v53 }
 0x288   : > { %v874_v55 = vpop.f32.mrb[34].mxu0 }
 0x289   : > { %v5378_v56 = vpop.f32.mrb[35].mxu0 }
 0x28c   : > { %v880_v57 = vpop.f32.mrb[36].mxu0 }
 0x28d   : > { %v5380_v58 = vpack.i.bf16 %v880_v57, %v874_v55  ;;  %v5382_v59 = vpop.f32.mrb[37].mxu0 }
 0x28e   : > { %v5386_v60 = vpack.i.bf16 %v5382_v59, %v5378_v56 }
 0x2eb   : > { %v985_v61 = vpop.f32.mrb[38].mxu0 }
 0x2ec   : > { %v986_v62 = vadd.f32 %v985_v61, %v5268_v14  ;;  %v3986_v63 = vpop.f32.mrb[39].mxu0 }
 0x2ee   : > { %1041 = vperm.xlu1 %4732, %v986_v62  }
 0x2ef   : > { %v990_v7 = vpop.f32.mrb[40].mxu0 }
 0x2f0   : > { %v991_v28 = vadd.f32 %v990_v7, %v5277_v17  ;;  %v3989_v2 = vpop.f32.mrb[41].mxu0 }
 0x2f2   : > { %1046 = vperm.xlu1 %4732, %v991_v28  }
 0x2f3   : > { %v995_v3 = vpop.f32.mrb[42].mxu0 }
 0x2f4   : > { %v996_v6 = vadd.f32 %v995_v3, %v5288_v22  ;;  %v3992_v9 = vpop.f32.mrb[43].mxu0 }
 0x2f5   : > { %v707_v9 = vld [vmem:[%s5116_s23] sm:$0xff] }
 0x2f6   : > { %1051 = vperm.xlu0 %4733, %v996_v6   ;;  %4064 = vmatprep.mubr.msk.f32.mxu1 %vm1105_vm15, %v707_v9 }
 0x2f7   : > { %v1000_v12 = vpop.f32.mrb[44].mxu0 }
 0x2f8   : > { %v1001_v15 = vadd.f32 %v1000_v12, %v5297_v25  ;;  %v3995_v18 = vpop.f32.mrb[45].mxu0  ;;  %v6144_v12 = vmov 1  }
 0x2fa   : > { %1056 = vperm.xlu1 %4732, %v1001_v15  }
 0x2fb   : > { %v1005_v19 = vpop.f32.mrb[46].mxu0 }
 0x2fc   : > { %v1006_v23 = vadd.f32 %v1005_v19, %v5308_v30  ;;  %v3998_v26 = vpop.f32.mrb[47].mxu0 }
 0x2fe   : > { %1061 = vperm.xlu1 %4732, %v1006_v23  }
 0x2ff   : > { %v1010_v27 = vpop.f32.mrb[48].mxu0 }
 0x300   : > { %v1011_v31 = vadd.f32 %v1010_v27, %v5317_v33  ;;  %v4001_v34 = vpop.f32.mrb[49].mxu0 }
 0x302   : > { %1066 = vperm.xlu0 %4733, %v1011_v31  }
 0x303   : > { %v1015_v35 = vpop.f32.mrb[50].mxu0 }
 0x304   : > { %v1016_v38 = vadd.f32 %v1015_v35, %v5328_v37  ;;  %v4004_v41 = vpop.f32.mrb[51].mxu0 }
 0x306   : > { %1071 = vperm.xlu1 %4732, %v1016_v38  }
 0x307   : > { %v1020_v42 = vpop.f32.mrb[52].mxu0 }
 0x308   : > { %v1021_v45 = vadd.f32 %v1020_v42, %v5337_v40  ;;  %v4007_v48 = vpop.f32.mrb[53].mxu0 }
 0x30a   : > { %1076 = vperm.xlu0 %4733, %v1021_v45  }
 0x30b   : > { %v1025_v49 = vpop.f32.mrb[54].mxu0 }
 0x30c   : > { %v1026_v52 = vadd.f32 %v1025_v49, %v5348_v44  ;;  %v4010_v53 = vpop.f32.mrb[55].mxu0 }
 0x30e   : > { %1081 = vperm.xlu1 %4732, %v1026_v52  }
 0x30f   : > { %v1030_v55 = vpop.f32.mrb[56].mxu0 }
 0x310   : > { %v1031_v57 = vadd.f32 %v1030_v55, %v5357_v47  ;;  %v4013_v61 = vpop.f32.mrb[57].mxu0 }
 0x312   : > { %1086 = vperm.xlu0 %4733, %v1031_v57  }
 0x313   : > { %v1035_v62 = vpop.f32.mrb[58].mxu0 }
 0x314   : > { %v1036_v63 = vadd.f32 %v1035_v62, %v5368_v51  ;;  %v4016_v7 = vpop.f32.mrb[59].mxu0 }
 0x316   : > { %1091 = vperm.xlu1 %4732, %v1036_v63   ;;  %v708_v63 = vld [vmem:[%s5116_s23 + $0x8] sm:$0xff] }
 0x317   : > { %v4041_v28 = vpop.f32.mrb[22].mxu1 }
 0x318   : > { %v1188_v2 = vadd.f32 %v4041_v28, %v5261_v11  ;;  %v1178_v3 = vpop.f32.mrb[23].mxu1 }
 0x319   : > { %v1187_v6 = vadd.f32 %v1178_v3, %v5257_v8 }
 0x31a   : > { %1196 = vperm.xlu1 %4732, %v1188_v2  }
 0x31b   : > { %1191 = vperm.xlu0 %4733, %v1187_v6  }
 0x31e   : > { %4735 = vset.pattern.permute.xlu1 %v6144_v12 }
 0x31f   : > { %4734 = vset.pattern.permute.xlu0 %v6144_v12  ;;  %1289 = vperm.xlu1 %4735, %v5261_v11  }
 0x320   : > { %1284 = vperm.xlu0 %4734, %v5257_v8  }
 0x323   : > { %4741 = vset.pattern.permute.xlu1 %v6146_v54 }
 0x324   : > { %4742 = vset.pattern.permute.xlu0 %v6146_v54 }
 0x36d   : > { %v1042_v15 = vpop.permute.xlu1 %1041 }
 0x36e   : > { %v1094_v19 = vmul.f32 %v1042_v15, %v5266_v13  ;;  %v5426_v15 = vld [vmem:[%s5116_s23 + $0x160] sm:$0xff] }
 0x36f   : > { %vm1301_vm3 = vcmp.gt.f32.partialorder %v5426_v15, 0.0 }
 0x371   : > { %v1047_v18 = vpop.permute.xlu1 %1046 }
 0x372   : > { %v1095_v23 = vmul.f32 %v1047_v18, %v5275_v16 }
 0x374   : > { %v4465_v26 = vpack.c.bf16 %v1095_v23, %v1094_v19  ;;  %v5429_v23 = vld [vmem:[%s5116_s23 + $0x158] sm:$0xff] }
 0x375   : > { %v1052_v27 = vpop.permute.xlu0 %1051  ;;  %vm1300_vm5 = vcmp.gt.f32.partialorder %v5429_v23, 0.0 }
 0x376   : > { %4466 = vmatprep.subr.bf16.mxu1 %v4465_v26  ;;  %v1096_v34 = vmul.f32 %v1052_v27, %v5286_v20 }
 0x377   : > { %4468 = vmatpush3.bf16.msra.mxu1 %v4465_v26 }
 0x379   : > { %v1057_v31 = vpop.permute.xlu1 %1056 }
 0x37a   : > { %v1097_v35 = vmul.f32 %v1057_v31, %v5295_v24 }
 0x37c   : > { %v4469_v38 = vpack.c.bf16 %v1097_v35, %v1096_v34 }
 0x37d   : > { %v1062_v41 = vpop.permute.xlu1 %1061 }
 0x37e   : > { %4470 = vmatprep.subr.bf16.mxu1 %v4469_v38  ;;  %v1098_v45 = vmul.f32 %v1062_v41, %v5306_v29 }
 0x37f   : > { %4472 = vmatpush3.bf16.msra.mxu1 %v4469_v38 }
 0x381   : > { %v1067_v42 = vpop.permute.xlu0 %1066 }
 0x382   : > { %v1099_v13 = vmul.f32 %v1067_v42, %v5315_v32 }
 0x384   : > { %v4473_v48 = vpack.c.bf16 %v1099_v13, %v1098_v45 }
 0x385   : > { %v1072_v16 = vpop.permute.xlu1 %1071 }
 0x386   : > { %4474 = vmatprep.subr.bf16.mxu1 %v4473_v48  ;;  %v1100_v52 = vmul.f32 %v1072_v16, %v5326_v36  ;;  %v757_v36 = vld [vmem:[#allocation3 + $0x220] sm:$0xff] }
 0x387   : > { %4476 = vmatpush3.bf16.msra.mxu1 %v4473_v48 }
 0x389   : > { %v1077_v49 = vpop.permute.xlu0 %1076 }
 0x38a   : > { %v1101_v20 = vmul.f32 %v1077_v49, %v5335_v39 }
 0x38c   : > { %v4477_v24 = vpack.c.bf16 %v1101_v20, %v1100_v52 }
 0x38d   : > { %v1082_v53 = vpop.permute.xlu1 %1081 }
 0x38e   : > { %4478 = vmatprep.subr.bf16.mxu1 %v4477_v24  ;;  %v1102_v57 = vmul.f32 %v1082_v53, %v5346_v43  ;;  %v756_v43 = vld [vmem:[#allocation3 + $0x210] sm:$0xff] }
 0x38f   : > { %4480 = vmatpush3.bf16.msra.mxu1 %v4477_v24 }
 0x391   : > { %v1087_v55 = vpop.permute.xlu0 %1086 }
 0x392   : > { %v1103_v29 = vmul.f32 %v1087_v55, %v5355_v46 }
 0x394   : > { %v4481_v32 = vpack.c.bf16 %v1103_v29, %v1102_v57 }
 0x395   : > { %v1092_v61 = vpop.permute.xlu1 %1091 }
 0x396   : > { %v1104_v62 = vmul.f32 %v1092_v61, %v5366_v50  ;;  %4482 = vmatprep.subr.bf16.mxu1 %v4481_v32 }
 0x397   : > { %4484 = vmatpush3.bf16.msra.mxu1 %v4481_v32 }
 0x398   : > { %4062 = vmatprep.subr.mxu1 %v1104_v62 }
 0x399   : > { %v1197_v39 = vpop.permute.xlu1 %1196 }
 0x39a   : > { %v1192_v46 = vpop.permute.xlu0 %1191  ;;  %v1200_v50 = vmul.f32 %v1197_v39, %v757_v36 }
 0x39b   : > { %4063 = vmatpush3.msra.mxu1 %v1104_v62  ;;  %v1199_v7 = vmul.f32 %v1192_v46, %v756_v43 }
 0x39c   : > { %4065 = vmatmul.mubr.msk.f32.vlgmr.msra.gmra.mrb[24].mxu1 %vm1105_vm15, %v708_v63  ;;  %4486 = vmatprep.subr.bf16.mxu1 %v5259_v10 }
 0x39d   : > { %4488 = vmatpush3.bf16.msra.mxu1 %v5259_v10 }
 0x39e   : > { %4489 = vmatprep.subr.bf16.mxu1 %v6150_v1  ;;  %v1290_v6 = vpop.permute.xlu1 %1289 }
 0x39f   : > { %v1285_v18 = vpop.permute.xlu0 %1284 }
 0x46f   : > { %v4066_v28 = vpop.f32.mrb[24].mxu1 }
 0x470   : > { %v1279_v2 = vadd.f32 %v4066_v28, %v1200_v50  ;;  %v1273_v3 = vpop.f32.mrb[25].mxu1 }
 0x471   : > { %v1274_v9 = vadd.f32 %v1273_v3, %v1199_v7  ;;  %v5461_v3 = vld [vmem:[%s5116_s23 + $0xa8] sm:$0xff] }
 0x472   : > { %v1293_v19 = vadd.f32 %v1290_v6, %v1279_v2  ;;  %v5469_v6 = vld [vmem:[%s5116_s23 + $0xb0] sm:$0xff] }
 0x473   : > { %v1292_v10 = vadd.f32 %v1285_v18, %v1274_v9  ;;  %v5476_v9 = vld [vmem:[%s5116_s23 + $0xb8] sm:$0xff]  ;;  %v5483_v18 = vld [vmem:[%s5116_s23 + $0xc0] sm:$0xff] }
 0x474   : > { %vm1295_vm1 = vcmp.ge.f32.partialorder %v1293_v19, 0.0  ;;  %v1297_v26 = vmul.f32 0.2, %v1293_v19 }
 0x475   : > { %vm1294_vm4 = vcmp.ge.f32.partialorder %v1292_v10, 0.0  ;;  %v1296_v27 = vmul.f32 0.2, %v1292_v10 }
 0x476   : > { %v1299_v31 = vsel %vm1295_vm1, %v1293_v19, %v1297_v26  ;;  %v5490_v19 = vld [vmem:[%s5116_s23 + $0xc8] sm:$0xff]  ;;  %v5504_v26 = vld [vmem:[%s5116_s23 + $0xd8] sm:$0xff] }
 0x477   : > { %v1303_v34 = vsel %vm1301_vm3, %v1299_v31, -1e+30  ;;  %v1298_v35 = vsel %vm1294_vm4, %v1292_v10, %v1296_v27  ;;  %v5497_v10 = vld [vmem:[%s5116_s23 + $0xd0] sm:$0xff]  ;;  %v5511_v27 = vld [vmem:[%s5116_s23 + $0xe0] sm:$0xff]  ;;  %v5518_v31 = vld [vmem:[%s5116_s23 + $0xe8] sm:$0xff] }
 0x478   : > { %v1307_v38 = vsel %vm258_vm0, %v1303_v34, -inf  ;;  %v1302_v41 = vsel %vm1300_vm5, %v1298_v35, -1e+30  ;;  %v5532_v35 = vld [vmem:[%s5116_s23 + $0xf8] sm:$0xff] }
 0x479   : > { %1308 = vmax.xlane.f32.xlu0 %v1307_v38  ;;  %v1304_v42 = vsel %vm258_vm0, %v1302_v41, -inf }
 0x47a   : > { %1305 = vmax.xlane.f32.xlu1 %v1304_v42 }
 0x506   : > { %v1309_v45 = vpop.xlane.xlu0 %1308 }
 0x507   : > { %v1311_v13 = vsub.f32 %v1303_v34, %v1309_v45  ;;  %v1306_v48 = vpop.xlane.xlu1 %1305  ;;  %v5525_v34 = vld [vmem:[%s5116_s23 + $0xf0] sm:$0xff] }
 0x508   : > { %v1310_v16 = vsub.f32 %v1302_v41, %v1306_v48 }
 0x509   : > { %v1314_v49 = vmul.f32 1.442695, %v1311_v13 }
 0x50a   : > { %v1312_v52 = vmul.f32 1.442695, %v1310_v16 }
 0x50b   : > { %4783 = vpow2.f32 %v1314_v49 }
 0x50c   : > { %4785 = vpow2.f32 %v1312_v52 }
 0x515   : > { %v4784_v20 = vpop.eup %4783 }
 0x516   : > { %v4786_v24 = vpop.eup %4785  ;;  %v1317_v53 = vmul.f32 %v4784_v20, %v5426_v15 }
 0x517   : > { %v1316_v55 = vmul.f32 %v4786_v24, %v5429_v23 }
 0x518   : > { %v1321_v57 = vsel %vm258_vm0, %v1317_v53, 0.0 }
 0x519   : > { %1322 = vadd.xlane.f32.xlu1 %v1321_v57  ;;  %v1318_v29 = vsel %vm258_vm0, %v1316_v55, 0.0 }
 0x51a   : > { %1319 = vadd.xlane.f32.xlu0 %v1318_v29 }
 0x52a   : > { %1436 = vrot.lane.b32.xlu1 %v5268_v14, %s4967_s15 }
 0x52e   : > { %1438 = vrot.lane.b32.xlu1 %v5277_v17, %s4967_s15 }
 0x530   : > { %4737 = vrot.lane.b32.xlu0 %v5386_v60, %s4968_s27 }
 0x532   : > { %1442 = vrot.lane.b32.xlu1 %v5297_v25, %s4967_s15 }
 0x534   : > { %1440 = vrot.lane.b32.xlu0 %v5288_v22, %s4967_s15 }
 0x536   : > { %1446 = vrot.lane.b32.xlu1 %v5317_v33, %s4967_s15 }
 0x538   : > { %1444 = vrot.lane.b32.xlu0 %v5308_v30, %s4967_s15 }
 0x53a   : > { %1450 = vrot.lane.b32.xlu1 %v5337_v40, %s4967_s15 }
 0x53c   : > { %1448 = vrot.lane.b32.xlu0 %v5328_v37, %s4967_s15 }
 0x53e   : > { %1454 = vrot.lane.b32.xlu1 %v5357_v47, %s4967_s15 }
 0x540   : > { %1452 = vrot.lane.b32.xlu0 %v5348_v44, %s4967_s15 }
 0x544   : > { %1456 = vrot.lane.b32.xlu0 %v5368_v51, %s4967_s15 }
 0x5a6   : > { %v1323_v32 = vpop.xlane.xlu1 %1322 }
 0x5a7   : > { %vm1325_vm6 = vcmp.gt.f32.partialorder %v1323_v32, 0.0  ;;  %v1320_v61 = vpop.xlane.xlu0 %1319 }
 0x5a8   : > { %v1327_v62 = vsel %vm1325_vm6, %v1323_v32, 1.0  ;;  %vm1324_vm7 = vcmp.gt.f32.partialorder %v1320_v61, 0.0 }
 0x5a9   : > { %4787 = vrcp.f32 %v1327_v62  ;;  %v1326_v63 = vsel %vm1324_vm7, %v1320_v61, 1.0 }
 0x5aa   : > { %4789 = vrcp.f32 %v1326_v63  ;;  %v1437_v42 = vpop.permute.xlu1 %1436 }
 0x5ab   : > { %v4738_v36 = vpop.permute.xlu0 %4737 }
 0x5ac   : > { %v4740_v43 = vunpack.i.h.bf16 %v4738_v36  ;;  %v4739_v46 = vunpack.i.l.bf16 %v4738_v36 }
 0x5ae   : > { %v4490_v2 = vpack.c.bf16 %v4740_v43, %v4739_v46  ;;  %v1439_v16 = vpop.permute.xlu1 %1438 }
 0x5af   : > { %v1441_v24 = vpop.permute.xlu0 %1440 }
 0x5b2   : > { %v1443_v29 = vpop.permute.xlu1 %1442 }
 0x5b3   : > { %v4788_v39 = vpop.eup %4787  ;;  %v1445_v63 = vpop.permute.xlu0 %1444 }
 0x5b4   : > { %v4790_v50 = vpop.eup %4789  ;;  %v1331_v28 = vmul.f32 %v4788_v39, %v1317_v53 }
 0x5b5   : > { %v1329_v7 = vmul.f32 %v4790_v50, %v1316_v55 }
 0x5b6   : > { %v1447_v46 = vpop.permute.xlu1 %1446 }
 0x5b7   : > { %4071 = vmatprep.mubr.msk.f32.mxu1 %vm258_vm0, %v1329_v7 }
 0x5b8   : > { %4072 = vmatmul.mubr.msk.f32.vlgmr.msra.gmra.mrb[26].mxu1 %vm258_vm0, %v1331_v28 }
 0x5b9   : > { %4491 = vmatpush3.bf16.msra.mxu1 %v4490_v2  ;;  %4078 = vmatprep.mubr.msk.f32.mxu1 %vm4964_vm14, %v6148_v0  ;;  %v1449_v2 = vpop.permute.xlu0 %1448 }
 0x5ba   : > { %4645 = vmatprep.subr.bf16.mxu1 %v6150_v1 }
 0x5bc   : > { %4079 = vmatmul.mubr.msk.f32.vlgmr.msra.gmra.mrb[28].mxu1 %vm258_vm0, %v5461_v3 }
 0x5bd   : > { %4081 = vmatprep.mubr.msk.f32.mxu1 %vm4964_vm14, %v6148_v0 }
 0x5c0   : > { %4082 = vmatmul.mubr.msk.f32.gmra.mrb[30].mxu1 %vm258_vm0, %v5469_v6 }
 0x5c1   : > { %4084 = vmatprep.mubr.msk.f32.mxu1 %vm4964_vm14, %v6148_v0 }
 0x5c4   : > { %4085 = vmatmul.mubr.msk.f32.gmra.mrb[32].mxu1 %vm258_vm0, %v5476_v9 }
 0x5c5   : > { %4087 = vmatprep.mubr.msk.f32.mxu1 %vm4964_vm14, %v6148_v0 }
 0x5c8   : > { %4088 = vmatmul.mubr.msk.f32.gmra.mrb[34].mxu1 %vm258_vm0, %v5483_v18 }
 0x5c9   : > { %4090 = vmatprep.mubr.msk.f32.mxu1 %vm4964_vm14, %v6148_v0 }
 0x5cc   : > { %4091 = vmatmul.mubr.msk.f32.gmra.mrb[36].mxu1 %vm258_vm0, %v5490_v19 }
 0x5cd   : > { %4093 = vmatprep.mubr.msk.f32.mxu1 %vm4964_vm14, %v6148_v0 }
 0x5d0   : > { %4094 = vmatmul.mubr.msk.f32.gmra.mrb[38].mxu1 %vm258_vm0, %v5497_v10 }
 0x5d1   : > { %4096 = vmatprep.mubr.msk.f32.mxu1 %vm4964_vm14, %v6148_v0 }
 0x5d4   : > { %4097 = vmatmul.mubr.msk.f32.gmra.mrb[40].mxu1 %vm258_vm0, %v5504_v26 }
 0x5d5   : > { %4099 = vmatprep.mubr.msk.f32.mxu1 %vm4964_vm14, %v6148_v0 }
 0x5d8   : > { %4100 = vmatmul.mubr.msk.f32.gmra.mrb[42].mxu1 %vm258_vm0, %v5511_v27 }
 0x5d9   : > { %4102 = vmatprep.mubr.msk.f32.mxu1 %vm4964_vm14, %v6148_v0 }
 0x5dc   : > { %4103 = vmatmul.mubr.msk.f32.gmra.mrb[44].mxu1 %vm258_vm0, %v5518_v31 }
 0x5dd   : > { %4105 = vmatprep.mubr.msk.f32.mxu1 %vm4964_vm14, %v6148_v0 }
 0x5e0   : > { %4106 = vmatmul.mubr.msk.f32.gmra.mrb[46].mxu1 %vm258_vm0, %v5525_v34 }
 0x5e1   : > { %4108 = vmatprep.mubr.msk.f32.mxu1 %vm4964_vm14, %v6148_v0 }
 0x5e4   : > { %4109 = vmatmul.mubr.msk.f32.gmra.mrb[48].mxu1 %vm258_vm0, %v5532_v35 }
 0x5e5   : > { %4165 = vmatprep.mubr.msk.f32.mxu1 %vm4964_vm14, %v6148_v0 }
 0x68b   : > { %v5538_v38 = vpop.f32.mrb[26].mxu1 }
 0x68c   : > { %v5540_v41 = vpop.f32.mrb[27].mxu1 }
 0x68f   : > { %v1568_v45 = vpop.f32.mrb[28].mxu1 }
 0x690   : > { %v1569_v13 = vadd.f32 %v1568_v45, %v1437_v42  ;;  %v4080_v48 = vpop.f32.mrb[29].mxu1 }
 0x691   : > { %v1451_v48 = vpop.permute.xlu1 %1450 }
 0x692   : > { %1624 = vperm.xlu1 %4741, %v1569_v13  }
 0x693   : > { %v1573_v49 = vpop.f32.mrb[30].mxu1 }
 0x694   : > { %v1574_v52 = vadd.f32 %v1573_v49, %v1439_v16  ;;  %v4083_v20 = vpop.f32.mrb[31].mxu1 }
 0x695   : > { %v1453_v20 = vpop.permute.xlu0 %1452 }
 0x696   : > { %1629 = vperm.xlu0 %4742, %v1574_v52  }
 0x697   : > { %v1578_v53 = vpop.f32.mrb[32].mxu1 }
 0x698   : > { %v1579_v55 = vadd.f32 %v1578_v53, %v1441_v24  ;;  %v4086_v57 = vpop.f32.mrb[33].mxu1 }
 0x699   : > { %v1455_v57 = vpop.permute.xlu1 %1454 }
 0x69a   : > { %1634 = vperm.xlu1 %4741, %v1579_v55  }
 0x69b   : > { %v1583_v32 = vpop.f32.mrb[34].mxu1 }
 0x69c   : > { %v1584_v61 = vadd.f32 %v1583_v32, %v1443_v29  ;;  %v4089_v62 = vpop.f32.mrb[35].mxu1 }
 0x69d   : > { %v1457_v62 = vpop.permute.xlu0 %1456 }
 0x69e   : > { %1639 = vperm.xlu1 %4741, %v1584_v61  }
 0x69f   : > { %v1588_v36 = vpop.f32.mrb[36].mxu1 }
 0x6a0   : > { %v1589_v39 = vadd.f32 %v1588_v36, %v1445_v63  ;;  %v4092_v43 = vpop.f32.mrb[37].mxu1 }
 0x6a1   : > { %v6142_v43 = vmov 2  }
 0x6a2   : > { %1644 = vperm.xlu0 %4742, %v1589_v39  }
 0x6a3   : > { %v1593_v50 = vpop.f32.mrb[38].mxu1 }
 0x6a4   : > { %v1594_v7 = vadd.f32 %v1593_v50, %v1447_v46  ;;  %v4095_v28 = vpop.f32.mrb[39].mxu1  ;;  %v709_v46 = vld [vmem:[%s5116_s23 + $0x10] sm:$0xff] }
 0x6a5   : > { %4133 = vmatprep.mubr.msk.f32.mxu0 %vm1105_vm15, %v709_v46 }
 0x6a6   : > { %1649 = vperm.xlu1 %4741, %v1594_v7  }
 0x6a7   : > { %v1598_v42 = vpop.f32.mrb[40].mxu1 }
 0x6a8   : > { %v1599_v45 = vadd.f32 %v1598_v42, %v1449_v2  ;;  %v4098_v13 = vpop.f32.mrb[41].mxu1 }
 0x6aa   : > { %1654 = vperm.xlu0 %4742, %v1599_v45  }
 0x6ab   : > { %v1603_v16 = vpop.f32.mrb[42].mxu1 }
 0x6ac   : > { %v1604_v49 = vadd.f32 %v1603_v16, %v1451_v48  ;;  %v4101_v52 = vpop.f32.mrb[43].mxu1 }
 0x6ae   : > { %1659 = vperm.xlu1 %4741, %v1604_v49  }
 0x6af   : > { %v1608_v24 = vpop.f32.mrb[44].mxu1 }
 0x6b0   : > { %v1609_v53 = vadd.f32 %v1608_v24, %v1453_v20  ;;  %v4104_v55 = vpop.f32.mrb[45].mxu1 }
 0x6b2   : > { %1664 = vperm.xlu0 %4742, %v1609_v53  }
 0x6b3   : > { %v1613_v29 = vpop.f32.mrb[46].mxu1 }
 0x6b4   : > { %v1614_v32 = vadd.f32 %v1613_v29, %v1455_v57  ;;  %v4107_v61 = vpop.f32.mrb[47].mxu1 }
 0x6b6   : > { %1669 = vperm.xlu1 %4741, %v1614_v32  }
 0x6b7   : > { %v1618_v63 = vpop.f32.mrb[48].mxu1 }
 0x6b8   : > { %v1619_v36 = vadd.f32 %v1618_v63, %v1457_v62  ;;  %v4110_v39 = vpop.f32.mrb[49].mxu1  ;;  %v5564_v63 = vld [vmem:[%s5116_s23 + $0x170] sm:$0xff] }
 0x6b9   : > { %vm1786_vm9 = vcmp.gt.f32.partialorder %v5564_v63, 0.0 }
 0x6ba   : > { %1674 = vperm.xlu0 %4742, %v1619_v36   ;;  %4743 = vset.pattern.permute.xlu1 %v6142_v43 }
 0x6bb   : > { %1770 = vperm.xlu1 %4743, %v5257_v8  }
 0x6be   : > { %4744 = vset.pattern.permute.xlu0 %v6142_v43 }
 0x6bf   : > { %1774 = vperm.xlu0 %4744, %v5261_v11   ;;  %4755 = vset.pattern.permute.xlu1 %v6146_v54 }
 0x6c3   : > { %4756 = vset.pattern.permute.xlu0 %v6146_v54 }
 0x711   : > { %v1625_v50 = vpop.permute.xlu1 %1624 }
 0x712   : > { %v1677_v28 = vmul.f32 %v1625_v50, %v5461_v3 }
 0x715   : > { %v1630_v7 = vpop.permute.xlu0 %1629 }
 0x716   : > { %v1678_v2 = vmul.f32 %v1630_v7, %v5469_v6 }
 0x718   : > { %v4492_v42 = vpack.c.bf16 %v1678_v2, %v1677_v28 }
 0x719   : > { %v1635_v45 = vpop.permute.xlu1 %1634 }
 0x71a   : > { %4493 = vmatprep.subr.bf16.mxu0 %v4492_v42  ;;  %v1679_v11 = vmul.f32 %v1635_v45, %v5476_v9 }
 0x71b   : > { %4495 = vmatpush3.bf16.msra.mxu0 %v4492_v42 }
 0x71d   : > { %v1640_v8 = vpop.permute.xlu1 %1639 }
 0x71e   : > { %v1680_v13 = vmul.f32 %v1640_v8, %v5483_v18 }
 0x720   : > { %v4496_v48 = vpack.c.bf16 %v1680_v13, %v1679_v11 }
 0x721   : > { %v1645_v16 = vpop.permute.xlu0 %1644 }
 0x722   : > { %4497 = vmatprep.subr.bf16.mxu0 %v4496_v48  ;;  %v1681_v52 = vmul.f32 %v1645_v16, %v5490_v19 }
 0x723   : > { %4499 = vmatpush3.bf16.msra.mxu0 %v4496_v48 }
 0x725   : > { %v1650_v49 = vpop.permute.xlu1 %1649 }
 0x726   : > { %v1682_v3 = vmul.f32 %v1650_v49, %v5497_v10 }
 0x728   : > { %v4500_v20 = vpack.c.bf16 %v1682_v3, %v1681_v52 }
 0x729   : > { %v1655_v6 = vpop.permute.xlu0 %1654 }
 0x72a   : > { %4501 = vmatprep.subr.bf16.mxu0 %v4500_v20  ;;  %v1683_v53 = vmul.f32 %v1655_v6, %v5504_v26  ;;  %v710_v26 = vld [vmem:[%s5116_s23 + $0x18] sm:$0xff] }
 0x72b   : > { %4503 = vmatpush3.bf16.msra.mxu0 %v4500_v20 }
 0x72d   : > { %v1660_v24 = vpop.permute.xlu1 %1659 }
 0x72e   : > { %v1684_v9 = vmul.f32 %v1660_v24, %v5511_v27 }
 0x730   : > { %v4504_v18 = vpack.c.bf16 %v1684_v9, %v1683_v53 }
 0x731   : > { %v1665_v55 = vpop.permute.xlu0 %1664 }
 0x732   : > { %4505 = vmatprep.subr.bf16.mxu0 %v4504_v18  ;;  %v1685_v19 = vmul.f32 %v1665_v55, %v5518_v31 }
 0x733   : > { %4507 = vmatpush3.bf16.msra.mxu0 %v4504_v18 }
 0x735   : > { %v1670_v57 = vpop.permute.xlu1 %1669 }
 0x736   : > { %v1686_v10 = vmul.f32 %v1670_v57, %v5525_v34  ;;  %v5567_v34 = vld [vmem:[%s5116_s23 + $0x168] sm:$0xff] }
 0x737   : > { %vm1785_vm11 = vcmp.gt.f32.partialorder %v5567_v34, 0.0 }
 0x738   : > { %v4508_v29 = vpack.c.bf16 %v1686_v10, %v1685_v19 }
 0x739   : > { %v1675_v32 = vpop.permute.xlu0 %1674 }
 0x73a   : > { %v1687_v61 = vmul.f32 %v1675_v32, %v5532_v35  ;;  %4509 = vmatprep.subr.bf16.mxu0 %v4508_v29  ;;  %v1771_v36 = vpop.permute.xlu1 %1770 }
 0x73b   : > { %4511 = vmatpush3.bf16.msra.mxu0 %v4508_v29 }
 0x73c   : > { %4131 = vmatprep.subr.mxu0 %v1687_v61 }
 0x73e   : > { %v1775_v27 = vpop.permute.xlu0 %1774 }
 0x73f   : > { %4132 = vmatpush3.msra.mxu0 %v1687_v61 }
 0x740   : > { %4134 = vmatmul.mubr.msk.f32.vlgmr.msra.gmra.mrb[60].mxu0 %vm1105_vm15, %v710_v26 }
 0x813   : > { %v4135_v62 = vpop.f32.mrb[60].mxu0 }
 0x814   : > { %v1778_v31 = vadd.f32 %v4135_v62, %v1775_v27  ;;  %v1760_v39 = vpop.f32.mrb[61].mxu0 }
 0x815   : > { %v1777_v46 = vadd.f32 %v1771_v36, %v1760_v39 }
 0x816   : > { %v1782_v50 = vmul.f32 0.2, %v1778_v31  ;;  %vm1780_vm8 = vcmp.ge.f32.partialorder %v1778_v31, 0.0 }
 0x817   : > { %v1781_v35 = vmul.f32 0.2, %v1777_v46  ;;  %vm1779_vm10 = vcmp.ge.f32.partialorder %v1777_v46, 0.0 }
 0x818   : > { %v1784_v7 = vsel %vm1780_vm8, %v1778_v31, %v1782_v50  ;;  %v5599_v31 = vld [vmem:[%s5116_s23 + $0x130] sm:$0xff]  ;;  %v5609_v50 = vld [vmem:[%s5116_s23 + $0x138] sm:$0xff] }
 0x819   : > { %v1788_v28 = vsel %vm1786_vm9, %v1784_v7, -1e+30  ;;  %v1783_v2 = vsel %vm1779_vm10, %v1777_v46, %v1781_v35 }
 0x81a   : > { %v1792_v42 = vsel %vm258_vm0, %v1788_v28, -inf  ;;  %v1787_v45 = vsel %vm1785_vm11, %v1783_v2, -1e+30 }
 0x81b   : > { %1793 = vmax.xlane.f32.xlu0 %v1792_v42  ;;  %v1789_v8 = vsel %vm258_vm0, %v1787_v45, -inf }
 0x81c   : > { %1790 = vmax.xlane.f32.xlu1 %v1789_v8 }
 0x8a8   : > { %v1794_v11 = vpop.xlane.xlu0 %1793 }
 0x8a9   : > { %v1796_v13 = vsub.f32 %v1788_v28, %v1794_v11  ;;  %v1791_v48 = vpop.xlane.xlu1 %1790  ;;  %v5629_v11 = vld [vmem:[%s5116_s23 + $0x100] sm:$0xff] }
 0x8aa   : > { %v1795_v16 = vsub.f32 %v1787_v45, %v1791_v48  ;;  %v5621_v45 = vld [vmem:[%s5116_s23 + $0x140] sm:$0xff] }
 0x8ab   : > { %v1799_v49 = vmul.f32 1.442695, %v1796_v13 }
 0x8ac   : > { %v1797_v52 = vmul.f32 1.442695, %v1795_v16  ;;  %v5640_v16 = vld [vmem:[%s5116_s23 + $0x148] sm:$0xff] }
 0x8ad   : > { %4791 = vpow2.f32 %v1799_v49 }
 0x8ae   : > { %4793 = vpow2.f32 %v1797_v52  ;;  %v5649_v52 = vld [vmem:[%s5116_s23 + $0x108] sm:$0xff] }
 0x8b7   : > { %v4792_v3 = vpop.eup %4791 }
 0x8b8   : > { %v4794_v20 = vpop.eup %4793  ;;  %v1802_v6 = vmul.f32 %v4792_v3, %v5564_v63 }
 0x8b9   : > { %v1801_v24 = vmul.f32 %v4794_v20, %v5567_v34  ;;  %v5658_v20 = vld [vmem:[%s5116_s23 + $0x150] sm:$0xff] }
 0x8ba   : > { %v1806_v53 = vsel %vm258_vm0, %v1802_v6, 0.0 }
 0x8bb   : > { %1807 = vadd.xlane.f32.xlu0 %v1806_v53  ;;  %v1803_v9 = vsel %vm258_vm0, %v1801_v24, 0.0  ;;  %v5669_v53 = vld [vmem:[%s5116_s23 + $0x110] sm:$0xff] }
 0x8bc   : > { %1804 = vadd.xlane.f32.xlu1 %v1803_v9 }
 0x8cd   : > { %4746 = vrot.lane.b32.xlu1 %v5380_v58, %s4963_s24 }
 0x8d1   : > { %4751 = vrot.lane.b32.xlu0 %v5386_v60, %s4970_s28  ;;  %1918 = vrot.lane.b32.xlu1 %v5268_v14, %s4971_s29 }
 0x8d5   : > { %1922 = vrot.lane.b32.xlu0 %v5288_v22, %s4971_s29  ;;  %1920 = vrot.lane.b32.xlu1 %v5277_v17, %s4971_s29 }
 0x8d9   : > { %1926 = vrot.lane.b32.xlu0 %v5308_v30, %s4971_s29  ;;  %1924 = vrot.lane.b32.xlu1 %v5297_v25, %s4971_s29 }
 0x8dd   : > { %1930 = vrot.lane.b32.xlu0 %v5328_v37, %s4971_s29  ;;  %1928 = vrot.lane.b32.xlu1 %v5317_v33, %s4971_s29 }
 0x8e1   : > { %1934 = vrot.lane.b32.xlu0 %v5348_v44, %s4971_s29  ;;  %1932 = vrot.lane.b32.xlu1 %v5337_v40, %s4971_s29 }
 0x8e5   : > { %1938 = vrot.lane.b32.xlu0 %v5368_v51, %s4971_s29  ;;  %1936 = vrot.lane.b32.xlu1 %v5357_v47, %s4971_s29 }
 0x948   : > { %v1808_v60 = vpop.xlane.xlu0 %1807 }
 0x949   : > { %vm1810_vm12 = vcmp.gt.f32.partialorder %v1808_v60, 0.0  ;;  %v1805_v18 = vpop.xlane.xlu1 %1804 }
 0x94a   : > { %v1812_v55 = vsel %vm1810_vm12, %v1808_v60, 1.0  ;;  %vm1809_vm13 = vcmp.gt.f32.partialorder %v1805_v18, 0.0 }
 0x94b   : > { %4795 = vrcp.f32 %v1812_v55  ;;  %v1811_v57 = vsel %vm1809_vm13, %v1805_v18, 1.0  ;;  %v5682_v18 = vld [vmem:[%s5116_s23 + $0x118] sm:$0xff] }
 0x94c   : > { %4797 = vrcp.f32 %v1811_v57  ;;  %v4752_v19 = vpop.permute.xlu0 %4751 }
 0x94d   : > { %v4754_v10 = vunpack.i.h.bf16 %v4752_v19  ;;  %v4753_v29 = vunpack.i.l.bf16 %v4752_v19  ;;  %v4747_v32 = vpop.permute.xlu1 %4746  ;;  %v5693_v19 = vld [vmem:[%s5116_s23 + $0x120] sm:$0xff] }
 0x94e   : > { %v4749_v61 = vunpack.i.h.bf16 %v4747_v32  ;;  %v4748_v26 = vunpack.i.l.bf16 %v4747_v32  ;;  %v754_v32 = vld [vmem:[%s5116_s23 + $0x40] sm:$0xff] }
 0x94f   : > { %v4517_v27 = vpack.c.bf16 %v4754_v10, %v4753_v29  ;;  %v5702_v29 = vld [vmem:[%s5116_s23 + $0x128] sm:$0xff] }
 0x950   : > { %v4512_v62 = vpack.c.bf16 %v4749_v61, %v4748_v26  ;;  %v5611_v7 = vpop.permute.xlu0 %1922  ;;  %v755_v61 = vld [vmem:[%s5116_s23 + $0x48] sm:$0xff]  ;;  %v5712_v26 = vld [vmem:[#allocation3 + $0x1b0] sm:$0x7] }
 0x951   : > { %4646 = vmatpush3.bf16.msra.mxu1 %v4517_v27  ;;  %v5596_v36 = vpop.permute.xlu1 %1918 }
 0x952   : > { %4513 = vmatprep.subr.bf16.mxu0 %v4512_v62 }
 0x953   : > { %4515 = vmatpush3.bf16.msra.mxu0 %v4512_v62 }
 0x954   : > { %4166 = vmatmul.mubr.msk.f32.vlgmr.msra.gmra.mrb[50].mxu1 %vm258_vm0, %v5599_v31  ;;  %4516 = vmatprep.subr.bf16.mxu0 %v6150_v1  ;;  %v5633_v13 = vpop.permute.xlu0 %1926 }
 0x955   : > { %v4796_v39 = vpop.eup %4795  ;;  %v5604_v46 = vpop.permute.xlu1 %1920  ;;  %4168 = vmatprep.mubr.msk.f32.mxu1 %vm4964_vm14, %v6148_v0 }
 0x956   : > { %v4798_v35 = vpop.eup %4797  ;;  %v1816_v2 = vmul.f32 %v4796_v39, %v1802_v6  ;;  %v4519_v8 = vpack.c.bf16 %v5604_v46, %v5596_v36 }
 0x957   : > { %v1814_v28 = vmul.f32 %v4798_v35, %v1801_v24 }
 0x958   : > { %4169 = vmatmul.mubr.msk.f32.gmra.mrb[52].mxu1 %vm258_vm0, %v5609_v50  ;;  %v5664_v24 = vpop.permute.xlu0 %1930 }
 0x959   : > { %4140 = vmatprep.mubr.msk.f32.mxu0 %vm258_vm0, %v1814_v28  ;;  %v5616_v42 = vpop.permute.xlu1 %1924  ;;  %4171 = vmatprep.mubr.msk.f32.mxu1 %vm4964_vm14, %v6148_v0  ;;  %v1820_v28 = vrot.slane %v5712_v26, %v5203_v21 }
 0x95a   : > { %4141 = vmatmul.mubr.msk.f32.vlgmr.msra.gmra.mrb[62].mxu0 %vm258_vm0, %v1816_v2  ;;  %v4523_v49 = vpack.c.bf16 %v5616_v42, %v5611_v7 }
 0x95b   : > { %4518 = vmatpush3.bf16.msra.mxu0 %v4517_v27  ;;  %4147 = vmatprep.mubr.msk.f32.mxu0 %vm4964_vm14, %v6148_v0  ;;  %v1335_v27 = vrot.slane %v5712_v26, %v5192_v5 }
 0x95c   : > { %4520 = vmatprep.subr.bf16.mxu0 %v4519_v8  ;;  %4172 = vmatmul.mubr.msk.f32.gmra.mrb[54].mxu1 %vm258_vm0, %v5621_v45  ;;  %v5684_v55 = vpop.permute.xlu0 %1934 }
 0x95d   : > { %v5635_v48 = vpop.permute.xlu1 %1928  ;;  %4174 = vmatprep.mubr.msk.f32.mxu1 %vm4964_vm14, %v6148_v0  ;;  %v1414_v39 = vadd.f32 %v5538_v38, %v1335_v27  ;;  %v1409_v2 = vadd.f32 %v5540_v41, %v1335_v27 }
 0x95e   : > { %4148 = vmatmul.mubr.msk.f32.vlgmr.msra.gmra.mrb[64].mxu0 %vm258_vm0, %v5629_v11  ;;  %v4527_v6 = vpack.c.bf16 %v5635_v48, %v5633_v13 }
 0x95f   : > { %4522 = vmatpush3.bf16.msra.mxu0 %v4519_v8  ;;  %4150 = vmatprep.mubr.msk.f32.mxu0 %vm4964_vm14, %v6148_v0 }
 0x960   : > { %4524 = vmatprep.subr.bf16.mxu0 %v4523_v49  ;;  %4175 = vmatmul.mubr.msk.f32.gmra.mrb[56].mxu1 %vm258_vm0, %v5640_v16  ;;  %v5697_v10 = vpop.permute.xlu0 %1938 }
 0x961   : > { %v5653_v3 = vpop.permute.xlu1 %1932  ;;  %4177 = vmatprep.mubr.msk.f32.mxu1 %vm4964_vm14, %v6148_v0 }
 0x962   : > { %4151 = vmatmul.mubr.msk.f32.gmra.mrb[66].mxu0 %vm258_vm0, %v5649_v52  ;;  %v4531_v9 = vpack.c.bf16 %v5653_v3, %v5664_v24 }
 0x963   : > { %4526 = vmatpush3.bf16.msra.mxu0 %v4523_v49  ;;  %4153 = vmatprep.mubr.msk.f32.mxu0 %vm4964_vm14, %v6148_v0  ;;  %v4648_v49 = vadd.f32 %v1820_v28, %v1414_v39 }
 0x964   : > { %4528 = vmatprep.subr.bf16.mxu0 %v4527_v6  ;;  %4178 = vmatmul.mubr.msk.f32.gmra.mrb[58].mxu1 %vm258_vm0, %v5658_v20 }
 0x965   : > { %v5677_v60 = vpop.permute.xlu1 %1936 }
 0x966   : > { %4154 = vmatmul.mubr.msk.f32.gmra.mrb[68].mxu0 %vm258_vm0, %v5669_v53  ;;  %v4535_v57 = vpack.c.bf16 %v5677_v60, %v5684_v55 }
 0x967   : > { %4530 = vmatpush3.bf16.msra.mxu0 %v4527_v6  ;;  %4156 = vmatprep.mubr.msk.f32.mxu0 %vm4964_vm14, %v6148_v0 }
 0x968   : > { %4532 = vmatprep.subr.bf16.mxu0 %v4531_v9 }
 0x96a   : > { %4157 = vmatmul.mubr.msk.f32.gmra.mrb[70].mxu0 %vm258_vm0, %v5682_v18 }
 0x96b   : > { %4534 = vmatpush3.bf16.msra.mxu0 %v4531_v9  ;;  %4159 = vmatprep.mubr.msk.f32.mxu0 %vm4964_vm14, %v6148_v0 }
 0x96c   : > { %4536 = vmatprep.subr.bf16.mxu0 %v4535_v57 }
 0x96e   : > { %4160 = vmatmul.mubr.msk.f32.gmra.mrb[72].mxu0 %vm258_vm0, %v5693_v19 }
 0x96f   : > { %4538 = vmatpush3.bf16.msra.mxu0 %v4535_v57  ;;  %4162 = vmatprep.mubr.msk.f32.mxu0 %vm4964_vm14, %v6148_v0  ;;  %v4651_v57 = vadd.f32 %v1820_v28, %v1409_v2 }
 0x970   : > { %4200 = vmatprep.subr.mxu0 %v5697_v10 }
 0x972   : > { %4163 = vmatmul.mubr.msk.f32.gmra.mrb[74].mxu0 %vm258_vm0, %v5702_v29 }
 0x973   : > { %4201 = vmatpush3.msra.mxu0 %v5697_v10  ;;  %4202 = vmatprep.mubr.msk.f32.mxu0 %vm1105_vm15, %v754_v32 }
 0x976   : > { %4203 = vmatmul.mubr.msk.f32.vlgmr.msra.gmra.mrb[76].mxu0 %vm1105_vm15, %v755_v61 }
 0xa27   : > { %v2080_v62 = vpop.f32.mrb[50].mxu1 }
 0xa28   : > { %v4167_v35 = vpop.f32.mrb[51].mxu1 }
 0xa2b   : > { %v2085_v8 = vpop.f32.mrb[52].mxu1 }
 0xa2c   : > { %v4170_v6 = vpop.f32.mrb[53].mxu1 }
 0xa2d   : > { %v4142_v9 = vpop.f32.mrb[62].mxu0 }
 0xa2e   : > { %v4649_v32 = vadd.f32 %v4648_v49, %v4142_v9  ;;  %v1901_v61 = vpop.f32.mrb[63].mxu0 }
 0xa2f   : > { %v4652_v43 = vadd.f32 %v4651_v57, %v1901_v61  ;;  %v2090_v12 = vpop.f32.mrb[54].mxu1 }
 0xa30   : > { %2494 = vst.msk [vmem:[#allocation2 + $0x8] sm:$0xff] %vm553_vm2, %v4649_v32  ;;  %v4173_v54 = vpop.f32.mrb[55].mxu1 }
 0xa31   : > { %2493 = vst.msk [vmem:[#allocation2] sm:$0xff] %vm553_vm2, %v4652_v43  ;;  %v2050_v38 = vpop.f32.mrb[64].mxu0 }
 0xa32   : > { %v2051_v35 = vadd.f32 %v2050_v38, %v5596_v36  ;;  %v4149_v0 = vpop.f32.mrb[65].mxu0  ;;  %v2081_v38 = vadd.f32 %v2080_v62, %v5664_v24  ;;  %v711_v24 = vld [vmem:[%s5116_s23 + $0x20] sm:$0xff] }
 0xa33   : > { %v2095_v1 = vpop.f32.mrb[56].mxu1  ;;  %4227 = vmatprep.mubr.msk.f32.mxu1 %vm1105_vm15, %v711_v24 }
 0xa34   : > { %2106 = vperm.xlu1 %4755, %v2051_v35   ;;  %v4176_v41 = vpop.f32.mrb[57].mxu1 }
 0xa35   : > { %v2055_v27 = vpop.f32.mrb[66].mxu0 }
 0xa36   : > { %v2056_v39 = vadd.f32 %v2055_v27, %v5604_v46  ;;  %v4152_v28 = vpop.f32.mrb[67].mxu0  ;;  %v2086_v27 = vadd.f32 %v2085_v8, %v5653_v3 }
 0xa37   : > { %v2100_v2 = vpop.f32.mrb[58].mxu1 }
 0xa38   : > { %2111 = vperm.xlu0 %4756, %v2056_v39   ;;  %v4179_v49 = vpop.f32.mrb[59].mxu1  ;;  %v2101_v28 = vadd.f32 %v2100_v2, %v5697_v10 }
 0xa39   : > { %v2060_v6 = vpop.f32.mrb[68].mxu0 }
 0xa3a   : > { %v2061_v9 = vadd.f32 %v2060_v6, %v5611_v7  ;;  %v4155_v54 = vpop.f32.mrb[69].mxu0 }
 0xa3c   : > { %2116 = vperm.xlu1 %4755, %v2061_v9  }
 0xa3d   : > { %v2065_v43 = vpop.f32.mrb[70].mxu0 }
 0xa3e   : > { %v2066_v57 = vadd.f32 %v2065_v43, %v5616_v42  ;;  %v4158_v36 = vpop.f32.mrb[71].mxu0  ;;  %v2091_v42 = vadd.f32 %v2090_v12, %v5684_v55 }
 0xa40   : > { %2121 = vperm.xlu1 %4755, %v2066_v57  }
 0xa41   : > { %v2070_v0 = vpop.f32.mrb[72].mxu0 }
 0xa42   : > { %v2071_v32 = vadd.f32 %v2070_v0, %v5633_v13  ;;  %v4161_v61 = vpop.f32.mrb[73].mxu0  ;;  %v2096_v13 = vadd.f32 %v2095_v1, %v5677_v60 }
 0xa44   : > { %2126 = vperm.xlu0 %4756, %v2071_v32  }
 0xa45   : > { %v2075_v46 = vpop.f32.mrb[74].mxu0 }
 0xa46   : > { %v2076_v35 = vadd.f32 %v2075_v46, %v5635_v48  ;;  %v4164_v41 = vpop.f32.mrb[75].mxu0  ;;  %v4973_v48 = vmov 4  }
 0xa48   : > { %2136 = vperm.xlu0 %4756, %v2081_v38   ;;  %2131 = vperm.xlu1 %4755, %v2076_v35  }
 0xa49   : > { %v4204_v7 = vpop.f32.mrb[76].mxu0 }
 0xa4a   : > { %v2242_v39 = vpop.f32.mrb[77].mxu0 }
 0xa4c   : > { %2146 = vperm.xlu0 %4756, %v2091_v42   ;;  %2141 = vperm.xlu1 %4755, %v2086_v27   ;;  %v6161_v27 = vmov 0.0  }
 0xa50   : > { %2156 = vperm.xlu0 %4756, %v2101_v28   ;;  %2151 = vperm.xlu1 %4755, %v2096_v13  }
 0xa54   : > { %2255 = vrot.lane.b32.xlu0 %v4204_v7, %s4972_s30  ;;  %2253 = vrot.lane.b32.xlu1 %v2242_v39, %s4972_s30  ;;  %v712_v7 = vld [vmem:[%s5116_s23 + $0x28] sm:$0xff] }
 0xa55   : > { %4757 = vset.pattern.permute.xlu0 %v4973_v48  ;;  %4758 = vset.pattern.permute.xlu1 %v4973_v48  ;;  %v759_v39 = vld [vmem:[#allocation3 + $0x240] sm:$0xff]  ;;  %v758_v48 = vld [vmem:[#allocation3 + $0x230] sm:$0xff] }
 0xab3   : > { %v2107_v3 = vpop.permute.xlu1 %2106 }
 0xab4   : > { %v2159_v55 = vmul.f32 %v2107_v3, %v5629_v11 }
 0xab7   : > { %v2112_v12 = vpop.permute.xlu0 %2111 }
 0xab8   : > { %v2160_v62 = vmul.f32 %v2112_v12, %v5649_v52 }
 0xaba   : > { %v4539_v1 = vpack.c.bf16 %v2160_v62, %v2159_v55 }
 0xabb   : > { %v2117_v60 = vpop.permute.xlu1 %2116 }
 0xabc   : > { %4540 = vmatprep.subr.bf16.mxu1 %v4539_v1  ;;  %v2161_v8 = vmul.f32 %v2117_v60, %v5669_v53  ;;  %v751_v60 = vld [vmem:[%s5116_s23 + $0x180] sm:$0xff] }
 0xabd   : > { %4542 = vmatpush3.bf16.msra.mxu1 %v4539_v1  ;;  %vm2371_vm4 = vcmp.gt.f32.partialorder %v751_v60, 0.0 }
 0xabf   : > { %v2122_v10 = vpop.permute.xlu1 %2121 }
 0xac0   : > { %v2162_v2 = vmul.f32 %v2122_v10, %v5682_v18 }
 0xac2   : > { %v4543_v49 = vpack.c.bf16 %v2162_v2, %v2161_v8  ;;  %v750_v8 = vld [vmem:[%s5116_s23 + $0x178] sm:$0xff] }
 0xac3   : > { %v2127_v6 = vpop.permute.xlu0 %2126  ;;  %vm2370_vm7 = vcmp.gt.f32.partialorder %v750_v8, 0.0 }
 0xac4   : > { %4544 = vmatprep.subr.bf16.mxu1 %v4543_v49  ;;  %v2163_v43 = vmul.f32 %v2127_v6, %v5693_v19 }
 0xac5   : > { %4546 = vmatpush3.bf16.msra.mxu1 %v4543_v49 }
 0xac7   : > { %v2137_v9 = vpop.permute.xlu0 %2136  ;;  %v2132_v54 = vpop.permute.xlu1 %2131 }
 0xac8   : > { %v2164_v11 = vmul.f32 %v2132_v54, %v5702_v29  ;;  %v2165_v0 = vmul.f32 %v2137_v9, %v5599_v31 }
 0xaca   : > { %v4547_v52 = vpack.c.bf16 %v2164_v11, %v2163_v43 }
 0xacb   : > { %v2147_v57 = vpop.permute.xlu0 %2146  ;;  %v2142_v36 = vpop.permute.xlu1 %2141 }
 0xacc   : > { %v2166_v32 = vmul.f32 %v2142_v36, %v5609_v50  ;;  %4548 = vmatprep.subr.bf16.mxu1 %v4547_v52  ;;  %v2167_v46 = vmul.f32 %v2147_v57, %v5621_v45  ;;  %v6160_v45 = vmov 0.0|0.0  }
 0xacd   : > { %4550 = vmatpush3.bf16.msra.mxu1 %v4547_v52 }
 0xace   : > { %v4551_v53 = vpack.c.bf16 %v2166_v32, %v2165_v0 }
 0xacf   : > { %v2157_v18 = vpop.permute.xlu0 %2156  ;;  %v2152_v61 = vpop.permute.xlu1 %2151 }
 0xad0   : > { %v2168_v38 = vmul.f32 %v2152_v61, %v5640_v16  ;;  %4552 = vmatprep.subr.bf16.mxu1 %v4551_v53  ;;  %v2169_v41 = vmul.f32 %v2157_v18, %v5658_v20  ;;  %v4974_v16 = vmov 5   ;;  %v6162_v20 = vmov 0  }
 0xad1   : > { %4554 = vmatpush3.bf16.msra.mxu1 %v4551_v53 }
 0xad2   : > { %v4555_v19 = vpack.c.bf16 %v2168_v38, %v2167_v46 }
 0xad3   : > { %v2256_v29 = vpop.permute.xlu0 %2255  ;;  %v2254_v35 = vpop.permute.xlu1 %2253 }
 0xad4   : > { %v2260_v31 = vadd.f32 %v2256_v29, %v5382_v59  ;;  %v2259_v50 = vadd.f32 %v2254_v35, %v5378_v56  ;;  %4556 = vmatprep.subr.bf16.mxu1 %v4555_v19 }
 0xad5   : > { %4558 = vmatpush3.bf16.msra.mxu1 %v4555_v19 }
 0xad6   : > { %4225 = vmatprep.subr.mxu1 %v2169_v41  ;;  %2268 = vperm.xlu0 %4757, %v2260_v31  }
 0xad7   : > { %2263 = vperm.xlu1 %4758, %v2259_v50  }
 0xad9   : > { %4226 = vmatpush3.msra.mxu1 %v2169_v41 }
 0xada   : > { %4228 = vmatmul.mubr.msk.f32.vlgmr.msra.gmra.mrb[60].mxu1 %vm1105_vm15, %v712_v7  ;;  %4571 = vmatprep.subr.bf16.mxu1 %v6160_v45  ;;  %v2502_v7 = vld [vmem:[#allocation3 + $0x1c8] sm:$0xff] }
 0xadb   : > { %4759 = vset.pattern.permute.xlu1 %v4974_v16  ;;  %4241 = vmatprep.mubr.msk.f32.mxu1 %vm4964_vm14, %v6161_v27  ;;  %v2504_v16 = vld [vmem:[#allocation3 + $0x1d8] sm:$0xff] }
 0xadc   : > { %2355 = vperm.xlu1 %4759, %v5378_v56   ;;  %4765 = vset.pattern.permute.xlu0 %v6162_v20 }
 0xae0   : > { %2359 = vperm.xlu1 %4759, %v5382_v59  }
 0xae4   : > { %4766 = vset.pattern.permute.xlu1 %v6162_v20 }
 0xb55   : > { %v2269_v13 = vpop.permute.xlu0 %2268 }
 0xb56   : > { %v2264_v42 = vpop.permute.xlu1 %2263  ;;  %v2272_v24 = vmul.f32 %v2269_v13, %v759_v39 }
 0xb57   : > { %v2271_v3 = vmul.f32 %v2264_v42, %v758_v48  ;;  %v4563_v42 = vpack.c.bf16 %v2504_v16, %v2502_v7 }
 0xb5b   : > { %v2356_v28 = vpop.permute.xlu1 %2355 }
 0xb5f   : > { %v2360_v1 = vpop.permute.xlu1 %2359 }
 0xbad   : > { %v4229_v12 = vpop.f32.mrb[60].mxu1 }
 0xbae   : > { %v2351_v55 = vadd.f32 %v4229_v12, %v2272_v24  ;;  %v2345_v62 = vpop.f32.mrb[61].mxu1 }
 0xbaf   : > { %v2346_v56 = vadd.f32 %v2345_v62, %v2271_v3  ;;  %v2503_v62 = vld [vmem:[#allocation3 + $0x1d0] sm:$0xff] }
 0xbb0   : > { %v2363_v10 = vadd.f32 %v2360_v1, %v2351_v55  ;;  %v2501_v55 = vld [vmem:[#allocation3 + $0x1c0] sm:$0xff] }
 0xbb1   : > { %v2362_v2 = vadd.f32 %v2356_v28, %v2346_v56  ;;  %v2506_v56 = vld [vmem:[#allocation3 + $0x1e8] sm:$0xff] }
 0xbb2   : > { %vm2365_vm1 = vcmp.ge.f32.partialorder %v2363_v10, 0.0  ;;  %v2367_v59 = vmul.f32 0.2, %v2363_v10 }
 0xbb3   : > { %vm2364_vm6 = vcmp.ge.f32.partialorder %v2362_v2, 0.0  ;;  %v2366_v49 = vmul.f32 0.2, %v2362_v2 }
 0xbb4   : > { %v2369_v6 = vsel %vm2365_vm1, %v2363_v10, %v2367_v59 }
 0xbb5   : > { %v2373_v9 = vsel %vm2371_vm4, %v2369_v6, -1e+30  ;;  %v2368_v54 = vsel %vm2364_vm6, %v2362_v2, %v2366_v49  ;;  %v2505_v49 = vld [vmem:[#allocation3 + $0x1e0] sm:$0xff]  ;;  %v2507_v6 = vld [vmem:[#allocation3 + $0x1f0] sm:$0xff] }
 0xbb6   : > { %v2377_v43 = vsel %vm258_vm0, %v2373_v9, -inf  ;;  %v2372_v11 = vsel %vm2370_vm7, %v2368_v54, -1e+30 }
 0xbb7   : > { %2378 = vmax.xlane.f32.xlu1 %v2377_v43  ;;  %v2374_v52 = vsel %vm258_vm0, %v2372_v11, -inf  ;;  %v4569_v43 = vpack.c.bf16 %v2507_v6, %v2505_v49  ;;  %v5889_v49 = vld [vmem:[%s5116_s23 + $0x80] sm:$0xff]  ;;  %v5896_v6 = vld [vmem:[%s5116_s23 + $0x88] sm:$0xff] }
 0xbb8   : > { %2375 = vmax.xlane.f32.xlu0 %v2374_v52 }
 0xbc8   : > { %4761 = vrot.lane.b32.xlu1 %v5380_v58, %s4975_s4 }
 0xbcc   : > { %2613 = vrot.lane.b32.xlu1 %v5277_v17, %s4968_s27 }
 0xbd0   : > { %2615 = vrot.lane.b32.xlu1 %v5288_v22, %s4968_s27 }
 0xbd4   : > { %2619 = vrot.lane.b32.xlu1 %v5308_v30, %s4968_s27 }
 0xbd8   : > { %2623 = vrot.lane.b32.xlu1 %v5328_v37, %s4968_s27 }
 0xbdc   : > { %2627 = vrot.lane.b32.xlu1 %v5348_v44, %s4968_s27 }
 0xbe0   : > { %2631 = vrot.lane.b32.xlu1 %v5368_v51, %s4968_s27 }
 0xc44   : > { %v2379_v57 = vpop.xlane.xlu1 %2378 }
 0xc45   : > { %v2381_v58 = vsub.f32 %v2373_v9, %v2379_v57  ;;  %v2376_v36 = vpop.xlane.xlu0 %2375 }
 0xc46   : > { %v2380_v0 = vsub.f32 %v2372_v11, %v2376_v36 }
 0xc47   : > { %v2384_v32 = vmul.f32 1.442695, %v2381_v58  ;;  %v2497_v58 = vld [vmem:[#allocation2] sm:$0xff] }
 0xc48   : > { %v2382_v53 = vmul.f32 1.442695, %v2380_v0  ;;  %v4762_v18 = vpop.permute.xlu1 %4761 }
 0xc49   : > { %4799 = vpow2.f32 %v2384_v32  ;;  %v4764_v61 = vunpack.i.h.bf16 %v4762_v18  ;;  %v4763_v46 = vunpack.i.l.bf16 %v4762_v18  ;;  %v2498_v32 = vld [vmem:[#allocation2 + $0x8] sm:$0xff] }
 0xc4a   : > { %4801 = vpow2.f32 %v2382_v53 }
 0xc4b   : > { %v4559_v38 = vpack.c.bf16 %v4764_v61, %v4763_v46 }
 0xc4c   : > { %v5788_v1 = vpop.permute.xlu1 %2613 }
 0xc4d   : > { %4560 = vmatprep.subr.bf16.mxu0 %v4559_v38 }
 0xc4e   : > { %4562 = vmatpush3.bf16.msra.mxu0 %v4559_v38 }
 0xc4f   : > { %4564 = vmatprep.subr.bf16.mxu0 %v4563_v42 }
 0xc50   : > { %v5794_v54 = vpop.permute.xlu1 %2615 }
 0xc53   : > { %v4800_v19 = vpop.eup %4799 }
 0xc54   : > { %v4802_v29 = vpop.eup %4801  ;;  %v2387_v31 = vmul.f32 %v4800_v19, %v751_v60  ;;  %v2508_v60 = vld [vmem:[#allocation3 + $0x1f8] sm:$0xff]  ;;  %v5801_v57 = vpop.permute.xlu1 %2619 }
 0xc55   : > { %v2386_v35 = vmul.f32 %v4802_v29, %v750_v8  ;;  %v4565_v8 = vpack.c.bf16 %v2503_v62, %v2501_v55  ;;  %v4567_v59 = vpack.c.bf16 %v2508_v60, %v2506_v56  ;;  %v5843_v55 = vld [vmem:[%s5116_s23 + $0x50] sm:$0xff]  ;;  %v4825_v62 = vld [vmem:[%s5116_s23 + $0x38] sm:$0xff]  ;;  %v4826_v56 = vld [vmem:[%s5116_s23] sm:$0xff] }
 0xc56   : > { %v2391_v50 = vsel %vm258_vm0, %v2387_v31, 0.0  ;;  %v5854_v60 = vld [vmem:[%s5116_s23 + $0x58] sm:$0xff] }
 0xc57   : > { %v2388_v41 = vsel %vm258_vm0, %v2386_v35, 0.0 }
 0xc58   : > { %2389 = vadd.xlane.f32.xlu0 %v2388_v41  ;;  %v5812_v18 = vpop.permute.xlu1 %2623 }
 0xc5c   : > { %2392 = vadd.xlane.f32.xlu0 %v2391_v50  ;;  %v5819_v38 = vpop.permute.xlu1 %2627 }
 0xc60   : > { %v5823_v29 = vpop.permute.xlu1 %2631 }
 0xc72   : > { %2611 = vrot.lane.b32.xlu0 %v5268_v14, %s4968_s27 }
 0xc76   : > { %2617 = vrot.lane.b32.xlu0 %v5297_v25, %s4968_s27 }
 0xc7a   : > { %2621 = vrot.lane.b32.xlu0 %v5317_v33, %s4968_s27 }
 0xc7e   : > { %2625 = vrot.lane.b32.xlu0 %v5337_v40, %s4968_s27 }
 0xc82   : > { %2629 = vrot.lane.b32.xlu0 %v5357_v47, %s4968_s27 }
 0xce5   : > { %v2390_v39 = vpop.xlane.xlu0 %2389 }
 0xce6   : > { %vm2394_vm8 = vcmp.gt.f32.partialorder %v2390_v39, 0.0 }
 0xce7   : > { %v2396_v13 = vsel %vm2394_vm8, %v2390_v39, 1.0 }
 0xce8   : > { %4803 = vrcp.f32 %v2396_v13 }
 0xce9   : > { %v2393_v28 = vpop.xlane.xlu0 %2392 }
 0xcea   : > { %vm2395_vm10 = vcmp.gt.f32.partialorder %v2393_v28, 0.0 }
 0xceb   : > { %v2397_v48 = vsel %vm2395_vm10, %v2393_v28, 1.0 }
 0xcec   : > { %4805 = vrcp.f32 %v2397_v48 }
 0xced   : > { %v5786_v3 = vpop.permute.xlu0 %2611 }
 0xcee   : > { %v4574_v11 = vpack.c.bf16 %v5788_v1, %v5786_v3 }
 0xcf1   : > { %v5791_v9 = vpop.permute.xlu0 %2617 }
 0xcf2   : > { %v4804_v24 = vpop.eup %4803  ;;  %v4578_v36 = vpack.c.bf16 %v5791_v9, %v5794_v54 }
 0xcf3   : > { %v2399_v12 = vmul.f32 %v4804_v24, %v2386_v35  ;;  %v2404_v35 = vsub.s32 2, %v5189_v4 }
 0xcf5   : > { %4234 = vmatprep.mubr.msk.f32.mxu0 %vm258_vm0, %v2399_v12  ;;  %v5799_v52 = vpop.permute.xlu0 %2621  ;;  %v2405_v41 = vrot.slane %v5712_v26, %v2404_v35  ;;  %v4823_v12 = vld [vmem:[%s5116_s23 + $0x30] sm:$0xff] }
 0xcf6   : > { %v4806_v10 = vpop.eup %4805  ;;  %v4582_v53 = vpack.c.bf16 %v5799_v52, %v5801_v57 }
 0xcf7   : > { %v2401_v2 = vmul.f32 %v4806_v10, %v2387_v31  ;;  %v5861_v10 = vld [vmem:[%s5116_s23 + $0x60] sm:$0xff] }
 0xcf9   : > { %4235 = vmatmul.mubr.msk.f32.vlgmr.msra.gmra.mrb[78].mxu0 %vm258_vm0, %v2401_v2  ;;  %v5807_v0 = vpop.permute.xlu0 %2625  ;;  %v5875_v2 = vld [vmem:[%s5116_s23 + $0x70] sm:$0xff] }
 0xcfa   : > { %4566 = vmatpush1.bf16.msra.mxu0 %v4565_v8  ;;  %2585 = vmatprep.mubr.f32.mxu0 %v6161_v27  ;;  %v4586_v61 = vpack.c.bf16 %v5807_v0, %v5812_v18  ;;  %v5868_v8 = vld [vmem:[%s5116_s23 + $0x68] sm:$0xff] }
 0xcfb   : > { %4568 = vmatprep.subr.bf16.mxu0 %v4567_v59  ;;  %v5882_v59 = vld [vmem:[%s5116_s23 + $0x78] sm:$0xff] }
 0xcfd   : > { %v5817_v46 = vpop.permute.xlu0 %2629 }
 0xcfe   : > { %4570 = vmatpush1.bf16.msra.mxu0 %v4569_v43  ;;  %v4590_v19 = vpack.c.bf16 %v5817_v46, %v5819_v38  ;;  %v5903_v43 = vld [vmem:[%s5116_s23 + $0x90] sm:$0xff] }
 0xcff   : > { %4575 = vmatprep.subr.bf16.mxu0 %v4574_v11 }
 0xd01   : > { %3752 = vmatmul.mubr.msk.f32.vlgmr.msra.gmra.mrb[80].mxu0 %vm553_vm2, %v2497_v58  ;;  %v5917_v58 = vld [vmem:[%s5116_s23 + $0xa0] sm:$0xff] }
 0xd02   : > { %4577 = vmatpush3.bf16.msra.mxu0 %v4574_v11  ;;  %2591 = vmatprep.mubr.f32.mxu0 %v6161_v27  ;;  %v5910_v11 = vld [vmem:[%s5116_s23 + $0x98] sm:$0xff] }
 0xd03   : > { %4579 = vmatprep.subr.bf16.mxu0 %v4578_v36 }
 0xd05   : > { %3753 = vmatmul.mubr.msk.f32.gmra.mrb[82].mxu0 %vm553_vm2, %v2498_v32 }
 0xd06   : > { %4581 = vmatpush3.bf16.msra.mxu0 %v4578_v36  ;;  %2597 = vmatprep.mubr.f32.mxu0 %v6161_v27 }
 0xd07   : > { %4583 = vmatprep.subr.bf16.mxu0 %v4582_v53 }
 0xd0a   : > { %4585 = vmatpush3.bf16.msra.mxu0 %v4582_v53 }
 0xd0b   : > { %4587 = vmatprep.subr.bf16.mxu0 %v4586_v61 }
 0xd0e   : > { %4589 = vmatpush3.bf16.msra.mxu0 %v4586_v61 }
 0xd0f   : > { %4591 = vmatprep.subr.bf16.mxu0 %v4590_v19 }
 0xd12   : > { %4593 = vmatpush3.bf16.msra.mxu0 %v4590_v19 }
 0xd13   : > { %4294 = vmatprep.subr.mxu0 %v5823_v29 }
 0xd16   : > { %4295 = vmatpush3.msra.mxu0 %v5823_v29 }
 0xdcc   : > { %v4236_v31 = vpop.f32.mrb[78].mxu0 }
 0xdcd   : > { %v2490_v50 = vadd.f32 %v4236_v31, %v2405_v41  ;;  %v2484_v7 = vpop.f32.mrb[79].mxu0 }
 0xdce   : > { %v2485_v16 = vadd.f32 %v2484_v7, %v2405_v41 }
 0xdcf   : > { %2496 = vst.msk [vmem:[#allocation2 + $0x18] sm:$0xff] %vm553_vm2, %v2490_v50 }
 0xdd0   : > { %2495 = vst.msk [vmem:[#allocation2 + $0x10] sm:$0xff] %vm553_vm2, %v2485_v16 }
 0xdd4   : > { %v2587_v42 = vpop.f32.mrb[80].mxu0 }
 0xdd5   : > { %v5831_v39 = vpop.f32.mrb[81].mxu0 }
 0xdd6   : > { %v2500_v24 = vld [vmem:[#allocation2 + $0x18] sm:$0xff] }
 0xdd7   : > { %v2499_v13 = vld [vmem:[#allocation2 + $0x10] sm:$0xff] }
 0xdd8   : > { %v2593_v28 = vpop.f32.mrb[82].mxu0  ;;  %3754 = vmatmul.mubr.msk.f32.gmra.mrb[84].mxu0 %vm553_vm2, %v2499_v13 }
 0xdd9   : > { %v4614_v4 = vpack.c.bf16 %v2593_v28, %v2587_v42  ;;  %v5834_v26 = vpop.f32.mrb[83].mxu0  ;;  %2603 = vmatprep.mubr.f32.mxu0 %v6161_v27 }
 0xdda   : > { %v4572_v48 = vpack.c.bf16 %v5834_v26, %v5831_v39 }
 0xddc   : > { %4573 = vmatpush3.bf16.msra.mxu1 %v4572_v48  ;;  %3755 = vmatmul.mubr.msk.f32.gmra.mrb[86].mxu0 %vm553_vm2, %v2500_v24 }
 0xddd   : > { %4615 = vmatprep.subr.bf16.mxu1 %v4614_v4  ;;  %4296 = vmatprep.mubr.msk.f32.mxu0 %vm1105_vm15, %v4823_v12 }
 0xddf   : > { %4242 = vmatmul.mubr.msk.f32.vlgmr.msra.gmra.mrb[62].mxu1 %vm258_vm0, %v5843_v55 }
 0xde0   : > { %4617 = vmatpush3.bf16.msra.mxu1 %v4614_v4  ;;  %4297 = vmatmul.mubr.msk.f32.vlgmr.msra.gmra.mrb[88].mxu0 %vm1105_vm15, %v4825_v62 }
 0xde1   : > { %4244 = vmatprep.mubr.msk.f32.mxu1 %vm4964_vm14, %v6161_v27  ;;  %4321 = vmatprep.mubr.msk.f32.mxu0 %vm1105_vm15, %v4826_v56 }
 0xde3   : > { %4245 = vmatmul.mubr.msk.f32.gmra.mrb[64].mxu1 %vm258_vm0, %v5854_v60 }
 0xde4   : > { %4247 = vmatprep.mubr.msk.f32.mxu1 %vm4964_vm14, %v6161_v27 }
 0xde7   : > { %4248 = vmatmul.mubr.msk.f32.gmra.mrb[66].mxu1 %vm258_vm0, %v5861_v10 }
 0xde8   : > { %4250 = vmatprep.mubr.msk.f32.mxu1 %vm4964_vm14, %v6161_v27 }
 0xdeb   : > { %4251 = vmatmul.mubr.msk.f32.gmra.mrb[68].mxu1 %vm258_vm0, %v5868_v8 }
 0xdec   : > { %4253 = vmatprep.mubr.msk.f32.mxu1 %vm4964_vm14, %v6161_v27 }
 0xdef   : > { %4254 = vmatmul.mubr.msk.f32.gmra.mrb[70].mxu1 %vm258_vm0, %v5875_v2 }
 0xdf0   : > { %4256 = vmatprep.mubr.msk.f32.mxu1 %vm4964_vm14, %v6161_v27 }
 0xdf3   : > { %4257 = vmatmul.mubr.msk.f32.gmra.mrb[72].mxu1 %vm258_vm0, %v5882_v59 }
 0xdf4   : > { %4259 = vmatprep.mubr.msk.f32.mxu1 %vm4964_vm14, %v6161_v27 }
 0xdf7   : > { %4260 = vmatmul.mubr.msk.f32.gmra.mrb[74].mxu1 %vm258_vm0, %v5889_v49 }
 0xdf8   : > { %4262 = vmatprep.mubr.msk.f32.mxu1 %vm4964_vm14, %v6161_v27 }
 0xdfb   : > { %4263 = vmatmul.mubr.msk.f32.gmra.mrb[76].mxu1 %vm258_vm0, %v5896_v6 }
 0xdfc   : > { %4265 = vmatprep.mubr.msk.f32.mxu1 %vm4964_vm14, %v6161_v27 }
 0xdff   : > { %4266 = vmatmul.mubr.msk.f32.gmra.mrb[78].mxu1 %vm258_vm0, %v5903_v43 }
 0xe00   : > { %4268 = vmatprep.mubr.msk.f32.mxu1 %vm4964_vm14, %v6161_v27 }
 0xe03   : > { %4269 = vmatmul.mubr.msk.f32.gmra.mrb[80].mxu1 %vm258_vm0, %v5910_v11 }
 0xe04   : > { %4271 = vmatprep.mubr.msk.f32.mxu1 %vm4964_vm14, %v6161_v27 }
 0xe07   : > { %4272 = vmatmul.mubr.msk.f32.gmra.mrb[82].mxu1 %vm258_vm0, %v5917_v58 }
 0xeab   : > { %v5921_v36 = vpop.f32.mrb[84].mxu0 }
 0xeac   : > { %v2601_v32 = vpop.f32.mrb[85].mxu0 }
 0xeaf   : > { %v5923_v53 = vpop.f32.mrb[86].mxu0 }
 0xeb0   : > { %v4778_v61 = vpack.i.bf16 %v5923_v53, %v5921_v36  ;;  %v2607_v19 = vpop.f32.mrb[87].mxu0  ;;  %v2610_v53 = vld [vmem:[#allocation3 + $0x200] sm:$0x7] }
 0xeb1   : > { %v4767_v35 = vpack.i.bf16 %v2607_v19, %v2601_v32 }
 0xeb2   : > { %v2710_v41 = vpop.f32.mrb[62].mxu1 }
 0xeb3   : > { %v2711_v31 = vadd.f32 %v2710_v41, %v5786_v3  ;;  %v4298_v50 = vpop.f32.mrb[88].mxu0  ;;  %v4243_v7 = vpop.f32.mrb[63].mxu1 }
 0xeb4   : > { %v2906_v16 = vadd.f32 %v4298_v50, %v5834_v26  ;;  %v2896_v42 = vpop.f32.mrb[89].mxu0 }
 0xeb5   : > { %2766 = vperm.xlu0 %4765, %v2711_v31   ;;  %v2905_v13 = vadd.f32 %v2896_v42, %v5831_v39 }
 0xeb6   : > { %v2715_v28 = vpop.f32.mrb[64].mxu1 }
 0xeb7   : > { %v2716_v4 = vadd.f32 %v2715_v28, %v5788_v1  ;;  %v4246_v48 = vpop.f32.mrb[65].mxu1 }
 0xeb9   : > { %2771 = vperm.xlu1 %4766, %v2716_v4  }
 0xeba   : > { %v2720_v24 = vpop.f32.mrb[66].mxu1 }
 0xebb   : > { %v2721_v12 = vadd.f32 %v2720_v24, %v5794_v54  ;;  %v4249_v62 = vpop.f32.mrb[67].mxu1 }
 0xebd   : > { %2776 = vperm.xlu1 %4766, %v2721_v12  }
 0xebe   : > { %v2725_v56 = vpop.f32.mrb[68].mxu1 }
 0xebf   : > { %v2726_v3 = vadd.f32 %v2725_v56, %v5791_v9  ;;  %v4252_v32 = vpop.f32.mrb[69].mxu1 }
 0xec1   : > { %2781 = vperm.xlu0 %4765, %v2726_v3  }
 0xec2   : > { %v2730_v19 = vpop.f32.mrb[70].mxu1 }
 0xec3   : > { %v2731_v41 = vadd.f32 %v2730_v19, %v5801_v57  ;;  %v4255_v31 = vpop.f32.mrb[71].mxu1 }
 0xec5   : > { %2786 = vperm.xlu1 %4766, %v2731_v41  }
 0xec6   : > { %v2735_v50 = vpop.f32.mrb[72].mxu1 }
 0xec7   : > { %v2736_v1 = vadd.f32 %v2735_v50, %v5799_v52  ;;  %v4258_v7 = vpop.f32.mrb[73].mxu1 }
 0xec9   : > { %2791 = vperm.xlu0 %4765, %v2736_v1  }
 0xeca   : > { %v2740_v42 = vpop.f32.mrb[74].mxu1 }
 0xecb   : > { %v2741_v54 = vadd.f32 %v2740_v42, %v5812_v18  ;;  %v4261_v28 = vpop.f32.mrb[75].mxu1 }
 0xecd   : > { %2796 = vperm.xlu1 %4766, %v2741_v54  }
 0xece   : > { %v2745_v4 = vpop.f32.mrb[76].mxu1 }
 0xecf   : > { %v2746_v9 = vadd.f32 %v2745_v4, %v5807_v0  ;;  %v4264_v48 = vpop.f32.mrb[77].mxu1  ;;  %v6163_v0 = vmov 1  }
 0xed1   : > { %2801 = vperm.xlu0 %4765, %v2746_v9  }
 0xed2   : > { %v2750_v24 = vpop.f32.mrb[78].mxu1 }
 0xed3   : > { %v2751_v57 = vadd.f32 %v2750_v24, %v5819_v38  ;;  %v4267_v12 = vpop.f32.mrb[79].mxu1 }
 0xed4   : > { %v5998_v12 = vld [vmem:[%s5116_s23 + $0xc8] sm:$0xff] }
 0xed5   : > { %2806 = vperm.xlu1 %4766, %v2751_v57   ;;  %v4837_v57 = vld [vmem:[%s5116_s23 + $0x8] sm:$0xff] }
 0xed6   : > { %v2755_v62 = vpop.f32.mrb[80].mxu1 }
 0xed7   : > { %v2756_v52 = vadd.f32 %v2755_v62, %v5817_v46  ;;  %v4270_v56 = vpop.f32.mrb[81].mxu1  ;;  %v6005_v62 = vld [vmem:[%s5116_s23 + $0xd0] sm:$0xff] }
 0xed8   : > { %v6019_v56 = vld [vmem:[%s5116_s23 + $0xe0] sm:$0xff] }
 0xed9   : > { %2811 = vperm.xlu0 %4765, %v2756_v52   ;;  %v6012_v52 = vld [vmem:[%s5116_s23 + $0xd8] sm:$0xff] }
 0xeda   : > { %v2760_v3 = vpop.f32.mrb[82].mxu1 }
 0xedb   : > { %v2761_v18 = vadd.f32 %v2760_v3, %v5823_v29  ;;  %v4273_v32 = vpop.f32.mrb[83].mxu1  ;;  %v6026_v3 = vld [vmem:[%s5116_s23 + $0xe8] sm:$0xff] }
 0xedc   : > { %v6040_v32 = vld [vmem:[%s5116_s23 + $0xf8] sm:$0xff] }
 0xedd   : > { %2816 = vperm.xlu1 %4766, %v2761_v18   ;;  %4768 = vrot.lane.b32.xlu0 %v4767_v35, %s4968_s27  ;;  %v6033_v18 = vld [vmem:[%s5116_s23 + $0xf0] sm:$0xff] }
 0xee1   : > { %2914 = vperm.xlu0 %4765, %v2906_v16   ;;  %2909 = vperm.xlu1 %4766, %v2905_v13  }
 0xee5   : > { %4773 = vset.pattern.permute.xlu0 %v6163_v0  ;;  %4772 = vset.pattern.permute.xlu1 %v6163_v0 }
 0xee6   : > { %3001 = vperm.xlu0 %4773, %v5834_v26   ;;  %2996 = vperm.xlu1 %4772, %v5831_v39  }
 0xeea   : > { %3135 = vrot.lane.b32.xlu1 %v5268_v14, %s4970_s28  ;;  %4774 = vset.pattern.permute.xlu0 %v6162_v20 }
 0xeeb   : > { %4775 = vset.pattern.permute.xlu1 %v6162_v20 }
 0xeee   : > { %3139 = vrot.lane.b32.xlu1 %v5288_v22, %s4970_s28 }
 0xef2   : > { %3141 = vrot.lane.b32.xlu1 %v5297_v25, %s4970_s28 }
 0xf34   : > { %v2767_v46 = vpop.permute.xlu0 %2766 }
 0xf35   : > { %v2819_v29 = vmul.f32 %v5843_v55, %v2767_v46 }
 0xf38   : > { %v2772_v38 = vpop.permute.xlu1 %2771 }
 0xf39   : > { %v2820_v35 = vmul.f32 %v5854_v60, %v2772_v38  ;;  %v4849_v38 = vld [vmem:[#allocation3 + $0x220] sm:$0xff] }
 0xf3b   : > { %v4594_v16 = vpack.c.bf16 %v2820_v35, %v2819_v29  ;;  %v4850_v35 = vld [vmem:[#allocation3 + $0x210] sm:$0xff] }
 0xf3c   : > { %v2777_v13 = vpop.permute.xlu1 %2776 }
 0xf3d   : > { %4595 = vmatprep.subr.bf16.mxu0 %v4594_v16  ;;  %v2821_v19 = vmul.f32 %v5861_v10, %v2777_v13 }
 0xf3e   : > { %4597 = vmatpush3.bf16.msra.mxu0 %v4594_v16 }
 0xf40   : > { %v2782_v14 = vpop.permute.xlu0 %2781 }
 0xf41   : > { %v2822_v20 = vmul.f32 %v5868_v8, %v2782_v14 }
 0xf43   : > { %v4598_v41 = vpack.c.bf16 %v2822_v20, %v2821_v19 }
 0xf44   : > { %v2787_v22 = vpop.permute.xlu1 %2786 }
 0xf45   : > { %4599 = vmatprep.subr.bf16.mxu0 %v4598_v41  ;;  %v2823_v31 = vmul.f32 %v5875_v2, %v2787_v22 }
 0xf46   : > { %4601 = vmatpush3.bf16.msra.mxu0 %v4598_v41 }
 0xf48   : > { %v2792_v25 = vpop.permute.xlu0 %2791 }
 0xf49   : > { %v2824_v55 = vmul.f32 %v5882_v59, %v2792_v25 }
 0xf4b   : > { %v4602_v50 = vpack.c.bf16 %v2824_v55, %v2823_v31 }
 0xf4c   : > { %v2797_v60 = vpop.permute.xlu1 %2796 }
 0xf4d   : > { %4603 = vmatprep.subr.bf16.mxu0 %v4602_v50  ;;  %v2825_v7 = vmul.f32 %v5889_v49, %v2797_v60 }
 0xf4e   : > { %4605 = vmatpush3.bf16.msra.mxu0 %v4602_v50 }
 0xf50   : > { %v2802_v1 = vpop.permute.xlu0 %2801 }
 0xf51   : > { %v2826_v10 = vmul.f32 %v5896_v6, %v2802_v1 }
 0xf53   : > { %v4606_v42 = vpack.c.bf16 %v2826_v10, %v2825_v7 }
 0xf54   : > { %v2807_v8 = vpop.permute.xlu1 %2806 }
 0xf55   : > { %4607 = vmatprep.subr.bf16.mxu0 %v4606_v42  ;;  %v2827_v28 = vmul.f32 %v5903_v43, %v2807_v8  ;;  %v5970_v43 = vld [vmem:[%s5116_s23 + $0xa8] sm:$0xff] }
 0xf56   : > { %4609 = vmatpush3.bf16.msra.mxu0 %v4606_v42 }
 0xf58   : > { %v2812_v54 = vpop.permute.xlu0 %2811 }
 0xf59   : > { %v2828_v2 = vmul.f32 %v5910_v11, %v2812_v54  ;;  %v5977_v11 = vld [vmem:[%s5116_s23 + $0xb0] sm:$0xff] }
 0xf5b   : > { %v4610_v59 = vpack.c.bf16 %v2828_v2, %v2827_v28 }
 0xf5c   : > { %v2817_v4 = vpop.permute.xlu1 %2816  ;;  %v4769_v9 = vpop.permute.xlu0 %4768 }
 0xf5d   : > { %v2829_v48 = vmul.f32 %v5917_v58, %v2817_v4  ;;  %4611 = vmatprep.subr.bf16.mxu0 %v4610_v59  ;;  %v4771_v49 = vunpack.i.h.bf16 %v4769_v9  ;;  %v4770_v6 = vunpack.i.l.bf16 %v4769_v9  ;;  %v5991_v58 = vld [vmem:[%s5116_s23 + $0xc0] sm:$0xff] }
 0xf5e   : > { %4613 = vmatpush3.bf16.msra.mxu0 %v4610_v59 }
 0xf5f   : > { %4319 = vmatprep.subr.mxu0 %v2829_v48  ;;  %v4619_v24 = vpack.c.bf16 %v4771_v49, %v4770_v6 }
 0xf60   : > { %v2915_v0 = vpop.permute.xlu0 %2914  ;;  %v2910_v46 = vpop.permute.xlu1 %2909 }
 0xf61   : > { %v2918_v29 = vmul.f32 %v4849_v38, %v2915_v0  ;;  %v2917_v16 = vmul.f32 %v4850_v35, %v2910_v46 }
 0xf62   : > { %4320 = vmatpush3.msra.mxu0 %v2829_v48 }
 0xf63   : > { %4322 = vmatmul.mubr.msk.f32.vlgmr.msra.gmra.mrb[90].mxu0 %vm1105_vm15, %v4837_v57  ;;  %4618 = vmatprep.subr.bf16.mxu0 %v6160_v45  ;;  %v5984_v45 = vld [vmem:[%s5116_s23 + $0xb8] sm:$0xff] }
 0xf64   : > { %4620 = vmatpush3.bf16.msra.mxu0 %v4619_v24  ;;  %4335 = vmatprep.mubr.msk.f32.mxu0 %vm4964_vm14, %v6161_v27 }
 0xf65   : > { %v3002_v20 = vpop.permute.xlu0 %3001  ;;  %v2997_v22 = vpop.permute.xlu1 %2996 }
 0xf67   : > { %4336 = vmatmul.mubr.msk.f32.vlgmr.msra.gmra.mrb[92].mxu0 %vm258_vm0, %v5970_v43 }
 0xf68   : > { %4338 = vmatprep.mubr.msk.f32.mxu0 %vm4964_vm14, %v6161_v27 }
 0xf6b   : > { %4339 = vmatmul.mubr.msk.f32.gmra.mrb[94].mxu0 %vm258_vm0, %v5977_v11 }
 0xf6c   : > { %4341 = vmatprep.mubr.msk.f32.mxu0 %vm4964_vm14, %v6161_v27 }
 0xf6f   : > { %4342 = vmatmul.mubr.msk.f32.gmra.mrb[96].mxu0 %vm258_vm0, %v5984_v45 }
 0xf70   : > { %4344 = vmatprep.mubr.msk.f32.mxu0 %vm4964_vm14, %v6161_v27 }
 0xf73   : > { %4345 = vmatmul.mubr.msk.f32.gmra.mrb[98].mxu0 %vm258_vm0, %v5991_v58 }
 0xf74   : > { %4347 = vmatprep.mubr.msk.f32.mxu0 %vm4964_vm14, %v6161_v27 }
 0xf77   : > { %4348 = vmatmul.mubr.msk.f32.gmra.mrb[100].mxu0 %vm258_vm0, %v5998_v12 }
 0xf78   : > { %4350 = vmatprep.mubr.msk.f32.mxu0 %vm4964_vm14, %v6161_v27 }
 0xf7b   : > { %4351 = vmatmul.mubr.msk.f32.gmra.mrb[102].mxu0 %vm258_vm0, %v6005_v62 }
 0xf7c   : > { %4353 = vmatprep.mubr.msk.f32.mxu0 %vm4964_vm14, %v6161_v27 }
 0xf7f   : > { %4354 = vmatmul.mubr.msk.f32.gmra.mrb[104].mxu0 %vm258_vm0, %v6012_v52 }
 0xf80   : > { %4356 = vmatprep.mubr.msk.f32.mxu0 %vm4964_vm14, %v6161_v27 }
 0xf83   : > { %4357 = vmatmul.mubr.msk.f32.gmra.mrb[106].mxu0 %vm258_vm0, %v6019_v56 }
 0xf84   : > { %4359 = vmatprep.mubr.msk.f32.mxu0 %vm4964_vm14, %v6161_v27 }
 0xf87   : > { %4360 = vmatmul.mubr.msk.f32.gmra.mrb[108].mxu0 %vm258_vm0, %v6026_v3 }
 0xf88   : > { %4362 = vmatprep.mubr.msk.f32.mxu0 %vm4964_vm14, %v6161_v27 }
 0xf8b   : > { %4363 = vmatmul.mubr.msk.f32.gmra.mrb[110].mxu0 %vm258_vm0, %v6033_v18 }
 0xf8c   : > { %4365 = vmatprep.mubr.msk.f32.mxu0 %vm4964_vm14, %v6161_v27 }
 0xf8f   : > { %4366 = vmatmul.mubr.msk.f32.gmra.mrb[112].mxu0 %vm258_vm0, %v6040_v32 }
0x1036   : > { %v4323_v13 = vpop.f32.mrb[90].mxu0 }
0x1037   : > { %v2991_v14 = vadd.f32 %v4323_v13, %v2918_v29  ;;  %v2985_v19 = vpop.f32.mrb[91].mxu0 }
0x1038   : > { %v2986_v41 = vadd.f32 %v2985_v19, %v2917_v16  ;;  %v3136_v16 = vpop.permute.xlu1 %3135 }
0x1039   : > { %v3005_v25 = vadd.f32 %v3002_v20, %v2991_v14 }
0x103a   : > { %v3004_v31 = vadd.f32 %v2997_v22, %v2986_v41  ;;  %v6044_v27 = vpop.f32.mrb[92].mxu0 }
0x103b   : > { %v3009_v55 = vmul.f32 0.2, %v3005_v25  ;;  %v4337_v50 = vpop.f32.mrb[93].mxu0  ;;  %vm3007_vm14 = vcmp.ge.f32.partialorder %v3005_v25, 0.0 }
0x103c   : > { %v3008_v60 = vmul.f32 0.2, %v3004_v31  ;;  %vm3006_vm12 = vcmp.ge.f32.partialorder %v3004_v31, 0.0 }
0x103d   : > { %v3011_v1 = vsel %vm3007_vm14, %v3005_v25, %v3009_v55  ;;  %v4851_v55 = vld [vmem:[%s5116_s23 + $0x160] sm:$0xff] }
0x103e   : > { %v3013_v7 = vsel %vm1301_vm3, %v3011_v1, -1e+30  ;;  %v3239_v10 = vpop.f32.mrb[94].mxu0  ;;  %v3010_v42 = vsel %vm3006_vm12, %v3004_v31, %v3008_v60 }
0x103f   : > { %v3017_v8 = vsel %vm258_vm0, %v3013_v7, -inf  ;;  %v4340_v54 = vpop.f32.mrb[95].mxu0  ;;  %v6051_v28 = vsel %vm1300_vm5, %v3010_v42, -1e+30 }
0x1040   : > { %3018 = vmax.xlane.f32.xlu0 %v3017_v8  ;;  %v3014_v2 = vsel %vm258_vm0, %v6051_v28, -inf }
0x1041   : > { %3015 = vmax.xlane.f32.xlu1 %v3014_v2  ;;  %v3235_v2 = vadd.f32 %v6044_v27, %v3136_v16 }
0x1042   : > { %v3244_v59 = vpop.f32.mrb[96].mxu0 }
0x1043   : > { %v4343_v4 = vpop.f32.mrb[97].mxu0 }
0x1046   : > { %v3249_v9 = vpop.f32.mrb[98].mxu0 }
0x1047   : > { %v4346_v48 = vpop.f32.mrb[99].mxu0 }
0x104a   : > { %v3254_v15 = vpop.f32.mrb[100].mxu0 }
0x104b   : > { %v4349_v49 = vpop.f32.mrb[101].mxu0 }
0x104e   : > { %v3259_v6 = vpop.f32.mrb[102].mxu0 }
0x104f   : > { %v4352_v24 = vpop.f32.mrb[103].mxu0 }
0x1052   : > { %3145 = vrot.lane.b32.xlu1 %v5317_v33, %s4970_s28  ;;  %v3264_v57 = vpop.f32.mrb[104].mxu0 }
0x1053   : > { %v4355_v23 = vpop.f32.mrb[105].mxu0 }
0x1056   : > { %3137 = vrot.lane.b32.xlu0 %v5277_v17, %s4970_s28  ;;  %3149 = vrot.lane.b32.xlu1 %v5337_v40, %s4970_s28  ;;  %v3269_v0 = vpop.f32.mrb[106].mxu0 }
0x1057   : > { %v4358_v46 = vpop.f32.mrb[107].mxu0 }
0x105a   : > { %3143 = vrot.lane.b32.xlu0 %v5308_v30, %s4970_s28  ;;  %3153 = vrot.lane.b32.xlu1 %v5357_v47, %s4970_s28  ;;  %v3274_v38 = vpop.f32.mrb[108].mxu0  ;;  %v3140_v47 = vpop.permute.xlu1 %3139 }
0x105b   : > { %v4361_v33 = vpop.f32.mrb[109].mxu0  ;;  %v3245_v41 = vadd.f32 %v3244_v59, %v3140_v47 }
0x105e   : > { %3147 = vrot.lane.b32.xlu0 %v5328_v37, %s4970_s28  ;;  %v3279_v29 = vpop.f32.mrb[110].mxu0  ;;  %v3142_v37 = vpop.permute.xlu1 %3141 }
0x105f   : > { %v4364_v35 = vpop.f32.mrb[111].mxu0 }
0x1062   : > { %3151 = vrot.lane.b32.xlu0 %v5348_v44, %s4970_s28  ;;  %v3284_v17 = vpop.f32.mrb[112].mxu0  ;;  %v3250_v44 = vadd.f32 %v3249_v9, %v3142_v37 }
0x1063   : > { %v4367_v40 = vpop.f32.mrb[113].mxu0 }
0x1066   : > { %3155 = vrot.lane.b32.xlu0 %v5368_v51, %s4970_s28 }
0x10cd   : > { %v3019_v30 = vpop.xlane.xlu0 %3018 }
0x10ce   : > { %v3021_v13 = vsub.f32 %v3013_v7, %v3019_v30  ;;  %v3016_v22 = vpop.xlane.xlu1 %3015 }
0x10cf   : > { %v3020_v4 = vsub.f32 %v6051_v28, %v3016_v22 }
0x10d0   : > { %v3024_v14 = vmul.f32 1.442695, %v3021_v13 }
0x10d1   : > { %v3138_v19 = vpop.permute.xlu0 %3137  ;;  %v3022_v48 = vmul.f32 1.442695, %v3020_v4 }
0x10d2   : > { %4807 = vpow2.f32 %v3024_v14  ;;  %v3240_v20 = vadd.f32 %v3239_v10, %v3138_v19  ;;  %v3146_v60 = vpop.permute.xlu1 %3145 }
0x10d3   : > { %v3260_v7 = vadd.f32 %v3259_v6, %v3146_v60  ;;  %4809 = vpow2.f32 %v3022_v48  ;;  %v4852_v6 = vld [vmem:[%s5116_s23 + $0x158] sm:$0xff] }
0x10d4   : > { %3295 = vperm.xlu1 %4775, %v3240_v20  }
0x10d5   : > { %v3144_v25 = vpop.permute.xlu0 %3143 }
0x10d6   : > { %v3255_v50 = vadd.f32 %v3254_v15, %v3144_v25  ;;  %v3150_v8 = vpop.permute.xlu1 %3149  ;;  %v6164_v15 = vmov 2  }
0x10d7   : > { %v3270_v54 = vadd.f32 %v3269_v0, %v3150_v8 }
0x10d8   : > { %3300 = vperm.xlu1 %4775, %v3245_v41  }
0x10d9   : > { %v3148_v42 = vpop.permute.xlu0 %3147 }
0x10da   : > { %v3265_v10 = vadd.f32 %v3264_v57, %v3148_v42  ;;  %v3154_v59 = vpop.permute.xlu1 %3153 }
0x10db   : > { %v3280_v9 = vadd.f32 %v3279_v29, %v3154_v59 }
0x10dc   : > { %v4808_v31 = vpop.eup %4807  ;;  %3305 = vperm.xlu1 %4775, %v3250_v44  }
0x10dd   : > { %v3027_v51 = vmul.f32 %v4851_v55, %v4808_v31  ;;  %v4810_v49 = vpop.eup %4809  ;;  %v3152_v23 = vpop.permute.xlu0 %3151  ;;  %v4853_v31 = vld [vmem:[%s5116_s23 + $0x10] sm:$0xff] }
0x10de   : > { %v3026_v24 = vmul.f32 %v4852_v6, %v4810_v49  ;;  %v3275_v27 = vadd.f32 %v3274_v38, %v3152_v23 }
0x10df   : > { %v3031_v1 = vsel %vm258_vm0, %v3027_v51, 0.0 }
0x10e0   : > { %3032 = vadd.xlane.f32.xlu0 %v3031_v1  ;;  %3310 = vperm.xlu1 %4775, %v3255_v50   ;;  %v3028_v57 = vsel %vm258_vm0, %v3026_v24, 0.0 }
0x10e1   : > { %v3156_v0 = vpop.permute.xlu0 %3155 }
0x10e2   : > { %v3285_v28 = vadd.f32 %v3284_v17, %v3156_v0 }
0x10e4   : > { %3315 = vperm.xlu1 %4775, %v3260_v7  }
0x10e8   : > { %3320 = vperm.xlu1 %4775, %v3265_v10  }
0x10ec   : > { %3325 = vperm.xlu1 %4775, %v3270_v54  }
0x10f6   : > { %3290 = vperm.xlu0 %4774, %v3235_v2  }
0x10fa   : > { %3335 = vperm.xlu0 %4774, %v3280_v9  }
0x10fe   : > { %4776 = vset.pattern.permute.xlu0 %v6164_v15 }
0x10ff   : > { %3430 = vperm.xlu0 %4776, %v5831_v39  }
0x1110   : > { %3029 = vadd.xlane.f32.xlu1 %v3028_v57 }
0x1121   : > { %3330 = vperm.xlu1 %4775, %v3275_v27  }
0x1125   : > { %3340 = vperm.xlu1 %4775, %v3285_v28  }
0x1129   : > { %4777 = vset.pattern.permute.xlu1 %v6164_v15 }
0x112a   : > { %3434 = vperm.xlu1 %4777, %v5834_v26  }
0x1153   : > { %v3296_v33 = vpop.permute.xlu1 %3295 }
0x1154   : > { %v3344_v39 = vmul.f32 %v5977_v11, %v3296_v33  ;;  %v4855_v33 = vld [vmem:[%s5116_s23 + $0x170] sm:$0xff] }
0x1157   : > { %v3301_v16 = vpop.permute.xlu1 %3300 }
0x1158   : > { %v3345_v41 = vmul.f32 %v5984_v45, %v3301_v16 }
0x115b   : > { %v3306_v30 = vpop.permute.xlu1 %3305 }
0x115f   : > { %v3311_v38 = vpop.permute.xlu1 %3310 }
0x1160   : > { %v3347_v55 = vmul.f32 %v5998_v12, %v3311_v38 }
0x1163   : > { %v3316_v13 = vpop.permute.xlu1 %3315 }
0x1164   : > { %v3348_v25 = vmul.f32 %v6005_v62, %v3316_v13 }
0x1166   : > { %v4629_v50 = vpack.c.bf16 %v3348_v25, %v3347_v55 }
0x1167   : > { %v3321_v47 = vpop.permute.xlu1 %3320 }
0x1168   : > { %v3349_v45 = vmul.f32 %v6012_v52, %v3321_v47  ;;  %v4854_v52 = vld [vmem:[%s5116_s23 + $0x18] sm:$0xff] }
0x116b   : > { %v3326_v17 = vpop.permute.xlu1 %3325 }
0x116d   : > { %v3033_v46 = vpop.xlane.xlu0 %3032 }
0x116e   : > { %vm3035_vm3 = vcmp.gt.f32.partialorder %v3033_v46, 0.0 }
0x116f   : > { %v3037_v14 = vsel %vm3035_vm3, %v3033_v46, 1.0 }
0x1170   : > { %4811 = vrcp.f32 %v3037_v14 }
0x1175   : > { %v3291_v29 = vpop.permute.xlu0 %3290 }
0x1176   : > { %v3343_v35 = vmul.f32 %v5970_v43, %v3291_v29  ;;  %v3346_v43 = vmul.f32 %v5991_v58, %v3306_v30  ;;  %v3350_v58 = vmul.f32 %v6019_v56, %v3326_v17 }
0x1178   : > { %v4621_v40 = vpack.c.bf16 %v3344_v39, %v3343_v35  ;;  %v4625_v44 = vpack.c.bf16 %v3346_v43, %v3345_v41  ;;  %v4633_v62 = vpack.c.bf16 %v3350_v58, %v3349_v45  ;;  %v4856_v39 = vld [vmem:[%s5116_s23 + $0x168] sm:$0xff]  ;;  %v3478_v43 = vrot.slane %v2610_v53, %v5203_v21 }
0x117a   : > { %4622 = vmatprep.subr.bf16.mxu1 %v4621_v40  ;;  %v4812_v20 = vpop.eup %4811 }
0x117b   : > { %v3041_v22 = vmul.f32 %v4812_v20, %v3027_v51  ;;  %v3336_v51 = vpop.permute.xlu0 %3335 }
0x117c   : > { %v3352_v7 = vmul.f32 %v6033_v18, %v3336_v51 }
0x117f   : > { %v3431_v54 = vpop.permute.xlu0 %3430 }
0x119d   : > { %v3030_v19 = vpop.xlane.xlu1 %3029 }
0x119e   : > { %vm3034_vm5 = vcmp.gt.f32.partialorder %v3030_v19, 0.0 }
0x119f   : > { %v3036_v26 = vsel %vm3034_vm5, %v3030_v19, 1.0 }
0x11a0   : > { %4813 = vrcp.f32 %v3036_v26 }
0x11a1   : > { %v3331_v60 = vpop.permute.xlu1 %3330 }
0x11a2   : > { %v3351_v1 = vmul.f32 %v6026_v3, %v3331_v60 }
0x11a4   : > { %v4637_v42 = vpack.c.bf16 %v3352_v7, %v3351_v1 }
0x11a5   : > { %v3341_v12 = vpop.permute.xlu1 %3340 }
0x11a6   : > { %v3353_v56 = vmul.f32 %v6040_v32, %v3341_v12 }
0x11a9   : > { %v3435_v10 = vpop.permute.xlu1 %3434 }
0x11aa   : > { %v4814_v11 = vpop.eup %4813 }
0x11ab   : > { %v3039_v37 = vmul.f32 %v4814_v11, %v3026_v24 }
0x11ad   : > { %4328 = vmatprep.mubr.msk.f32.mxu1 %vm258_vm0, %v3039_v37 }
0x11ae   : > { %4329 = vmatmul.mubr.msk.f32.vlgmr.msra.gmra.mrb[84].mxu1 %vm258_vm0, %v3041_v22 }
0x11af   : > { %4624 = vmatpush3.bf16.msra.mxu1 %v4621_v40  ;;  %4390 = vmatprep.mubr.msk.f32.mxu1 %vm1105_vm15, %v4853_v31 }
0x11b0   : > { %4626 = vmatprep.subr.bf16.mxu1 %v4625_v44 }
0x11b3   : > { %4628 = vmatpush3.bf16.msra.mxu1 %v4625_v44 }
0x11b4   : > { %4630 = vmatprep.subr.bf16.mxu1 %v4629_v50 }
0x11b7   : > { %4632 = vmatpush3.bf16.msra.mxu1 %v4629_v50 }
0x11b8   : > { %4634 = vmatprep.subr.bf16.mxu1 %v4633_v62 }
0x11bb   : > { %4636 = vmatpush3.bf16.msra.mxu1 %v4633_v62 }
0x11bc   : > { %4638 = vmatprep.subr.bf16.mxu1 %v4637_v42 }
0x11bf   : > { %4640 = vmatpush3.bf16.msra.mxu1 %v4637_v42 }
0x11c0   : > { %4388 = vmatprep.subr.mxu1 %v3353_v56 }
0x11c3   : > { %4389 = vmatpush3.msra.mxu1 %v3353_v56 }
0x11c4   : > { %4391 = vmatmul.mubr.msk.f32.vlgmr.msra.gmra.mrb[86].mxu1 %vm1105_vm15, %v4854_v52 }
0x1297   : > { %v4392_v8 = vpop.f32.mrb[86].mxu1 }
0x1298   : > { %v3438_v3 = vadd.f32 %v4392_v8, %v3435_v10  ;;  %v3420_v2 = vpop.f32.mrb[87].mxu1 }
0x1299   : > { %v3437_v59 = vadd.f32 %v3431_v54, %v3420_v2 }
0x129a   : > { %vm3440_vm13 = vcmp.ge.f32.partialorder %v3438_v3, 0.0  ;;  %v3442_v18 = vmul.f32 0.2, %v3438_v3 }
0x129b   : > { %vm3439_vm1 = vcmp.ge.f32.partialorder %v3437_v59, 0.0  ;;  %v3441_v4 = vmul.f32 0.2, %v3437_v59 }
0x129c   : > { %v3444_v9 = vsel %vm3440_vm13, %v3438_v3, %v3442_v18 }
0x129d   : > { %v3446_v32 = vsel %vm1786_vm9, %v3444_v9, -1e+30  ;;  %v3443_v48 = vsel %vm3439_vm1, %v3437_v59, %v3441_v4 }
0x129e   : > { %v3450_v15 = vsel %vm258_vm0, %v3446_v32, -inf  ;;  %v3445_v49 = vsel %vm1785_vm11, %v3443_v48, -1e+30 }
0x129f   : > { %3451 = vmax.xlane.f32.xlu0 %v3450_v15  ;;  %v3447_v6 = vsel %vm258_vm0, %v3445_v49, -inf }
0x12a0   : > { %3448 = vmax.xlane.f32.xlu1 %v3447_v6 }
0x132c   : > { %v3452_v24 = vpop.xlane.xlu0 %3451 }
0x132d   : > { %v3454_v57 = vsub.f32 %v3446_v32, %v3452_v24  ;;  %v3449_v23 = vpop.xlane.xlu1 %3448 }
0x132e   : > { %v3453_v27 = vsub.f32 %v3445_v49, %v3449_v23 }
0x132f   : > { %v3457_v0 = vmul.f32 1.442695, %v3454_v57 }
0x1330   : > { %v3455_v28 = vmul.f32 1.442695, %v3453_v27 }
0x1331   : > { %4815 = vpow2.f32 %v3457_v0 }
0x1332   : > { %4817 = vpow2.f32 %v3455_v28 }
0x133b   : > { %v4816_v63 = vpop.eup %4815 }
0x133c   : > { %v4818_v46 = vpop.eup %4817  ;;  %v3460_v29 = vmul.f32 %v4855_v33, %v4816_v63 }
0x133d   : > { %v3459_v34 = vmul.f32 %v4856_v39, %v4818_v46 }
0x133e   : > { %v3464_v35 = vsel %vm258_vm0, %v3460_v29, 0.0 }
0x133f   : > { %3465 = vadd.xlane.f32.xlu1 %v3464_v35  ;;  %v3461_v40 = vsel %vm258_vm0, %v3459_v34, 0.0 }
0x1340   : > { %3462 = vadd.xlane.f32.xlu0 %v3461_v40 }
0x1356   : > { %4779 = vrot.lane.b32.xlu0 %v4778_v61, %s4963_s24  ;;  %v3045_v61 = vrot.slane %v2610_v53, %v5192_v5 }
0x1358   : > { %v4655_v37 = vadd.f32 %v3478_v43, %v3045_v61 }
0x13cc   : > { %v3466_v16 = vpop.xlane.xlu1 %3465 }
0x13cd   : > { %vm3468_vm15 = vcmp.gt.f32.partialorder %v3466_v16, 0.0  ;;  %v3463_v30 = vpop.xlane.xlu0 %3462 }
0x13ce   : > { %v3470_v38 = vsel %vm3468_vm15, %v3466_v16, 1.0  ;;  %vm3467_vm9 = vcmp.gt.f32.partialorder %v3463_v30, 0.0 }
0x13cf   : > { %4819 = vrcp.f32 %v3470_v38  ;;  %v3469_v13 = vsel %vm3467_vm9, %v3463_v30, 1.0 }
0x13d0   : > { %4821 = vrcp.f32 %v3469_v13 }
0x13d1   : > { %v4780_v47 = vpop.permute.xlu0 %4779 }
0x13d2   : > { %v4782_v17 = vunpack.i.h.bf16 %v4780_v47  ;;  %v4781_v14 = vunpack.i.l.bf16 %v4780_v47 }
0x13d4   : > { %v4641_v19 = vpack.c.bf16 %v4782_v17, %v4781_v14 }
0x13d6   : > { %4642 = vmatprep.subr.bf16.mxu1 %v4641_v19 }
0x13d7   : > { %4644 = vmatpush3.bf16.msra.mxu1 %v4641_v19 }
0x13d9   : > { %v4820_v26 = vpop.eup %4819 }
0x13da   : > { %v4822_v20 = vpop.eup %4821  ;;  %v3474_v36 = vmul.f32 %v4820_v26, %v3460_v29 }
0x13db   : > { %v3472_v11 = vmul.f32 %v4822_v20, %v3459_v34 }
0x13dd   : > { %4397 = vmatprep.mubr.msk.f32.mxu1 %vm258_vm0, %v3472_v11 }
0x13de   : > { %4398 = vmatmul.mubr.msk.f32.vlgmr.msra.gmra.mrb[84].mxu1 %vm258_vm0, %v3474_v36 }
0x14b1   : > { %v4399_v41 = vpop.f32.mrb[84].mxu1 }
0x14b2   : > { %v4654_v22 = vadd.f32 %v4655_v37, %v4399_v41  ;;  %v3559_v44 = vpop.f32.mrb[85].mxu1 }
0x14b3   : > { %v4656_v25 = vadd.f32 %v4655_v37, %v3559_v44 }
0x14b4   : > { %3571 = vst.msk [vmem:[%s225_s8 + $0x8] sm:$0xff] %vm553_vm2, %v4654_v22 }
0x14b5   : > { %3570 = vst.msk [vmem:[%s225_s8] sm:$0xff] %vm553_vm2, %v4656_v25 }
0x14b6 PF: > { %p14_p8 = scmp.ge.s32.totalorder %s5040_s22, 5   ;;  %s6165_s12 = smov %s4945_s13 }
0x14b7   : > { %s6166_s13 = smov %s4949_s14  ;;  %s6167_s14 = smov %s5066_s10 }
0x14b8   : > { %s6168_s15 = smov %s5040_s22  ;;  %16 = sbr.rel (!%p14_p8) target bundleno = 4 (0x4), region = 81 }
0x14bf   :  { %3593 = vsyncpa [#allocation4], 1 }
0x14c0   :  { %3595 = vsyncpa [#allocation4 + $0x1], 1 }
0x14c1   :  { %3596 = vsyncpa [#allocation6], 1 }
0x14c2   :  { %3598 = vsyncpa [#allocation6 + $0x1], 1 }

</bundles_post_ra>
